<compile_context>
chip_gen: v5e
topology: v5e:2x2
jax: 0.10.0
libtpu: 0.0.40
codegen_flags: <defaults>
</compile_context>

<pallas_src>
import math
import jax
import jax.numpy as jnp
from jax.experimental import pallas as pl
from jax.experimental.pallas import tpu as pltpu


# ----------------------------------------------------------------------------
# Fully fused DST kernel
# ----------------------------------------------------------------------------
def _make_dst_kernel(L, T, d, H, n_iter, mid):
    dh = d // H

    def layernorm(x, g, b):
        mu = jnp.mean(x, axis=-1, keepdims=True)
        var = jnp.mean(jnp.square(x - mu), axis=-1, keepdims=True)
        return (x - mu) * jax.lax.rsqrt(var + 1e-5) * g + b

    def kernel(x_ref,
               pw_ref, pb_ref, pos_ref,
               ln1g_ref, ln1b_ref,
               qw_ref, kw_ref, vw_ref, qb_ref, kb_ref, vb_ref,
               aw_ref, ab_ref, ln2g_ref, ln2b_ref,
               f1w_ref, f1b_ref, f2w_ref, f2b_ref,
               hw_ref, hb_ref,
               spw_ref, spb_ref, svw_ref, svb_ref, sow_ref, sob_ref,
               w1s_ref, w1t_ref, w1p_ref, b1_ref,
               w2_ref, b2_ref, dw_ref, db_ref,
               g_out_ref, s_out_ref):
        bf16 = jnp.bfloat16
        f32 = jnp.float32

        # ---- temporal (GMM) path -------------------------------------------------
        xb = x_ref[0].astype(bf16)                              # [T, 2048] cast in-kernel
        h = jnp.dot(xb, pw_ref[...], preferred_element_type=f32)
        h = h + pb_ref[...] + pos_ref[...]                      # [T, d]

        for l in range(L):                                      # static unroll over layers
            # ---- multi-head self attention ----
            hn = layernorm(h, ln1g_ref[l], ln1b_ref[l]).astype(bf16)
            # softmax scale is already folded into Wq / bq
            q = (jnp.dot(hn, qw_ref[l], preferred_element_type=f32) + qb_ref[l]).astype(bf16)
            k = (jnp.dot(hn, kw_ref[l], preferred_element_type=f32) + kb_ref[l]).astype(bf16)
            v = (jnp.dot(hn, vw_ref[l], preferred_element_type=f32) + vb_ref[l]).astype(bf16)
            heads = []
            for hd in range(H):                                 # static unroll over heads
                sl = slice(hd * dh, (hd + 1) * dh)
                s = jax.lax.dot_general(q[:, sl], k[:, sl],
                                        (((1,), (1,)), ((), ())),
                                        preferred_element_type=f32)        # [T, T]
                s = s - jnp.max(s, axis=-1, keepdims=True)
                p = jnp.exp(s)
                p = p * pl.reciprocal(jnp.sum(p, axis=-1, keepdims=True), approx=True)
                heads.append(jnp.dot(p.astype(bf16), v[:, sl],
                                     preferred_element_type=f32))          # [T, dh]
            # lane-dense head merge + ONE output-projection matmul
            o = jnp.concatenate(heads, axis=-1).astype(bf16)                # [T, d]
            h = h + jnp.dot(o, aw_ref[l], preferred_element_type=f32) + ab_ref[l]

            # ---- MLP ----
            hn = layernorm(h, ln2g_ref[l], ln2b_ref[l]).astype(bf16)
            m = jnp.dot(hn, f1w_ref[l], preferred_element_type=f32) + f1b_ref[l]
            # TODO(synk): PyTorch nn.GELU defaults to exact erf; tanh approximation used here.
            m = jax.nn.gelu(m, approximate=True).astype(bf16)
            h = h + jnp.dot(m, f2w_ref[l], preferred_element_type=f32) + f2b_ref[l]

        # mean pool over time + SMPL head (init pose/shape/cam folded into the bias)
        pooled = jnp.mean(h, axis=0, keepdims=True).astype(bf16)            # [1, d]
        params_g = (jnp.dot(pooled, hw_ref[...], preferred_element_type=f32)
                    + hb_ref[...])                                          # [1, 157]
        g_out_ref[0] = params_g

        # ---- spatial branch --------------------------------------------------------
        # Length-1 sequence => softmax over a single key is 1 => attention == V proj.
        xm = xb[mid:mid + 1, :]                                             # [1, 2048]
        xs = (jnp.dot(xm, spw_ref[...], preferred_element_type=f32)
              + spb_ref[...]).astype(bf16)
        vsp = (jnp.dot(xs, svw_ref[...], preferred_element_type=f32)
               + svb_ref[...]).astype(bf16)
        spat = (jnp.dot(vsp, sow_ref[...], preferred_element_type=f32)
                + sob_ref[...]).astype(bf16)                                # [1, dm]

        # ---- IEF regressor (state kept on-chip across the unrolled iterations) ----
        # xc = cat([spat, temp, state]) @ W1 done as split matmuls; the feature part
        # is loop-invariant and hoisted out of the iterations.
        temp = h[mid:mid + 1, :].astype(bf16)                               # [1, d]
        pre = (jnp.dot(spat, w1s_ref[...], preferred_element_type=f32)
               + jnp.dot(temp, w1t_ref[...], preferred_element_type=f32)
               + b1_ref[...])                                               # [1, hid]
        state = params_g                                                    # [pose|shape|cam]
        for _ in range(n_iter):                                             # static unroll
            xc = jnp.maximum(
                pre + jnp.dot(state.astype(bf16), w1p_ref[...],
                              preferred_element_type=f32), 0.0)
            xc = jnp.maximum(
                jnp.dot(xc.astype(bf16), w2_ref[...],
                        preferred_element_type=f32) + b2_ref[...], 0.0)
            # fused [hid, 157] decoder head (pose|shape|cam in one lane-dense matmul)
            state = state + (jnp.dot(xc.astype(bf16), dw_ref[...],
                                     preferred_element_type=f32) + db_ref[...])
        s_out_ref[0] = state

    return kernel


def dst_fused(x, params):
    """Whole DST forward in one fused pallas_call.

    x: [B, T, 2048] f32 -> (params_g [B, 157], state [B, 157]) both f32.
    """
    B, T, Din = x.shape
    gp = params["gmm"]
    d = gp["proj_w"].shape[1]
    L = gp["qkv_w"].shape[0]
    H = params["num_head"]
    dm = params["s_proj_w"].shape[1]
    mid = params["seqlen"] // 2
    dh = d // H
    scale = 1.0 / math.sqrt(dh)
    bf16 = jnp.bfloat16

    # Fused temporal qkv -> separate lane-dense q/k/v slabs; fold softmax scale into q.
    qkv_w = gp["qkv_w"]                                 # [L, d, 3d]
    qkv_b = gp["qkv_b"]                                 # [L, 1, 3d]
    q_w = (qkv_w[:, :, :d] * scale).astype(bf16)
    k_w = qkv_w[:, :, d:2 * d].astype(bf16)
    v_w = qkv_w[:, :, 2 * d:].astype(bf16)
    q_b = qkv_b[:, :, :d] * scale
    k_b = qkv_b[:, :, d:2 * d]
    v_b = qkv_b[:, :, 2 * d:]

    # SMPL head bias with init pose/shape/cam folded in.
    head_bias = (gp["head_b"] + jnp.concatenate(
        [gp["init_pose"], gp["init_shape"], gp["init_cam"]])).reshape(1, 157)

    sp = params["spat"]
    reg = params["reg"]
    w1 = reg["fc1_w"]                                   # [dm + d + 157, hid]

    args = (
        x,                                              # [B, T, 2048] f32 (cast in-kernel)
        gp["proj_w"].astype(bf16), gp["proj_b"].reshape(1, d), gp["pos_emb"],
        gp["ln1_g"], gp["ln1_b"],
        q_w, k_w, v_w, q_b, k_b, v_b,
        gp["attn_proj_w"].astype(bf16), gp["attn_proj_b"],
        gp["ln2_g"], gp["ln2_b"],
        gp["fc1_w"].astype(bf16), gp["fc1_b"],
        gp["fc2_w"].astype(bf16), gp["fc2_b"],
        gp["head_w"].astype(bf16), head_bias,
        params["s_proj_w"].astype(bf16), params["s_proj_b"].reshape(1, dm),
        sp["qkv_w"][:, 2 * dm:].astype(bf16),           # V slice of fused spatial qkv
        sp["qkv_b"][2 * dm:].reshape(1, dm),
        sp["proj_w"].astype(bf16), sp["proj_b"].reshape(1, dm),
        w1[:dm].astype(bf16), w1[dm:dm + d].astype(bf16), w1[dm + d:].astype(bf16),
        reg["fc1_b"].reshape(1, -1),
        reg["fc2_w"].astype(bf16), reg["fc2_b"].reshape(1, -1),
        reg["dec_w"].astype(bf16), reg["dec_b"].reshape(1, -1),
    )

    def shared(a):
        nd = a.ndim
        return pl.BlockSpec(a.shape, lambda b: (0,) * nd)

    in_specs = ([pl.BlockSpec((1, T, Din), lambda b: (b, 0, 0))]
                + [shared(a) for a in args[1:]])

    params_g, state = pl.pallas_call(
        _make_dst_kernel(L=L, T=T, d=d, H=H, n_iter=3, mid=mid),
        grid=(B,),
        out_shape=(jax.ShapeDtypeStruct((B, 1, 157), jnp.float32),
                   jax.ShapeDtypeStruct((B, 1, 157), jnp.float32)),
        in_specs=in_specs,
        out_specs=(pl.BlockSpec((1, 1, 157), lambda b: (b, 0, 0)),
                   pl.BlockSpec((1, 1, 157), lambda b: (b, 0, 0))),
        compiler_params=pltpu.CompilerParams(
            dimension_semantics=("parallel",),
            vmem_limit_bytes=48 * 1024 * 1024),
    )(*args)
    return params_g.reshape(B, 157), state.reshape(B, 157)


# ----------------------------------------------------------------------------
# Plain-JAX glue
# ----------------------------------------------------------------------------
def rot6d_to_rotmat(x):
    """x: [B, 24*6] -> [B*24, 3, 3]."""
    x = x.reshape(-1, 3, 2)
    a1, a2 = x[:, :, 0], x[:, :, 1]
    b1 = a1 / jnp.maximum(jnp.linalg.norm(a1, axis=-1, keepdims=True), 1e-8)
    b2 = a2 - jnp.sum(b1 * a2, axis=-1, keepdims=True) * b1
    b2 = b2 / jnp.maximum(jnp.linalg.norm(b2, axis=-1, keepdims=True), 1e-8)
    b3 = jnp.cross(b1, b2)
    return jnp.stack([b1, b2, b3], axis=-1)


def _smpl_placeholder(B, theta, rotmat):
    # TODO(synk): SMPL mesh recovery (verts / kp_3d / kp_2d) needs the external SMPL
    # blend-shape model; zero placeholders with the correct shapes are emitted instead.
    return {
        "theta": theta,
        "rotmat": rotmat,
        "verts": jnp.zeros((B, 6890, 3), jnp.float32),
        "kp_3d": jnp.zeros((B, 49, 3), jnp.float32),
        "kp_2d": jnp.zeros((B, 49, 2), jnp.float32),
        "scores": None,
    }


def dst_forward(x, params, is_train=False):
    """Mirror of DST.forward.  x: [B, T, 2048]."""
    B, T, _ = x.shape

    # One fused pallas_call for temporal GMM + spatial branch + IEF regressor.
    params_g, state = dst_fused(x, params)

    # ---- global (temporal) estimate ----
    pred_pose_g = params_g[:, :144]
    pred_shape_g = params_g[:, 144:154]
    pred_cam_g = params_g[:, 154:157]
    theta_g = jnp.concatenate([pred_cam_g, pred_pose_g, pred_shape_g], axis=-1)
    rotmat_g = rot6d_to_rotmat(pred_pose_g).reshape(B, 24, 3, 3)
    smpl_output_global = [_smpl_placeholder(B, theta_g, rotmat_g)]
    mask_ids = None                                            # mask_ratio = 0.0

    # ---- refined (spatial + IEF) estimate ----
    pred_pose = state[:, :144]
    pred_shape = state[:, 144:154]
    pred_cam = state[:, 154:157]
    theta = jnp.concatenate([pred_cam, pred_pose, pred_shape], axis=-1)
    rotmat = rot6d_to_rotmat(pred_pose).reshape(B, 24, 3, 3)
    smpl_output = [_smpl_placeholder(B, theta, rotmat)]

    scores = None
    if not is_train:
        for s in smpl_output:
            s["theta"] = s["theta"].reshape(B, -1)
            s["verts"] = s["verts"].reshape(B, -1, 3)
            s["kp_2d"] = s["kp_2d"].reshape(B, -1, 2)
            s["kp_3d"] = s["kp_3d"].reshape(B, -1, 3)
            s["rotmat"] = s["rotmat"].reshape(B, -1, 3, 3)
            s["scores"] = scores
    else:
        size = 1
        for s in smpl_output:
            s["theta"] = s["theta"].reshape(B, size, -1)
            s["verts"] = s["verts"].reshape(B, size, -1, 3)
            s["kp_2d"] = s["kp_2d"].reshape(B, size, -1, 2)
            s["kp_3d"] = s["kp_3d"].reshape(B, size, -1, 3)
            s["rotmat"] = s["rotmat"].reshape(B, size, -1, 3, 3)
            s["scores"] = scores
    return smpl_output, mask_ids, smpl_output_global


# ----------------------------------------------------------------------------
# Deterministic parameter init (stacked per-layer weights for the fused kernel)
# ----------------------------------------------------------------------------
def init_params(key, *, seqlen, d_model, n_layers, num_head, in_dim=2048):
    d = d_model // 2
    keys = iter(jax.random.split(key, 32))

    def nrm(shape, scale=0.02):
        return scale * jax.random.normal(next(keys), shape, dtype=jnp.float32)

    gmm = {
        "proj_w": nrm((in_dim, d)),
        "proj_b": jnp.zeros((d,), jnp.float32),
        "pos_emb": nrm((seqlen, d)),
        "ln1_g": jnp.ones((n_layers, 1, d), jnp.float32),
        "ln1_b": jnp.zeros((n_layers, 1, d), jnp.float32),
        "qkv_w": nrm((n_layers, d, 3 * d)),
        "qkv_b": jnp.zeros((n_layers, 1, 3 * d), jnp.float32),
        "attn_proj_w": nrm((n_layers, d, d)),
        "attn_proj_b": jnp.zeros((n_layers, 1, d), jnp.float32),
        "ln2_g": jnp.ones((n_layers, 1, d), jnp.float32),
        "ln2_b": jnp.zeros((n_layers, 1, d), jnp.float32),
        "fc1_w": nrm((n_layers, d, 4 * d)),
        "fc1_b": jnp.zeros((n_layers, 1, 4 * d), jnp.float32),
        "fc2_w": nrm((n_layers, 4 * d, d)),
        "fc2_b": jnp.zeros((n_layers, 1, d), jnp.float32),
        "head_w": nrm((d, 157)),
        "head_b": jnp.zeros((157,), jnp.float32),
        "init_pose": jnp.tile(jnp.array([1., 0., 0., 0., 1., 0.], jnp.float32), 24),
        "init_shape": jnp.zeros((10,), jnp.float32),
        "init_cam": jnp.array([0.9, 0.0, 0.0], jnp.float32),
    }

    hid = 256
    params = {
        "seqlen": seqlen, "num_head": num_head, "d_model": d_model,
        "gmm": gmm,
        "s_proj_w": nrm((in_dim, d_model)),
        "s_proj_b": jnp.zeros((d_model,), jnp.float32),
        "spat": {
            "qkv_w": nrm((d_model, 3 * d_model)),
            "qkv_b": jnp.zeros((3 * d_model,), jnp.float32),
            "proj_w": nrm((d_model, d_model)),
            "proj_b": jnp.zeros((d_model,), jnp.float32),
        },
        # regressor: fc1 input = feature(d_model + d_model//2) + pose(144)+shape(10)+cam(3)
        "reg": {
            "fc1_w": nrm((d_model + d + 157, hid)),
            "fc1_b": jnp.zeros((hid,), jnp.float32),
            "fc2_w": nrm((hid, hid)),
            "fc2_b": jnp.zeros((hid,), jnp.float32),
            "dec_w": nrm((hid, 157), scale=0.01),   # [decpose|decshape|deccam] fused
            "dec_b": jnp.zeros((157,), jnp.float32),
        },
    }
    return params


# ----------------------------------------------------------------------------
if __name__ == "__main__":
    B, seqlen, in_dim = 2, 8, 2048
    d_model, n_layers, num_head = 64, 2, 4

    key = jax.random.PRNGKey(0)
    k_x, k_p = jax.random.split(key)
    x = jax.random.normal(k_x, (B, seqlen, in_dim), dtype=jnp.float32)
    params = init_params(k_p, seqlen=seqlen, d_model=d_model,
                         n_layers=n_layers, num_head=num_head, in_dim=in_dim)

    fwd = jax.jit(lambda xx: dst_forward(xx, params, is_train=False))
    smpl_output, mask_ids, smpl_output_global = fwd(x)

    jax.block_until_ready(smpl_output[0]["theta"])
    jax.block_until_ready(smpl_output[0]["rotmat"])
    jax.block_until_ready(smpl_output_global[0]["theta"])

    assert smpl_output[0]["theta"].shape == (B, 157)
    assert smpl_output[0]["rotmat"].shape == (B, 24, 3, 3)
    assert smpl_output_global[0]["theta"].shape == (B, 157)
    print("KERNEL_OK")
</pallas_src>

<mosaic_0001>
module attributes {stable_mosaic.version = 11 : i64} {
  func.func @kernel(%arg0: i32, %arg1: memref<1x8x2048xf32, #tpu.memory_space<vmem>>, %arg2: memref<2048x32xbf16, #tpu.memory_space<vmem>>, %arg3: memref<1x32xf32, #tpu.memory_space<vmem>>, %arg4: memref<8x32xf32, #tpu.memory_space<vmem>>, %arg5: memref<2x1x32xf32, #tpu.memory_space<vmem>>, %arg6: memref<2x1x32xf32, #tpu.memory_space<vmem>>, %arg7: memref<2x32x32xbf16, #tpu.memory_space<vmem>>, %arg8: memref<2x32x32xbf16, #tpu.memory_space<vmem>>, %arg9: memref<2x32x32xbf16, #tpu.memory_space<vmem>>, %arg10: memref<2x1x32xf32, #tpu.memory_space<vmem>>, %arg11: memref<2x1x32xf32, #tpu.memory_space<vmem>>, %arg12: memref<2x1x32xf32, #tpu.memory_space<vmem>>, %arg13: memref<2x32x32xbf16, #tpu.memory_space<vmem>>, %arg14: memref<2x1x32xf32, #tpu.memory_space<vmem>>, %arg15: memref<2x1x32xf32, #tpu.memory_space<vmem>>, %arg16: memref<2x1x32xf32, #tpu.memory_space<vmem>>, %arg17: memref<2x32x128xbf16, #tpu.memory_space<vmem>>, %arg18: memref<2x1x128xf32, #tpu.memory_space<vmem>>, %arg19: memref<2x128x32xbf16, #tpu.memory_space<vmem>>, %arg20: memref<2x1x32xf32, #tpu.memory_space<vmem>>, %arg21: memref<32x157xbf16, #tpu.memory_space<vmem>>, %arg22: memref<1x157xf32, #tpu.memory_space<vmem>>, %arg23: memref<2048x64xbf16, #tpu.memory_space<vmem>>, %arg24: memref<1x64xf32, #tpu.memory_space<vmem>>, %arg25: memref<64x64xbf16, #tpu.memory_space<vmem>>, %arg26: memref<1x64xf32, #tpu.memory_space<vmem>>, %arg27: memref<64x64xbf16, #tpu.memory_space<vmem>>, %arg28: memref<1x64xf32, #tpu.memory_space<vmem>>, %arg29: memref<64x256xbf16, #tpu.memory_space<vmem>>, %arg30: memref<32x256xbf16, #tpu.memory_space<vmem>>, %arg31: memref<157x256xbf16, #tpu.memory_space<vmem>>, %arg32: memref<1x256xf32, #tpu.memory_space<vmem>>, %arg33: memref<256x256xbf16, #tpu.memory_space<vmem>>, %arg34: memref<1x256xf32, #tpu.memory_space<vmem>>, %arg35: memref<256x157xbf16, #tpu.memory_space<vmem>>, %arg36: memref<1x157xf32, #tpu.memory_space<vmem>>, %arg37: memref<1x1x157xf32, #tpu.memory_space<vmem>>, %arg38: memref<1x1x157xf32, #tpu.memory_space<vmem>>) attributes {dimension_semantics = [#tpu.dimension_semantics<parallel>], iteration_bounds = array<i64: 2>, scalar_prefetch = 0 : i64, scratch_operands = 0 : i64, tpu.core_type = #tpu.core_type<tc>, window_params = [{transform_indices = @transform_0, window_bounds = array<i64: 1, 8, 2048>}, {pipeline_mode = #tpu.pipeline_mode<synchronous>, transform_indices = @transform_1, window_bounds = array<i64: 2048, 32>}, {pipeline_mode = #tpu.pipeline_mode<synchronous>, transform_indices = @transform_2, window_bounds = array<i64: 1, 32>}, {pipeline_mode = #tpu.pipeline_mode<synchronous>, transform_indices = @transform_3, window_bounds = array<i64: 8, 32>}, {pipeline_mode = #tpu.pipeline_mode<synchronous>, transform_indices = @transform_4, window_bounds = array<i64: 2, 1, 32>}, {pipeline_mode = #tpu.pipeline_mode<synchronous>, transform_indices = @transform_5, window_bounds = array<i64: 2, 1, 32>}, {pipeline_mode = #tpu.pipeline_mode<synchronous>, transform_indices = @transform_6, window_bounds = array<i64: 2, 32, 32>}, {pipeline_mode = #tpu.pipeline_mode<synchronous>, transform_indices = @transform_7, window_bounds = array<i64: 2, 32, 32>}, {pipeline_mode = #tpu.pipeline_mode<synchronous>, transform_indices = @transform_8, window_bounds = array<i64: 2, 32, 32>}, {pipeline_mode = #tpu.pipeline_mode<synchronous>, transform_indices = @transform_9, window_bounds = array<i64: 2, 1, 32>}, {pipeline_mode = #tpu.pipeline_mode<synchronous>, transform_indices = @transform_10, window_bounds = array<i64: 2, 1, 32>}, {pipeline_mode = #tpu.pipeline_mode<synchronous>, transform_indices = @transform_11, window_bounds = array<i64: 2, 1, 32>}, {pipeline_mode = #tpu.pipeline_mode<synchronous>, transform_indices = @transform_12, window_bounds = array<i64: 2, 32, 32>}, {pipeline_mode = #tpu.pipeline_mode<synchronous>, transform_indices = @transform_13, window_bounds = array<i64: 2, 1, 32>}, {pipeline_mode = #tpu.pipeline_mode<synchronous>, transform_indices = @transform_14, window_bounds = array<i64: 2, 1, 32>}, {pipeline_mode = #tpu.pipeline_mode<synchronous>, transform_indices = @transform_15, window_bounds = array<i64: 2, 1, 32>}, {pipeline_mode = #tpu.pipeline_mode<synchronous>, transform_indices = @transform_16, window_bounds = array<i64: 2, 32, 128>}, {pipeline_mode = #tpu.pipeline_mode<synchronous>, transform_indices = @transform_17, window_bounds = array<i64: 2, 1, 128>}, {pipeline_mode = #tpu.pipeline_mode<synchronous>, transform_indices = @transform_18, window_bounds = array<i64: 2, 128, 32>}, {pipeline_mode = #tpu.pipeline_mode<synchronous>, transform_indices = @transform_19, window_bounds = array<i64: 2, 1, 32>}, {pipeline_mode = #tpu.pipeline_mode<synchronous>, transform_indices = @transform_20, window_bounds = array<i64: 32, 157>}, {pipeline_mode = #tpu.pipeline_mode<synchronous>, transform_indices = @transform_21, window_bounds = array<i64: 1, 157>}, {pipeline_mode = #tpu.pipeline_mode<synchronous>, transform_indices = @transform_22, window_bounds = array<i64: 2048, 64>}, {pipeline_mode = #tpu.pipeline_mode<synchronous>, transform_indices = @transform_23, window_bounds = array<i64: 1, 64>}, {pipeline_mode = #tpu.pipeline_mode<synchronous>, transform_indices = @transform_24, window_bounds = array<i64: 64, 64>}, {pipeline_mode = #tpu.pipeline_mode<synchronous>, transform_indices = @transform_25, window_bounds = array<i64: 1, 64>}, {pipeline_mode = #tpu.pipeline_mode<synchronous>, transform_indices = @transform_26, window_bounds = array<i64: 64, 64>}, {pipeline_mode = #tpu.pipeline_mode<synchronous>, transform_indices = @transform_27, window_bounds = array<i64: 1, 64>}, {pipeline_mode = #tpu.pipeline_mode<synchronous>, transform_indices = @transform_28, window_bounds = array<i64: 64, 256>}, {pipeline_mode = #tpu.pipeline_mode<synchronous>, transform_indices = @transform_29, window_bounds = array<i64: 32, 256>}, {pipeline_mode = #tpu.pipeline_mode<synchronous>, transform_indices = @transform_30, window_bounds = array<i64: 157, 256>}, {pipeline_mode = #tpu.pipeline_mode<synchronous>, transform_indices = @transform_31, window_bounds = array<i64: 1, 256>}, {pipeline_mode = #tpu.pipeline_mode<synchronous>, transform_indices = @transform_32, window_bounds = array<i64: 256, 256>}, {pipeline_mode = #tpu.pipeline_mode<synchronous>, transform_indices = @transform_33, window_bounds = array<i64: 1, 256>}, {pipeline_mode = #tpu.pipeline_mode<synchronous>, transform_indices = @transform_34, window_bounds = array<i64: 256, 157>}, {pipeline_mode = #tpu.pipeline_mode<synchronous>, transform_indices = @transform_35, window_bounds = array<i64: 1, 157>}, {transform_indices = @transform_36, window_bounds = array<i64: 1, 1, 157>}, {transform_indices = @transform_37, window_bounds = array<i64: 1, 1, 157>}]} {
    %c0 = arith.constant 0 : index
    %c0_0 = arith.constant 0 : index
    %c0_1 = arith.constant 0 : index
    %0 = vector.load %arg1[%c0, %c0_0, %c0_1] : memref<1x8x2048xf32, #tpu.memory_space<vmem>>, vector<1x8x2048xf32>
    %1 = vector.shape_cast %0 : vector<1x8x2048xf32> to vector<8x2048xf32>
    %2 = arith.truncf %1 : vector<8x2048xf32> to vector<8x2048xbf16>
    %c0_2 = arith.constant 0 : index
    %c0_3 = arith.constant 0 : index
    %3 = vector.load %arg2[%c0_2, %c0_3] : memref<2048x32xbf16, #tpu.memory_space<vmem>>, vector<2048x32xbf16>
    %cst = arith.constant dense<0.000000e+00> : vector<8x32xf32>
    %4 = tpu.matmul %2, %3, %cst {dimension_numbers = #tpu.dot_dimension_numbers<[1], [0], [0], [1], [0, 0, 1, 1], [], []>} : vector<8x2048xbf16>, vector<2048x32xbf16>, vector<8x32xf32> -> vector<8x32xf32>
    %c0_4 = arith.constant 0 : index
    %c0_5 = arith.constant 0 : index
    %5 = vector.load %arg3[%c0_4, %c0_5] : memref<1x32xf32, #tpu.memory_space<vmem>>, vector<1x32xf32>
    %6 = vector.broadcast %5 : vector<1x32xf32> to vector<8x32xf32>
    %7 = arith.addf %4, %6 : vector<8x32xf32>
    %c0_6 = arith.constant 0 : index
    %c0_7 = arith.constant 0 : index
    %8 = vector.load %arg4[%c0_6, %c0_7] : memref<8x32xf32, #tpu.memory_space<vmem>>, vector<8x32xf32>
    %9 = arith.addf %7, %8 : vector<8x32xf32>
    %c0_8 = arith.constant 0 : index
    %c0_9 = arith.constant 0 : index
    %c0_10 = arith.constant 0 : index
    %10 = vector.load %arg5[%c0_8, %c0_9, %c0_10] : memref<2x1x32xf32, #tpu.memory_space<vmem>>, vector<1x1x32xf32>
    %11 = vector.shape_cast %10 : vector<1x1x32xf32> to vector<1x32xf32>
    %c0_11 = arith.constant 0 : index
    %c0_12 = arith.constant 0 : index
    %c0_13 = arith.constant 0 : index
    %12 = vector.load %arg6[%c0_11, %c0_12, %c0_13] : memref<2x1x32xf32, #tpu.memory_space<vmem>>, vector<1x1x32xf32>
    %13 = vector.shape_cast %12 : vector<1x1x32xf32> to vector<1x32xf32>
    %cst_14 = arith.constant dense<0.000000e+00> : vector<8xf32>
    %14 = vector.multi_reduction <add>, %9, %cst_14 [1] : vector<8x32xf32> to vector<8xf32>
    %15 = vector.shape_cast %14 : vector<8xf32> to vector<8x1xf32>
    %cst_15 = arith.constant 3.200000e+01 : f32
    %16 = vector.broadcast %cst_15 : f32 to vector<8x1xf32>
    %17 = arith.divf %15, %16 : vector<8x1xf32>
    %18 = vector.broadcast %17 : vector<8x1xf32> to vector<8x32xf32>
    %19 = arith.subf %9, %18 : vector<8x32xf32>
    %20 = arith.mulf %19, %19 : vector<8x32xf32>
    %cst_16 = arith.constant dense<0.000000e+00> : vector<8xf32>
    %21 = vector.multi_reduction <add>, %20, %cst_16 [1] : vector<8x32xf32> to vector<8xf32>
    %22 = vector.shape_cast %21 : vector<8xf32> to vector<8x1xf32>
    %cst_17 = arith.constant 3.200000e+01 : f32
    %23 = vector.broadcast %cst_17 : f32 to vector<8x1xf32>
    %24 = arith.divf %22, %23 : vector<8x1xf32>
    %25 = vector.broadcast %17 : vector<8x1xf32> to vector<8x32xf32>
    %26 = arith.subf %9, %25 : vector<8x32xf32>
    %cst_18 = arith.constant 9.99999974E-6 : f32
    %27 = vector.broadcast %cst_18 : f32 to vector<8x1xf32>
    %28 = arith.addf %24, %27 : vector<8x1xf32>
    %29 = math.rsqrt %28 : vector<8x1xf32>
    %30 = vector.broadcast %29 : vector<8x1xf32> to vector<8x32xf32>
    %31 = arith.mulf %26, %30 : vector<8x32xf32>
    %32 = vector.broadcast %11 : vector<1x32xf32> to vector<8x32xf32>
    %33 = arith.mulf %31, %32 : vector<8x32xf32>
    %34 = vector.broadcast %13 : vector<1x32xf32> to vector<8x32xf32>
    %35 = arith.addf %33, %34 : vector<8x32xf32>
    %36 = arith.truncf %35 : vector<8x32xf32> to vector<8x32xbf16>
    %c0_19 = arith.constant 0 : index
    %c0_20 = arith.constant 0 : index
    %c0_21 = arith.constant 0 : index
    %37 = vector.load %arg7[%c0_19, %c0_20, %c0_21] : memref<2x32x32xbf16, #tpu.memory_space<vmem>>, vector<1x32x32xbf16>
    %38 = vector.shape_cast %37 : vector<1x32x32xbf16> to vector<32x32xbf16>
    %cst_22 = arith.constant dense<0.000000e+00> : vector<8x32xf32>
    %39 = tpu.matmul %36, %38, %cst_22 {dimension_numbers = #tpu.dot_dimension_numbers<[1], [0], [0], [1], [0, 0, 1, 1], [], []>} : vector<8x32xbf16>, vector<32x32xbf16>, vector<8x32xf32> -> vector<8x32xf32>
    %c0_23 = arith.constant 0 : index
    %c0_24 = arith.constant 0 : index
    %c0_25 = arith.constant 0 : index
    %40 = vector.load %arg10[%c0_23, %c0_24, %c0_25] : memref<2x1x32xf32, #tpu.memory_space<vmem>>, vector<1x1x32xf32>
    %41 = vector.shape_cast %40 : vector<1x1x32xf32> to vector<1x32xf32>
    %42 = vector.broadcast %41 : vector<1x32xf32> to vector<8x32xf32>
    %43 = arith.addf %39, %42 : vector<8x32xf32>
    %44 = arith.truncf %43 : vector<8x32xf32> to vector<8x32xbf16>
    %c0_26 = arith.constant 0 : index
    %c0_27 = arith.constant 0 : index
    %c0_28 = arith.constant 0 : index
    %45 = vector.load %arg8[%c0_26, %c0_27, %c0_28] : memref<2x32x32xbf16, #tpu.memory_space<vmem>>, vector<1x32x32xbf16>
    %46 = vector.shape_cast %45 : vector<1x32x32xbf16> to vector<32x32xbf16>
    %cst_29 = arith.constant dense<0.000000e+00> : vector<8x32xf32>
    %47 = tpu.matmul %36, %46, %cst_29 {dimension_numbers = #tpu.dot_dimension_numbers<[1], [0], [0], [1], [0, 0, 1, 1], [], []>} : vector<8x32xbf16>, vector<32x32xbf16>, vector<8x32xf32> -> vector<8x32xf32>
    %c0_30 = arith.constant 0 : index
    %c0_31 = arith.constant 0 : index
    %c0_32 = arith.constant 0 : index
    %48 = vector.load %arg11[%c0_30, %c0_31, %c0_32] : memref<2x1x32xf32, #tpu.memory_space<vmem>>, vector<1x1x32xf32>
    %49 = vector.shape_cast %48 : vector<1x1x32xf32> to vector<1x32xf32>
    %50 = vector.broadcast %49 : vector<1x32xf32> to vector<8x32xf32>
    %51 = arith.addf %47, %50 : vector<8x32xf32>
    %52 = arith.truncf %51 : vector<8x32xf32> to vector<8x32xbf16>
    %c0_33 = arith.constant 0 : index
    %c0_34 = arith.constant 0 : index
    %c0_35 = arith.constant 0 : index
    %53 = vector.load %arg9[%c0_33, %c0_34, %c0_35] : memref<2x32x32xbf16, #tpu.memory_space<vmem>>, vector<1x32x32xbf16>
    %54 = vector.shape_cast %53 : vector<1x32x32xbf16> to vector<32x32xbf16>
    %cst_36 = arith.constant dense<0.000000e+00> : vector<8x32xf32>
    %55 = tpu.matmul %36, %54, %cst_36 {dimension_numbers = #tpu.dot_dimension_numbers<[1], [0], [0], [1], [0, 0, 1, 1], [], []>} : vector<8x32xbf16>, vector<32x32xbf16>, vector<8x32xf32> -> vector<8x32xf32>
    %c0_37 = arith.constant 0 : index
    %c0_38 = arith.constant 0 : index
    %c0_39 = arith.constant 0 : index
    %56 = vector.load %arg12[%c0_37, %c0_38, %c0_39] : memref<2x1x32xf32, #tpu.memory_space<vmem>>, vector<1x1x32xf32>
    %57 = vector.shape_cast %56 : vector<1x1x32xf32> to vector<1x32xf32>
    %58 = vector.broadcast %57 : vector<1x32xf32> to vector<8x32xf32>
    %59 = arith.addf %55, %58 : vector<8x32xf32>
    %60 = arith.truncf %59 : vector<8x32xf32> to vector<8x32xbf16>
    %61 = vector.extract_strided_slice %44 {offsets = [0, 0], sizes = [8, 8], strides = [1, 1]} : vector<8x32xbf16> to vector<8x8xbf16>
    %62 = vector.extract_strided_slice %52 {offsets = [0, 0], sizes = [8, 8], strides = [1, 1]} : vector<8x32xbf16> to vector<8x8xbf16>
    %cst_40 = arith.constant dense<0.000000e+00> : vector<8x8xf32>
    %63 = tpu.matmul %61, %62, %cst_40 {dimension_numbers = #tpu.dot_dimension_numbers<[1], [1], [0], [0], [0, 0, 1, 0], [], []>} : vector<8x8xbf16>, vector<8x8xbf16>, vector<8x8xf32> -> vector<8x8xf32>
    %cst_41 = arith.constant dense<0xFF800000> : vector<8xf32>
    %64 = vector.multi_reduction <maximumf>, %63, %cst_41 [1] : vector<8x8xf32> to vector<8xf32>
    %65 = vector.shape_cast %64 : vector<8xf32> to vector<8x1xf32>
    %66 = vector.broadcast %65 : vector<8x1xf32> to vector<8x8xf32>
    %67 = arith.subf %63, %66 : vector<8x8xf32>
    %68 = math.exp %67 : vector<8x8xf32>
    %cst_42 = arith.constant dense<0.000000e+00> : vector<8xf32>
    %69 = vector.multi_reduction <add>, %68, %cst_42 [1] : vector<8x8xf32> to vector<8xf32>
    %70 = vector.shape_cast %69 : vector<8xf32> to vector<8x1xf32>
    %71 = tpu.reciprocal %70 {approx = true} : vector<8x1xf32> -> vector<8x1xf32>
    %72 = vector.broadcast %71 : vector<8x1xf32> to vector<8x8xf32>
    %73 = arith.mulf %68, %72 : vector<8x8xf32>
    %74 = arith.truncf %73 : vector<8x8xf32> to vector<8x8xbf16>
    %75 = vector.extract_strided_slice %60 {offsets = [0, 0], sizes = [8, 8], strides = [1, 1]} : vector<8x32xbf16> to vector<8x8xbf16>
    %cst_43 = arith.constant dense<0.000000e+00> : vector<8x8xf32>
    %76 = tpu.matmul %74, %75, %cst_43 {dimension_numbers = #tpu.dot_dimension_numbers<[1], [0], [0], [1], [0, 0, 1, 1], [], []>} : vector<8x8xbf16>, vector<8x8xbf16>, vector<8x8xf32> -> vector<8x8xf32>
    %77 = vector.extract_strided_slice %44 {offsets = [0, 8], sizes = [8, 8], strides = [1, 1]} : vector<8x32xbf16> to vector<8x8xbf16>
    %78 = vector.extract_strided_slice %52 {offsets = [0, 8], sizes = [8, 8], strides = [1, 1]} : vector<8x32xbf16> to vector<8x8xbf16>
    %cst_44 = arith.constant dense<0.000000e+00> : vector<8x8xf32>
    %79 = tpu.matmul %77, %78, %cst_44 {dimension_numbers = #tpu.dot_dimension_numbers<[1], [1], [0], [0], [0, 0, 1, 0], [], []>} : vector<8x8xbf16>, vector<8x8xbf16>, vector<8x8xf32> -> vector<8x8xf32>
    %cst_45 = arith.constant dense<0xFF800000> : vector<8xf32>
    %80 = vector.multi_reduction <maximumf>, %79, %cst_45 [1] : vector<8x8xf32> to vector<8xf32>
    %81 = vector.shape_cast %80 : vector<8xf32> to vector<8x1xf32>
    %82 = vector.broadcast %81 : vector<8x1xf32> to vector<8x8xf32>
    %83 = arith.subf %79, %82 : vector<8x8xf32>
    %84 = math.exp %83 : vector<8x8xf32>
    %cst_46 = arith.constant dense<0.000000e+00> : vector<8xf32>
    %85 = vector.multi_reduction <add>, %84, %cst_46 [1] : vector<8x8xf32> to vector<8xf32>
    %86 = vector.shape_cast %85 : vector<8xf32> to vector<8x1xf32>
    %87 = tpu.reciprocal %86 {approx = true} : vector<8x1xf32> -> vector<8x1xf32>
    %88 = vector.broadcast %87 : vector<8x1xf32> to vector<8x8xf32>
    %89 = arith.mulf %84, %88 : vector<8x8xf32>
    %90 = arith.truncf %89 : vector<8x8xf32> to vector<8x8xbf16>
    %91 = vector.extract_strided_slice %60 {offsets = [0, 8], sizes = [8, 8], strides = [1, 1]} : vector<8x32xbf16> to vector<8x8xbf16>
    %cst_47 = arith.constant dense<0.000000e+00> : vector<8x8xf32>
    %92 = tpu.matmul %90, %91, %cst_47 {dimension_numbers = #tpu.dot_dimension_numbers<[1], [0], [0], [1], [0, 0, 1, 1], [], []>} : vector<8x8xbf16>, vector<8x8xbf16>, vector<8x8xf32> -> vector<8x8xf32>
    %93 = vector.extract_strided_slice %44 {offsets = [0, 16], sizes = [8, 8], strides = [1, 1]} : vector<8x32xbf16> to vector<8x8xbf16>
    %94 = vector.extract_strided_slice %52 {offsets = [0, 16], sizes = [8, 8], strides = [1, 1]} : vector<8x32xbf16> to vector<8x8xbf16>
    %cst_48 = arith.constant dense<0.000000e+00> : vector<8x8xf32>
    %95 = tpu.matmul %93, %94, %cst_48 {dimension_numbers = #tpu.dot_dimension_numbers<[1], [1], [0], [0], [0, 0, 1, 0], [], []>} : vector<8x8xbf16>, vector<8x8xbf16>, vector<8x8xf32> -> vector<8x8xf32>
    %cst_49 = arith.constant dense<0xFF800000> : vector<8xf32>
    %96 = vector.multi_reduction <maximumf>, %95, %cst_49 [1] : vector<8x8xf32> to vector<8xf32>
    %97 = vector.shape_cast %96 : vector<8xf32> to vector<8x1xf32>
    %98 = vector.broadcast %97 : vector<8x1xf32> to vector<8x8xf32>
    %99 = arith.subf %95, %98 : vector<8x8xf32>
    %100 = math.exp %99 : vector<8x8xf32>
    %cst_50 = arith.constant dense<0.000000e+00> : vector<8xf32>
    %101 = vector.multi_reduction <add>, %100, %cst_50 [1] : vector<8x8xf32> to vector<8xf32>
    %102 = vector.shape_cast %101 : vector<8xf32> to vector<8x1xf32>
    %103 = tpu.reciprocal %102 {approx = true} : vector<8x1xf32> -> vector<8x1xf32>
    %104 = vector.broadcast %103 : vector<8x1xf32> to vector<8x8xf32>
    %105 = arith.mulf %100, %104 : vector<8x8xf32>
    %106 = arith.truncf %105 : vector<8x8xf32> to vector<8x8xbf16>
    %107 = vector.extract_strided_slice %60 {offsets = [0, 16], sizes = [8, 8], strides = [1, 1]} : vector<8x32xbf16> to vector<8x8xbf16>
    %cst_51 = arith.constant dense<0.000000e+00> : vector<8x8xf32>
    %108 = tpu.matmul %106, %107, %cst_51 {dimension_numbers = #tpu.dot_dimension_numbers<[1], [0], [0], [1], [0, 0, 1, 1], [], []>} : vector<8x8xbf16>, vector<8x8xbf16>, vector<8x8xf32> -> vector<8x8xf32>
    %109 = vector.extract_strided_slice %44 {offsets = [0, 24], sizes = [8, 8], strides = [1, 1]} : vector<8x32xbf16> to vector<8x8xbf16>
    %110 = vector.extract_strided_slice %52 {offsets = [0, 24], sizes = [8, 8], strides = [1, 1]} : vector<8x32xbf16> to vector<8x8xbf16>
    %cst_52 = arith.constant dense<0.000000e+00> : vector<8x8xf32>
    %111 = tpu.matmul %109, %110, %cst_52 {dimension_numbers = #tpu.dot_dimension_numbers<[1], [1], [0], [0], [0, 0, 1, 0], [], []>} : vector<8x8xbf16>, vector<8x8xbf16>, vector<8x8xf32> -> vector<8x8xf32>
    %cst_53 = arith.constant dense<0xFF800000> : vector<8xf32>
    %112 = vector.multi_reduction <maximumf>, %111, %cst_53 [1] : vector<8x8xf32> to vector<8xf32>
    %113 = vector.shape_cast %112 : vector<8xf32> to vector<8x1xf32>
    %114 = vector.broadcast %113 : vector<8x1xf32> to vector<8x8xf32>
    %115 = arith.subf %111, %114 : vector<8x8xf32>
    %116 = math.exp %115 : vector<8x8xf32>
    %cst_54 = arith.constant dense<0.000000e+00> : vector<8xf32>
    %117 = vector.multi_reduction <add>, %116, %cst_54 [1] : vector<8x8xf32> to vector<8xf32>
    %118 = vector.shape_cast %117 : vector<8xf32> to vector<8x1xf32>
    %119 = tpu.reciprocal %118 {approx = true} : vector<8x1xf32> -> vector<8x1xf32>
    %120 = vector.broadcast %119 : vector<8x1xf32> to vector<8x8xf32>
    %121 = arith.mulf %116, %120 : vector<8x8xf32>
    %122 = arith.truncf %121 : vector<8x8xf32> to vector<8x8xbf16>
    %123 = vector.extract_strided_slice %60 {offsets = [0, 24], sizes = [8, 8], strides = [1, 1]} : vector<8x32xbf16> to vector<8x8xbf16>
    %cst_55 = arith.constant dense<0.000000e+00> : vector<8x8xf32>
    %124 = tpu.matmul %122, %123, %cst_55 {dimension_numbers = #tpu.dot_dimension_numbers<[1], [0], [0], [1], [0, 0, 1, 1], [], []>} : vector<8x8xbf16>, vector<8x8xbf16>, vector<8x8xf32> -> vector<8x8xf32>
    %125 = tpu.concatenate %76, %92, %108, %124 in 1 : vector<8x8xf32>, vector<8x8xf32>, vector<8x8xf32>, vector<8x8xf32> -> vector<8x32xf32>
    %126 = arith.truncf %125 : vector<8x32xf32> to vector<8x32xbf16>
    %c0_56 = arith.constant 0 : index
    %c0_57 = arith.constant 0 : index
    %c0_58 = arith.constant 0 : index
    %127 = vector.load %arg13[%c0_56, %c0_57, %c0_58] : memref<2x32x32xbf16, #tpu.memory_space<vmem>>, vector<1x32x32xbf16>
    %128 = vector.shape_cast %127 : vector<1x32x32xbf16> to vector<32x32xbf16>
    %cst_59 = arith.constant dense<0.000000e+00> : vector<8x32xf32>
    %129 = tpu.matmul %126, %128, %cst_59 {dimension_numbers = #tpu.dot_dimension_numbers<[1], [0], [0], [1], [0, 0, 1, 1], [], []>} : vector<8x32xbf16>, vector<32x32xbf16>, vector<8x32xf32> -> vector<8x32xf32>
    %130 = arith.addf %9, %129 : vector<8x32xf32>
    %c0_60 = arith.constant 0 : index
    %c0_61 = arith.constant 0 : index
    %c0_62 = arith.constant 0 : index
    %131 = vector.load %arg14[%c0_60, %c0_61, %c0_62] : memref<2x1x32xf32, #tpu.memory_space<vmem>>, vector<1x1x32xf32>
    %132 = vector.shape_cast %131 : vector<1x1x32xf32> to vector<1x32xf32>
    %133 = vector.broadcast %132 : vector<1x32xf32> to vector<8x32xf32>
    %134 = arith.addf %130, %133 : vector<8x32xf32>
    %c0_63 = arith.constant 0 : index
    %c0_64 = arith.constant 0 : index
    %c0_65 = arith.constant 0 : index
    %135 = vector.load %arg15[%c0_63, %c0_64, %c0_65] : memref<2x1x32xf32, #tpu.memory_space<vmem>>, vector<1x1x32xf32>
    %136 = vector.shape_cast %135 : vector<1x1x32xf32> to vector<1x32xf32>
    %c0_66 = arith.constant 0 : index
    %c0_67 = arith.constant 0 : index
    %c0_68 = arith.constant 0 : index
    %137 = vector.load %arg16[%c0_66, %c0_67, %c0_68] : memref<2x1x32xf32, #tpu.memory_space<vmem>>, vector<1x1x32xf32>
    %138 = vector.shape_cast %137 : vector<1x1x32xf32> to vector<1x32xf32>
    %cst_69 = arith.constant dense<0.000000e+00> : vector<8xf32>
    %139 = vector.multi_reduction <add>, %134, %cst_69 [1] : vector<8x32xf32> to vector<8xf32>
    %140 = vector.shape_cast %139 : vector<8xf32> to vector<8x1xf32>
    %cst_70 = arith.constant 3.200000e+01 : f32
    %141 = vector.broadcast %cst_70 : f32 to vector<8x1xf32>
    %142 = arith.divf %140, %141 : vector<8x1xf32>
    %143 = vector.broadcast %142 : vector<8x1xf32> to vector<8x32xf32>
    %144 = arith.subf %134, %143 : vector<8x32xf32>
    %145 = arith.mulf %144, %144 : vector<8x32xf32>
    %cst_71 = arith.constant dense<0.000000e+00> : vector<8xf32>
    %146 = vector.multi_reduction <add>, %145, %cst_71 [1] : vector<8x32xf32> to vector<8xf32>
    %147 = vector.shape_cast %146 : vector<8xf32> to vector<8x1xf32>
    %cst_72 = arith.constant 3.200000e+01 : f32
    %148 = vector.broadcast %cst_72 : f32 to vector<8x1xf32>
    %149 = arith.divf %147, %148 : vector<8x1xf32>
    %150 = vector.broadcast %142 : vector<8x1xf32> to vector<8x32xf32>
    %151 = arith.subf %134, %150 : vector<8x32xf32>
    %cst_73 = arith.constant 9.99999974E-6 : f32
    %152 = vector.broadcast %cst_73 : f32 to vector<8x1xf32>
    %153 = arith.addf %149, %152 : vector<8x1xf32>
    %154 = math.rsqrt %153 : vector<8x1xf32>
    %155 = vector.broadcast %154 : vector<8x1xf32> to vector<8x32xf32>
    %156 = arith.mulf %151, %155 : vector<8x32xf32>
    %157 = vector.broadcast %136 : vector<1x32xf32> to vector<8x32xf32>
    %158 = arith.mulf %156, %157 : vector<8x32xf32>
    %159 = vector.broadcast %138 : vector<1x32xf32> to vector<8x32xf32>
    %160 = arith.addf %158, %159 : vector<8x32xf32>
    %161 = arith.truncf %160 : vector<8x32xf32> to vector<8x32xbf16>
    %c0_74 = arith.constant 0 : index
    %c0_75 = arith.constant 0 : index
    %c0_76 = arith.constant 0 : index
    %162 = vector.load %arg17[%c0_74, %c0_75, %c0_76] : memref<2x32x128xbf16, #tpu.memory_space<vmem>>, vector<1x32x128xbf16>
    %163 = vector.shape_cast %162 : vector<1x32x128xbf16> to vector<32x128xbf16>
    %cst_77 = arith.constant dense<0.000000e+00> : vector<8x128xf32>
    %164 = tpu.matmul %161, %163, %cst_77 {dimension_numbers = #tpu.dot_dimension_numbers<[1], [0], [0], [1], [0, 0, 1, 1], [], []>} : vector<8x32xbf16>, vector<32x128xbf16>, vector<8x128xf32> -> vector<8x128xf32>
    %c0_78 = arith.constant 0 : index
    %c0_79 = arith.constant 0 : index
    %c0_80 = arith.constant 0 : index
    %165 = vector.load %arg18[%c0_78, %c0_79, %c0_80] : memref<2x1x128xf32, #tpu.memory_space<vmem>>, vector<1x1x128xf32>
    %166 = vector.shape_cast %165 : vector<1x1x128xf32> to vector<1x128xf32>
    %167 = vector.broadcast %166 : vector<1x128xf32> to vector<8x128xf32>
    %168 = arith.addf %164, %167 : vector<8x128xf32>
    %169 = arith.mulf %168, %168 : vector<8x128xf32>
    %170 = arith.mulf %168, %169 : vector<8x128xf32>
    %cst_81 = arith.constant 4.471500e-02 : f32
    %171 = vector.broadcast %cst_81 : f32 to vector<8x128xf32>
    %172 = arith.mulf %171, %170 : vector<8x128xf32>
    %173 = arith.addf %168, %172 : vector<8x128xf32>
    %cst_82 = arith.constant 0.797884583 : f32
    %174 = vector.broadcast %cst_82 : f32 to vector<8x128xf32>
    %175 = arith.mulf %174, %173 : vector<8x128xf32>
    %176 = math.tanh %175 : vector<8x128xf32>
    %cst_83 = arith.constant 1.000000e+00 : f32
    %177 = vector.broadcast %cst_83 : f32 to vector<8x128xf32>
    %178 = arith.addf %177, %176 : vector<8x128xf32>
    %cst_84 = arith.constant 5.000000e-01 : f32
    %179 = vector.broadcast %cst_84 : f32 to vector<8x128xf32>
    %180 = arith.mulf %179, %178 : vector<8x128xf32>
    %181 = arith.mulf %168, %180 : vector<8x128xf32>
    %182 = arith.truncf %181 : vector<8x128xf32> to vector<8x128xbf16>
    %c0_85 = arith.constant 0 : index
    %c0_86 = arith.constant 0 : index
    %c0_87 = arith.constant 0 : index
    %183 = vector.load %arg19[%c0_85, %c0_86, %c0_87] : memref<2x128x32xbf16, #tpu.memory_space<vmem>>, vector<1x128x32xbf16>
    %184 = vector.shape_cast %183 : vector<1x128x32xbf16> to vector<128x32xbf16>
    %cst_88 = arith.constant dense<0.000000e+00> : vector<8x32xf32>
    %185 = tpu.matmul %182, %184, %cst_88 {dimension_numbers = #tpu.dot_dimension_numbers<[1], [0], [0], [1], [0, 0, 1, 1], [], []>} : vector<8x128xbf16>, vector<128x32xbf16>, vector<8x32xf32> -> vector<8x32xf32>
    %186 = arith.addf %134, %185 : vector<8x32xf32>
    %c0_89 = arith.constant 0 : index
    %c0_90 = arith.constant 0 : index
    %c0_91 = arith.constant 0 : index
    %187 = vector.load %arg20[%c0_89, %c0_90, %c0_91] : memref<2x1x32xf32, #tpu.memory_space<vmem>>, vector<1x1x32xf32>
    %188 = vector.shape_cast %187 : vector<1x1x32xf32> to vector<1x32xf32>
    %189 = vector.broadcast %188 : vector<1x32xf32> to vector<8x32xf32>
    %190 = arith.addf %186, %189 : vector<8x32xf32>
    %c1 = arith.constant 1 : index
    %c0_92 = arith.constant 0 : index
    %c0_93 = arith.constant 0 : index
    %191 = vector.load %arg5[%c1, %c0_92, %c0_93] : memref<2x1x32xf32, #tpu.memory_space<vmem>>, vector<1x1x32xf32>
    %192 = vector.shape_cast %191 : vector<1x1x32xf32> to vector<1x32xf32>
    %c1_94 = arith.constant 1 : index
    %c0_95 = arith.constant 0 : index
    %c0_96 = arith.constant 0 : index
    %193 = vector.load %arg6[%c1_94, %c0_95, %c0_96] : memref<2x1x32xf32, #tpu.memory_space<vmem>>, vector<1x1x32xf32>
    %194 = vector.shape_cast %193 : vector<1x1x32xf32> to vector<1x32xf32>
    %cst_97 = arith.constant dense<0.000000e+00> : vector<8xf32>
    %195 = vector.multi_reduction <add>, %190, %cst_97 [1] : vector<8x32xf32> to vector<8xf32>
    %196 = vector.shape_cast %195 : vector<8xf32> to vector<8x1xf32>
    %cst_98 = arith.constant 3.200000e+01 : f32
    %197 = vector.broadcast %cst_98 : f32 to vector<8x1xf32>
    %198 = arith.divf %196, %197 : vector<8x1xf32>
    %199 = vector.broadcast %198 : vector<8x1xf32> to vector<8x32xf32>
    %200 = arith.subf %190, %199 : vector<8x32xf32>
    %201 = arith.mulf %200, %200 : vector<8x32xf32>
    %cst_99 = arith.constant dense<0.000000e+00> : vector<8xf32>
    %202 = vector.multi_reduction <add>, %201, %cst_99 [1] : vector<8x32xf32> to vector<8xf32>
    %203 = vector.shape_cast %202 : vector<8xf32> to vector<8x1xf32>
    %cst_100 = arith.constant 3.200000e+01 : f32
    %204 = vector.broadcast %cst_100 : f32 to vector<8x1xf32>
    %205 = arith.divf %203, %204 : vector<8x1xf32>
    %206 = vector.broadcast %198 : vector<8x1xf32> to vector<8x32xf32>
    %207 = arith.subf %190, %206 : vector<8x32xf32>
    %cst_101 = arith.constant 9.99999974E-6 : f32
    %208 = vector.broadcast %cst_101 : f32 to vector<8x1xf32>
    %209 = arith.addf %205, %208 : vector<8x1xf32>
    %210 = math.rsqrt %209 : vector<8x1xf32>
    %211 = vector.broadcast %210 : vector<8x1xf32> to vector<8x32xf32>
    %212 = arith.mulf %207, %211 : vector<8x32xf32>
    %213 = vector.broadcast %192 : vector<1x32xf32> to vector<8x32xf32>
    %214 = arith.mulf %212, %213 : vector<8x32xf32>
    %215 = vector.broadcast %194 : vector<1x32xf32> to vector<8x32xf32>
    %216 = arith.addf %214, %215 : vector<8x32xf32>
    %217 = arith.truncf %216 : vector<8x32xf32> to vector<8x32xbf16>
    %c1_102 = arith.constant 1 : index
    %c0_103 = arith.constant 0 : index
    %c0_104 = arith.constant 0 : index
    %218 = vector.load %arg7[%c1_102, %c0_103, %c0_104] : memref<2x32x32xbf16, #tpu.memory_space<vmem>>, vector<1x32x32xbf16>
    %219 = vector.shape_cast %218 : vector<1x32x32xbf16> to vector<32x32xbf16>
    %cst_105 = arith.constant dense<0.000000e+00> : vector<8x32xf32>
    %220 = tpu.matmul %217, %219, %cst_105 {dimension_numbers = #tpu.dot_dimension_numbers<[1], [0], [0], [1], [0, 0, 1, 1], [], []>} : vector<8x32xbf16>, vector<32x32xbf16>, vector<8x32xf32> -> vector<8x32xf32>
    %c1_106 = arith.constant 1 : index
    %c0_107 = arith.constant 0 : index
    %c0_108 = arith.constant 0 : index
    %221 = vector.load %arg10[%c1_106, %c0_107, %c0_108] : memref<2x1x32xf32, #tpu.memory_space<vmem>>, vector<1x1x32xf32>
    %222 = vector.shape_cast %221 : vector<1x1x32xf32> to vector<1x32xf32>
    %223 = vector.broadcast %222 : vector<1x32xf32> to vector<8x32xf32>
    %224 = arith.addf %220, %223 : vector<8x32xf32>
    %225 = arith.truncf %224 : vector<8x32xf32> to vector<8x32xbf16>
    %c1_109 = arith.constant 1 : index
    %c0_110 = arith.constant 0 : index
    %c0_111 = arith.constant 0 : index
    %226 = vector.load %arg8[%c1_109, %c0_110, %c0_111] : memref<2x32x32xbf16, #tpu.memory_space<vmem>>, vector<1x32x32xbf16>
    %227 = vector.shape_cast %226 : vector<1x32x32xbf16> to vector<32x32xbf16>
    %cst_112 = arith.constant dense<0.000000e+00> : vector<8x32xf32>
    %228 = tpu.matmul %217, %227, %cst_112 {dimension_numbers = #tpu.dot_dimension_numbers<[1], [0], [0], [1], [0, 0, 1, 1], [], []>} : vector<8x32xbf16>, vector<32x32xbf16>, vector<8x32xf32> -> vector<8x32xf32>
    %c1_113 = arith.constant 1 : index
    %c0_114 = arith.constant 0 : index
    %c0_115 = arith.constant 0 : index
    %229 = vector.load %arg11[%c1_113, %c0_114, %c0_115] : memref<2x1x32xf32, #tpu.memory_space<vmem>>, vector<1x1x32xf32>
    %230 = vector.shape_cast %229 : vector<1x1x32xf32> to vector<1x32xf32>
    %231 = vector.broadcast %230 : vector<1x32xf32> to vector<8x32xf32>
    %232 = arith.addf %228, %231 : vector<8x32xf32>
    %233 = arith.truncf %232 : vector<8x32xf32> to vector<8x32xbf16>
    %c1_116 = arith.constant 1 : index
    %c0_117 = arith.constant 0 : index
    %c0_118 = arith.constant 0 : index
    %234 = vector.load %arg9[%c1_116, %c0_117, %c0_118] : memref<2x32x32xbf16, #tpu.memory_space<vmem>>, vector<1x32x32xbf16>
    %235 = vector.shape_cast %234 : vector<1x32x32xbf16> to vector<32x32xbf16>
    %cst_119 = arith.constant dense<0.000000e+00> : vector<8x32xf32>
    %236 = tpu.matmul %217, %235, %cst_119 {dimension_numbers = #tpu.dot_dimension_numbers<[1], [0], [0], [1], [0, 0, 1, 1], [], []>} : vector<8x32xbf16>, vector<32x32xbf16>, vector<8x32xf32> -> vector<8x32xf32>
    %c1_120 = arith.constant 1 : index
    %c0_121 = arith.constant 0 : index
    %c0_122 = arith.constant 0 : index
    %237 = vector.load %arg12[%c1_120, %c0_121, %c0_122] : memref<2x1x32xf32, #tpu.memory_space<vmem>>, vector<1x1x32xf32>
    %238 = vector.shape_cast %237 : vector<1x1x32xf32> to vector<1x32xf32>
    %239 = vector.broadcast %238 : vector<1x32xf32> to vector<8x32xf32>
    %240 = arith.addf %236, %239 : vector<8x32xf32>
    %241 = arith.truncf %240 : vector<8x32xf32> to vector<8x32xbf16>
    %242 = vector.extract_strided_slice %225 {offsets = [0, 0], sizes = [8, 8], strides = [1, 1]} : vector<8x32xbf16> to vector<8x8xbf16>
    %243 = vector.extract_strided_slice %233 {offsets = [0, 0], sizes = [8, 8], strides = [1, 1]} : vector<8x32xbf16> to vector<8x8xbf16>
    %cst_123 = arith.constant dense<0.000000e+00> : vector<8x8xf32>
    %244 = tpu.matmul %242, %243, %cst_123 {dimension_numbers = #tpu.dot_dimension_numbers<[1], [1], [0], [0], [0, 0, 1, 0], [], []>} : vector<8x8xbf16>, vector<8x8xbf16>, vector<8x8xf32> -> vector<8x8xf32>
    %cst_124 = arith.constant dense<0xFF800000> : vector<8xf32>
    %245 = vector.multi_reduction <maximumf>, %244, %cst_124 [1] : vector<8x8xf32> to vector<8xf32>
    %246 = vector.shape_cast %245 : vector<8xf32> to vector<8x1xf32>
    %247 = vector.broadcast %246 : vector<8x1xf32> to vector<8x8xf32>
    %248 = arith.subf %244, %247 : vector<8x8xf32>
    %249 = math.exp %248 : vector<8x8xf32>
    %cst_125 = arith.constant dense<0.000000e+00> : vector<8xf32>
    %250 = vector.multi_reduction <add>, %249, %cst_125 [1] : vector<8x8xf32> to vector<8xf32>
    %251 = vector.shape_cast %250 : vector<8xf32> to vector<8x1xf32>
    %252 = tpu.reciprocal %251 {approx = true} : vector<8x1xf32> -> vector<8x1xf32>
    %253 = vector.broadcast %252 : vector<8x1xf32> to vector<8x8xf32>
    %254 = arith.mulf %249, %253 : vector<8x8xf32>
    %255 = arith.truncf %254 : vector<8x8xf32> to vector<8x8xbf16>
    %256 = vector.extract_strided_slice %241 {offsets = [0, 0], sizes = [8, 8], strides = [1, 1]} : vector<8x32xbf16> to vector<8x8xbf16>
    %cst_126 = arith.constant dense<0.000000e+00> : vector<8x8xf32>
    %257 = tpu.matmul %255, %256, %cst_126 {dimension_numbers = #tpu.dot_dimension_numbers<[1], [0], [0], [1], [0, 0, 1, 1], [], []>} : vector<8x8xbf16>, vector<8x8xbf16>, vector<8x8xf32> -> vector<8x8xf32>
    %258 = vector.extract_strided_slice %225 {offsets = [0, 8], sizes = [8, 8], strides = [1, 1]} : vector<8x32xbf16> to vector<8x8xbf16>
    %259 = vector.extract_strided_slice %233 {offsets = [0, 8], sizes = [8, 8], strides = [1, 1]} : vector<8x32xbf16> to vector<8x8xbf16>
    %cst_127 = arith.constant dense<0.000000e+00> : vector<8x8xf32>
    %260 = tpu.matmul %258, %259, %cst_127 {dimension_numbers = #tpu.dot_dimension_numbers<[1], [1], [0], [0], [0, 0, 1, 0], [], []>} : vector<8x8xbf16>, vector<8x8xbf16>, vector<8x8xf32> -> vector<8x8xf32>
    %cst_128 = arith.constant dense<0xFF800000> : vector<8xf32>
    %261 = vector.multi_reduction <maximumf>, %260, %cst_128 [1] : vector<8x8xf32> to vector<8xf32>
    %262 = vector.shape_cast %261 : vector<8xf32> to vector<8x1xf32>
    %263 = vector.broadcast %262 : vector<8x1xf32> to vector<8x8xf32>
    %264 = arith.subf %260, %263 : vector<8x8xf32>
    %265 = math.exp %264 : vector<8x8xf32>
    %cst_129 = arith.constant dense<0.000000e+00> : vector<8xf32>
    %266 = vector.multi_reduction <add>, %265, %cst_129 [1] : vector<8x8xf32> to vector<8xf32>
    %267 = vector.shape_cast %266 : vector<8xf32> to vector<8x1xf32>
    %268 = tpu.reciprocal %267 {approx = true} : vector<8x1xf32> -> vector<8x1xf32>
    %269 = vector.broadcast %268 : vector<8x1xf32> to vector<8x8xf32>
    %270 = arith.mulf %265, %269 : vector<8x8xf32>
    %271 = arith.truncf %270 : vector<8x8xf32> to vector<8x8xbf16>
    %272 = vector.extract_strided_slice %241 {offsets = [0, 8], sizes = [8, 8], strides = [1, 1]} : vector<8x32xbf16> to vector<8x8xbf16>
    %cst_130 = arith.constant dense<0.000000e+00> : vector<8x8xf32>
    %273 = tpu.matmul %271, %272, %cst_130 {dimension_numbers = #tpu.dot_dimension_numbers<[1], [0], [0], [1], [0, 0, 1, 1], [], []>} : vector<8x8xbf16>, vector<8x8xbf16>, vector<8x8xf32> -> vector<8x8xf32>
    %274 = vector.extract_strided_slice %225 {offsets = [0, 16], sizes = [8, 8], strides = [1, 1]} : vector<8x32xbf16> to vector<8x8xbf16>
    %275 = vector.extract_strided_slice %233 {offsets = [0, 16], sizes = [8, 8], strides = [1, 1]} : vector<8x32xbf16> to vector<8x8xbf16>
    %cst_131 = arith.constant dense<0.000000e+00> : vector<8x8xf32>
    %276 = tpu.matmul %274, %275, %cst_131 {dimension_numbers = #tpu.dot_dimension_numbers<[1], [1], [0], [0], [0, 0, 1, 0], [], []>} : vector<8x8xbf16>, vector<8x8xbf16>, vector<8x8xf32> -> vector<8x8xf32>
    %cst_132 = arith.constant dense<0xFF800000> : vector<8xf32>
    %277 = vector.multi_reduction <maximumf>, %276, %cst_132 [1] : vector<8x8xf32> to vector<8xf32>
    %278 = vector.shape_cast %277 : vector<8xf32> to vector<8x1xf32>
    %279 = vector.broadcast %278 : vector<8x1xf32> to vector<8x8xf32>
    %280 = arith.subf %276, %279 : vector<8x8xf32>
    %281 = math.exp %280 : vector<8x8xf32>
    %cst_133 = arith.constant dense<0.000000e+00> : vector<8xf32>
    %282 = vector.multi_reduction <add>, %281, %cst_133 [1] : vector<8x8xf32> to vector<8xf32>
    %283 = vector.shape_cast %282 : vector<8xf32> to vector<8x1xf32>
    %284 = tpu.reciprocal %283 {approx = true} : vector<8x1xf32> -> vector<8x1xf32>
    %285 = vector.broadcast %284 : vector<8x1xf32> to vector<8x8xf32>
    %286 = arith.mulf %281, %285 : vector<8x8xf32>
    %287 = arith.truncf %286 : vector<8x8xf32> to vector<8x8xbf16>
    %288 = vector.extract_strided_slice %241 {offsets = [0, 16], sizes = [8, 8], strides = [1, 1]} : vector<8x32xbf16> to vector<8x8xbf16>
    %cst_134 = arith.constant dense<0.000000e+00> : vector<8x8xf32>
    %289 = tpu.matmul %287, %288, %cst_134 {dimension_numbers = #tpu.dot_dimension_numbers<[1], [0], [0], [1], [0, 0, 1, 1], [], []>} : vector<8x8xbf16>, vector<8x8xbf16>, vector<8x8xf32> -> vector<8x8xf32>
    %290 = vector.extract_strided_slice %225 {offsets = [0, 24], sizes = [8, 8], strides = [1, 1]} : vector<8x32xbf16> to vector<8x8xbf16>
    %291 = vector.extract_strided_slice %233 {offsets = [0, 24], sizes = [8, 8], strides = [1, 1]} : vector<8x32xbf16> to vector<8x8xbf16>
    %cst_135 = arith.constant dense<0.000000e+00> : vector<8x8xf32>
    %292 = tpu.matmul %290, %291, %cst_135 {dimension_numbers = #tpu.dot_dimension_numbers<[1], [1], [0], [0], [0, 0, 1, 0], [], []>} : vector<8x8xbf16>, vector<8x8xbf16>, vector<8x8xf32> -> vector<8x8xf32>
    %cst_136 = arith.constant dense<0xFF800000> : vector<8xf32>
    %293 = vector.multi_reduction <maximumf>, %292, %cst_136 [1] : vector<8x8xf32> to vector<8xf32>
    %294 = vector.shape_cast %293 : vector<8xf32> to vector<8x1xf32>
    %295 = vector.broadcast %294 : vector<8x1xf32> to vector<8x8xf32>
    %296 = arith.subf %292, %295 : vector<8x8xf32>
    %297 = math.exp %296 : vector<8x8xf32>
    %cst_137 = arith.constant dense<0.000000e+00> : vector<8xf32>
    %298 = vector.multi_reduction <add>, %297, %cst_137 [1] : vector<8x8xf32> to vector<8xf32>
    %299 = vector.shape_cast %298 : vector<8xf32> to vector<8x1xf32>
    %300 = tpu.reciprocal %299 {approx = true} : vector<8x1xf32> -> vector<8x1xf32>
    %301 = vector.broadcast %300 : vector<8x1xf32> to vector<8x8xf32>
    %302 = arith.mulf %297, %301 : vector<8x8xf32>
    %303 = arith.truncf %302 : vector<8x8xf32> to vector<8x8xbf16>
    %304 = vector.extract_strided_slice %241 {offsets = [0, 24], sizes = [8, 8], strides = [1, 1]} : vector<8x32xbf16> to vector<8x8xbf16>
    %cst_138 = arith.constant dense<0.000000e+00> : vector<8x8xf32>
    %305 = tpu.matmul %303, %304, %cst_138 {dimension_numbers = #tpu.dot_dimension_numbers<[1], [0], [0], [1], [0, 0, 1, 1], [], []>} : vector<8x8xbf16>, vector<8x8xbf16>, vector<8x8xf32> -> vector<8x8xf32>
    %306 = tpu.concatenate %257, %273, %289, %305 in 1 : vector<8x8xf32>, vector<8x8xf32>, vector<8x8xf32>, vector<8x8xf32> -> vector<8x32xf32>
    %307 = arith.truncf %306 : vector<8x32xf32> to vector<8x32xbf16>
    %c1_139 = arith.constant 1 : index
    %c0_140 = arith.constant 0 : index
    %c0_141 = arith.constant 0 : index
    %308 = vector.load %arg13[%c1_139, %c0_140, %c0_141] : memref<2x32x32xbf16, #tpu.memory_space<vmem>>, vector<1x32x32xbf16>
    %309 = vector.shape_cast %308 : vector<1x32x32xbf16> to vector<32x32xbf16>
    %cst_142 = arith.constant dense<0.000000e+00> : vector<8x32xf32>
    %310 = tpu.matmul %307, %309, %cst_142 {dimension_numbers = #tpu.dot_dimension_numbers<[1], [0], [0], [1], [0, 0, 1, 1], [], []>} : vector<8x32xbf16>, vector<32x32xbf16>, vector<8x32xf32> -> vector<8x32xf32>
    %311 = arith.addf %190, %310 : vector<8x32xf32>
    %c1_143 = arith.constant 1 : index
    %c0_144 = arith.constant 0 : index
    %c0_145 = arith.constant 0 : index
    %312 = vector.load %arg14[%c1_143, %c0_144, %c0_145] : memref<2x1x32xf32, #tpu.memory_space<vmem>>, vector<1x1x32xf32>
    %313 = vector.shape_cast %312 : vector<1x1x32xf32> to vector<1x32xf32>
    %314 = vector.broadcast %313 : vector<1x32xf32> to vector<8x32xf32>
    %315 = arith.addf %311, %314 : vector<8x32xf32>
    %c1_146 = arith.constant 1 : index
    %c0_147 = arith.constant 0 : index
    %c0_148 = arith.constant 0 : index
    %316 = vector.load %arg15[%c1_146, %c0_147, %c0_148] : memref<2x1x32xf32, #tpu.memory_space<vmem>>, vector<1x1x32xf32>
    %317 = vector.shape_cast %316 : vector<1x1x32xf32> to vector<1x32xf32>
    %c1_149 = arith.constant 1 : index
    %c0_150 = arith.constant 0 : index
    %c0_151 = arith.constant 0 : index
    %318 = vector.load %arg16[%c1_149, %c0_150, %c0_151] : memref<2x1x32xf32, #tpu.memory_space<vmem>>, vector<1x1x32xf32>
    %319 = vector.shape_cast %318 : vector<1x1x32xf32> to vector<1x32xf32>
    %cst_152 = arith.constant dense<0.000000e+00> : vector<8xf32>
    %320 = vector.multi_reduction <add>, %315, %cst_152 [1] : vector<8x32xf32> to vector<8xf32>
    %321 = vector.shape_cast %320 : vector<8xf32> to vector<8x1xf32>
    %cst_153 = arith.constant 3.200000e+01 : f32
    %322 = vector.broadcast %cst_153 : f32 to vector<8x1xf32>
    %323 = arith.divf %321, %322 : vector<8x1xf32>
    %324 = vector.broadcast %323 : vector<8x1xf32> to vector<8x32xf32>
    %325 = arith.subf %315, %324 : vector<8x32xf32>
    %326 = arith.mulf %325, %325 : vector<8x32xf32>
    %cst_154 = arith.constant dense<0.000000e+00> : vector<8xf32>
    %327 = vector.multi_reduction <add>, %326, %cst_154 [1] : vector<8x32xf32> to vector<8xf32>
    %328 = vector.shape_cast %327 : vector<8xf32> to vector<8x1xf32>
    %cst_155 = arith.constant 3.200000e+01 : f32
    %329 = vector.broadcast %cst_155 : f32 to vector<8x1xf32>
    %330 = arith.divf %328, %329 : vector<8x1xf32>
    %331 = vector.broadcast %323 : vector<8x1xf32> to vector<8x32xf32>
    %332 = arith.subf %315, %331 : vector<8x32xf32>
    %cst_156 = arith.constant 9.99999974E-6 : f32
    %333 = vector.broadcast %cst_156 : f32 to vector<8x1xf32>
    %334 = arith.addf %330, %333 : vector<8x1xf32>
    %335 = math.rsqrt %334 : vector<8x1xf32>
    %336 = vector.broadcast %335 : vector<8x1xf32> to vector<8x32xf32>
    %337 = arith.mulf %332, %336 : vector<8x32xf32>
    %338 = vector.broadcast %317 : vector<1x32xf32> to vector<8x32xf32>
    %339 = arith.mulf %337, %338 : vector<8x32xf32>
    %340 = vector.broadcast %319 : vector<1x32xf32> to vector<8x32xf32>
    %341 = arith.addf %339, %340 : vector<8x32xf32>
    %342 = arith.truncf %341 : vector<8x32xf32> to vector<8x32xbf16>
    %c1_157 = arith.constant 1 : index
    %c0_158 = arith.constant 0 : index
    %c0_159 = arith.constant 0 : index
    %343 = vector.load %arg17[%c1_157, %c0_158, %c0_159] : memref<2x32x128xbf16, #tpu.memory_space<vmem>>, vector<1x32x128xbf16>
    %344 = vector.shape_cast %343 : vector<1x32x128xbf16> to vector<32x128xbf16>
    %cst_160 = arith.constant dense<0.000000e+00> : vector<8x128xf32>
    %345 = tpu.matmul %342, %344, %cst_160 {dimension_numbers = #tpu.dot_dimension_numbers<[1], [0], [0], [1], [0, 0, 1, 1], [], []>} : vector<8x32xbf16>, vector<32x128xbf16>, vector<8x128xf32> -> vector<8x128xf32>
    %c1_161 = arith.constant 1 : index
    %c0_162 = arith.constant 0 : index
    %c0_163 = arith.constant 0 : index
    %346 = vector.load %arg18[%c1_161, %c0_162, %c0_163] : memref<2x1x128xf32, #tpu.memory_space<vmem>>, vector<1x1x128xf32>
    %347 = vector.shape_cast %346 : vector<1x1x128xf32> to vector<1x128xf32>
    %348 = vector.broadcast %347 : vector<1x128xf32> to vector<8x128xf32>
    %349 = arith.addf %345, %348 : vector<8x128xf32>
    %350 = arith.mulf %349, %349 : vector<8x128xf32>
    %351 = arith.mulf %349, %350 : vector<8x128xf32>
    %cst_164 = arith.constant 4.471500e-02 : f32
    %352 = vector.broadcast %cst_164 : f32 to vector<8x128xf32>
    %353 = arith.mulf %352, %351 : vector<8x128xf32>
    %354 = arith.addf %349, %353 : vector<8x128xf32>
    %cst_165 = arith.constant 0.797884583 : f32
    %355 = vector.broadcast %cst_165 : f32 to vector<8x128xf32>
    %356 = arith.mulf %355, %354 : vector<8x128xf32>
    %357 = math.tanh %356 : vector<8x128xf32>
    %cst_166 = arith.constant 1.000000e+00 : f32
    %358 = vector.broadcast %cst_166 : f32 to vector<8x128xf32>
    %359 = arith.addf %358, %357 : vector<8x128xf32>
    %cst_167 = arith.constant 5.000000e-01 : f32
    %360 = vector.broadcast %cst_167 : f32 to vector<8x128xf32>
    %361 = arith.mulf %360, %359 : vector<8x128xf32>
    %362 = arith.mulf %349, %361 : vector<8x128xf32>
    %363 = arith.truncf %362 : vector<8x128xf32> to vector<8x128xbf16>
    %c1_168 = arith.constant 1 : index
    %c0_169 = arith.constant 0 : index
    %c0_170 = arith.constant 0 : index
    %364 = vector.load %arg19[%c1_168, %c0_169, %c0_170] : memref<2x128x32xbf16, #tpu.memory_space<vmem>>, vector<1x128x32xbf16>
    %365 = vector.shape_cast %364 : vector<1x128x32xbf16> to vector<128x32xbf16>
    %cst_171 = arith.constant dense<0.000000e+00> : vector<8x32xf32>
    %366 = tpu.matmul %363, %365, %cst_171 {dimension_numbers = #tpu.dot_dimension_numbers<[1], [0], [0], [1], [0, 0, 1, 1], [], []>} : vector<8x128xbf16>, vector<128x32xbf16>, vector<8x32xf32> -> vector<8x32xf32>
    %367 = arith.addf %315, %366 : vector<8x32xf32>
    %c1_172 = arith.constant 1 : index
    %c0_173 = arith.constant 0 : index
    %c0_174 = arith.constant 0 : index
    %368 = vector.load %arg20[%c1_172, %c0_173, %c0_174] : memref<2x1x32xf32, #tpu.memory_space<vmem>>, vector<1x1x32xf32>
    %369 = vector.shape_cast %368 : vector<1x1x32xf32> to vector<1x32xf32>
    %370 = vector.broadcast %369 : vector<1x32xf32> to vector<8x32xf32>
    %371 = arith.addf %367, %370 : vector<8x32xf32>
    %cst_175 = arith.constant dense<0.000000e+00> : vector<32xf32>
    %372 = vector.multi_reduction <add>, %371, %cst_175 [0] : vector<8x32xf32> to vector<32xf32>
    %373 = vector.shape_cast %372 : vector<32xf32> to vector<1x32xf32>
    %cst_176 = arith.constant 8.000000e+00 : f32
    %374 = vector.broadcast %cst_176 : f32 to vector<1x32xf32>
    %375 = arith.divf %373, %374 : vector<1x32xf32>
    %376 = arith.truncf %375 : vector<1x32xf32> to vector<1x32xbf16>
    %c0_177 = arith.constant 0 : index
    %c0_178 = arith.constant 0 : index
    %377 = vector.load %arg21[%c0_177, %c0_178] : memref<32x157xbf16, #tpu.memory_space<vmem>>, vector<32x157xbf16>
    %cst_179 = arith.constant dense<0.000000e+00> : vector<1x157xf32>
    %378 = tpu.matmul %376, %377, %cst_179 {dimension_numbers = #tpu.dot_dimension_numbers<[1], [0], [0], [1], [0, 0, 1, 1], [], []>} : vector<1x32xbf16>, vector<32x157xbf16>, vector<1x157xf32> -> vector<1x157xf32>
    %c0_180 = arith.constant 0 : index
    %c0_181 = arith.constant 0 : index
    %379 = vector.load %arg22[%c0_180, %c0_181] : memref<1x157xf32, #tpu.memory_space<vmem>>, vector<1x157xf32>
    %380 = arith.addf %378, %379 : vector<1x157xf32>
    %c0_182 = arith.constant 0 : index
    %c0_183 = arith.constant 0 : index
    %c0_184 = arith.constant 0 : index
    %381 = vector.load %arg37[%c0_182, %c0_183, %c0_184] : memref<1x1x157xf32, #tpu.memory_space<vmem>>, vector<1x1x157xf32>
    %382 = vector.shape_cast %381 : vector<1x1x157xf32> to vector<1x157xf32>
    %383 = vector.shape_cast %380 : vector<1x157xf32> to vector<1x1x157xf32>
    tpu.vector_store %arg37[%c0_182, %c0_183, %c0_184], %383 {strides = array<i32>} : memref<1x1x157xf32, #tpu.memory_space<vmem>>, vector<1x1x157xf32>,
    %384 = vector.extract_strided_slice %2 {offsets = [4, 0], sizes = [1, 2048], strides = [1, 1]} : vector<8x2048xbf16> to vector<1x2048xbf16>
    %c0_185 = arith.constant 0 : index
    %c0_186 = arith.constant 0 : index
    %385 = vector.load %arg23[%c0_185, %c0_186] : memref<2048x64xbf16, #tpu.memory_space<vmem>>, vector<2048x64xbf16>
    %cst_187 = arith.constant dense<0.000000e+00> : vector<1x64xf32>
    %386 = tpu.matmul %384, %385, %cst_187 {dimension_numbers = #tpu.dot_dimension_numbers<[1], [0], [0], [1], [0, 0, 1, 1], [], []>} : vector<1x2048xbf16>, vector<2048x64xbf16>, vector<1x64xf32> -> vector<1x64xf32>
    %c0_188 = arith.constant 0 : index
    %c0_189 = arith.constant 0 : index
    %387 = vector.load %arg24[%c0_188, %c0_189] : memref<1x64xf32, #tpu.memory_space<vmem>>, vector<1x64xf32>
    %388 = arith.addf %386, %387 : vector<1x64xf32>
    %389 = arith.truncf %388 : vector<1x64xf32> to vector<1x64xbf16>
    %c0_190 = arith.constant 0 : index
    %c0_191 = arith.constant 0 : index
    %390 = vector.load %arg25[%c0_190, %c0_191] : memref<64x64xbf16, #tpu.memory_space<vmem>>, vector<64x64xbf16>
    %cst_192 = arith.constant dense<0.000000e+00> : vector<1x64xf32>
    %391 = tpu.matmul %389, %390, %cst_192 {dimension_numbers = #tpu.dot_dimension_numbers<[1], [0], [0], [1], [0, 0, 1, 1], [], []>} : vector<1x64xbf16>, vector<64x64xbf16>, vector<1x64xf32> -> vector<1x64xf32>
    %c0_193 = arith.constant 0 : index
    %c0_194 = arith.constant 0 : index
    %392 = vector.load %arg26[%c0_193, %c0_194] : memref<1x64xf32, #tpu.memory_space<vmem>>, vector<1x64xf32>
    %393 = arith.addf %391, %392 : vector<1x64xf32>
    %394 = arith.truncf %393 : vector<1x64xf32> to vector<1x64xbf16>
    %c0_195 = arith.constant 0 : index
    %c0_196 = arith.constant 0 : index
    %395 = vector.load %arg27[%c0_195, %c0_196] : memref<64x64xbf16, #tpu.memory_space<vmem>>, vector<64x64xbf16>
    %cst_197 = arith.constant dense<0.000000e+00> : vector<1x64xf32>
    %396 = tpu.matmul %394, %395, %cst_197 {dimension_numbers = #tpu.dot_dimension_numbers<[1], [0], [0], [1], [0, 0, 1, 1], [], []>} : vector<1x64xbf16>, vector<64x64xbf16>, vector<1x64xf32> -> vector<1x64xf32>
    %c0_198 = arith.constant 0 : index
    %c0_199 = arith.constant 0 : index
    %397 = vector.load %arg28[%c0_198, %c0_199] : memref<1x64xf32, #tpu.memory_space<vmem>>, vector<1x64xf32>
    %398 = arith.addf %396, %397 : vector<1x64xf32>
    %399 = arith.truncf %398 : vector<1x64xf32> to vector<1x64xbf16>
    %400 = vector.extract_strided_slice %371 {offsets = [4, 0], sizes = [1, 32], strides = [1, 1]} : vector<8x32xf32> to vector<1x32xf32>
    %401 = arith.truncf %400 : vector<1x32xf32> to vector<1x32xbf16>
    %c0_200 = arith.constant 0 : index
    %c0_201 = arith.constant 0 : index
    %402 = vector.load %arg29[%c0_200, %c0_201] : memref<64x256xbf16, #tpu.memory_space<vmem>>, vector<64x256xbf16>
    %cst_202 = arith.constant dense<0.000000e+00> : vector<1x256xf32>
    %403 = tpu.matmul %399, %402, %cst_202 {dimension_numbers = #tpu.dot_dimension_numbers<[1], [0], [0], [1], [0, 0, 1, 1], [], []>} : vector<1x64xbf16>, vector<64x256xbf16>, vector<1x256xf32> -> vector<1x256xf32>
    %c0_203 = arith.constant 0 : index
    %c0_204 = arith.constant 0 : index
    %404 = vector.load %arg30[%c0_203, %c0_204] : memref<32x256xbf16, #tpu.memory_space<vmem>>, vector<32x256xbf16>
    %cst_205 = arith.constant dense<0.000000e+00> : vector<1x256xf32>
    %405 = tpu.matmul %401, %404, %cst_205 {dimension_numbers = #tpu.dot_dimension_numbers<[1], [0], [0], [1], [0, 0, 1, 1], [], []>} : vector<1x32xbf16>, vector<32x256xbf16>, vector<1x256xf32> -> vector<1x256xf32>
    %406 = arith.addf %403, %405 : vector<1x256xf32>
    %c0_206 = arith.constant 0 : index
    %c0_207 = arith.constant 0 : index
    %407 = vector.load %arg32[%c0_206, %c0_207] : memref<1x256xf32, #tpu.memory_space<vmem>>, vector<1x256xf32>
    %408 = arith.addf %406, %407 : vector<1x256xf32>
    %409 = arith.truncf %380 : vector<1x157xf32> to vector<1x157xbf16>
    %c0_208 = arith.constant 0 : index
    %c0_209 = arith.constant 0 : index
    %410 = vector.load %arg31[%c0_208, %c0_209] : memref<157x256xbf16, #tpu.memory_space<vmem>>, vector<157x256xbf16>
    %cst_210 = arith.constant dense<0.000000e+00> : vector<1x256xf32>
    %411 = tpu.matmul %409, %410, %cst_210 {dimension_numbers = #tpu.dot_dimension_numbers<[1], [0], [0], [1], [0, 0, 1, 1], [], []>} : vector<1x157xbf16>, vector<157x256xbf16>, vector<1x256xf32> -> vector<1x256xf32>
    %412 = arith.addf %408, %411 : vector<1x256xf32>
    %cst_211 = arith.constant 0.000000e+00 : f32
    %413 = vector.broadcast %cst_211 : f32 to vector<1x256xf32>
    %414 = arith.maximumf %412, %413 : vector<1x256xf32>
    %415 = arith.truncf %414 : vector<1x256xf32> to vector<1x256xbf16>
    %c0_212 = arith.constant 0 : index
    %c0_213 = arith.constant 0 : index
    %416 = vector.load %arg33[%c0_212, %c0_213] : memref<256x256xbf16, #tpu.memory_space<vmem>>, vector<256x256xbf16>
    %cst_214 = arith.constant dense<0.000000e+00> : vector<1x256xf32>
    %417 = tpu.matmul %415, %416, %cst_214 {dimension_numbers = #tpu.dot_dimension_numbers<[1], [0], [0], [1], [0, 0, 1, 1], [], []>} : vector<1x256xbf16>, vector<256x256xbf16>, vector<1x256xf32> -> vector<1x256xf32>
    %c0_215 = arith.constant 0 : index
    %c0_216 = arith.constant 0 : index
    %418 = vector.load %arg34[%c0_215, %c0_216] : memref<1x256xf32, #tpu.memory_space<vmem>>, vector<1x256xf32>
    %419 = arith.addf %417, %418 : vector<1x256xf32>
    %cst_217 = arith.constant 0.000000e+00 : f32
    %420 = vector.broadcast %cst_217 : f32 to vector<1x256xf32>
    %421 = arith.maximumf %419, %420 : vector<1x256xf32>
    %422 = arith.truncf %421 : vector<1x256xf32> to vector<1x256xbf16>
    %c0_218 = arith.constant 0 : index
    %c0_219 = arith.constant 0 : index
    %423 = vector.load %arg35[%c0_218, %c0_219] : memref<256x157xbf16, #tpu.memory_space<vmem>>, vector<256x157xbf16>
    %cst_220 = arith.constant dense<0.000000e+00> : vector<1x157xf32>
    %424 = tpu.matmul %422, %423, %cst_220 {dimension_numbers = #tpu.dot_dimension_numbers<[1], [0], [0], [1], [0, 0, 1, 1], [], []>} : vector<1x256xbf16>, vector<256x157xbf16>, vector<1x157xf32> -> vector<1x157xf32>
    %c0_221 = arith.constant 0 : index
    %c0_222 = arith.constant 0 : index
    %425 = vector.load %arg36[%c0_221, %c0_222] : memref<1x157xf32, #tpu.memory_space<vmem>>, vector<1x157xf32>
    %426 = arith.addf %424, %425 : vector<1x157xf32>
    %427 = arith.addf %380, %426 : vector<1x157xf32>
    %428 = arith.truncf %427 : vector<1x157xf32> to vector<1x157xbf16>
    %c0_223 = arith.constant 0 : index
    %c0_224 = arith.constant 0 : index
    %429 = vector.load %arg31[%c0_223, %c0_224] : memref<157x256xbf16, #tpu.memory_space<vmem>>, vector<157x256xbf16>
    %cst_225 = arith.constant dense<0.000000e+00> : vector<1x256xf32>
    %430 = tpu.matmul %428, %429, %cst_225 {dimension_numbers = #tpu.dot_dimension_numbers<[1], [0], [0], [1], [0, 0, 1, 1], [], []>} : vector<1x157xbf16>, vector<157x256xbf16>, vector<1x256xf32> -> vector<1x256xf32>
    %431 = arith.addf %408, %430 : vector<1x256xf32>
    %cst_226 = arith.constant 0.000000e+00 : f32
    %432 = vector.broadcast %cst_226 : f32 to vector<1x256xf32>
    %433 = arith.maximumf %431, %432 : vector<1x256xf32>
    %434 = arith.truncf %433 : vector<1x256xf32> to vector<1x256xbf16>
    %c0_227 = arith.constant 0 : index
    %c0_228 = arith.constant 0 : index
    %435 = vector.load %arg33[%c0_227, %c0_228] : memref<256x256xbf16, #tpu.memory_space<vmem>>, vector<256x256xbf16>
    %cst_229 = arith.constant dense<0.000000e+00> : vector<1x256xf32>
    %436 = tpu.matmul %434, %435, %cst_229 {dimension_numbers = #tpu.dot_dimension_numbers<[1], [0], [0], [1], [0, 0, 1, 1], [], []>} : vector<1x256xbf16>, vector<256x256xbf16>, vector<1x256xf32> -> vector<1x256xf32>
    %c0_230 = arith.constant 0 : index
    %c0_231 = arith.constant 0 : index
    %437 = vector.load %arg34[%c0_230, %c0_231] : memref<1x256xf32, #tpu.memory_space<vmem>>, vector<1x256xf32>
    %438 = arith.addf %436, %437 : vector<1x256xf32>
    %cst_232 = arith.constant 0.000000e+00 : f32
    %439 = vector.broadcast %cst_232 : f32 to vector<1x256xf32>
    %440 = arith.maximumf %438, %439 : vector<1x256xf32>
    %441 = arith.truncf %440 : vector<1x256xf32> to vector<1x256xbf16>
    %c0_233 = arith.constant 0 : index
    %c0_234 = arith.constant 0 : index
    %442 = vector.load %arg35[%c0_233, %c0_234] : memref<256x157xbf16, #tpu.memory_space<vmem>>, vector<256x157xbf16>
    %cst_235 = arith.constant dense<0.000000e+00> : vector<1x157xf32>
    %443 = tpu.matmul %441, %442, %cst_235 {dimension_numbers = #tpu.dot_dimension_numbers<[1], [0], [0], [1], [0, 0, 1, 1], [], []>} : vector<1x256xbf16>, vector<256x157xbf16>, vector<1x157xf32> -> vector<1x157xf32>
    %c0_236 = arith.constant 0 : index
    %c0_237 = arith.constant 0 : index
    %444 = vector.load %arg36[%c0_236, %c0_237] : memref<1x157xf32, #tpu.memory_space<vmem>>, vector<1x157xf32>
    %445 = arith.addf %443, %444 : vector<1x157xf32>
    %446 = arith.addf %427, %445 : vector<1x157xf32>
    %447 = arith.truncf %446 : vector<1x157xf32> to vector<1x157xbf16>
    %c0_238 = arith.constant 0 : index
    %c0_239 = arith.constant 0 : index
    %448 = vector.load %arg31[%c0_238, %c0_239] : memref<157x256xbf16, #tpu.memory_space<vmem>>, vector<157x256xbf16>
    %cst_240 = arith.constant dense<0.000000e+00> : vector<1x256xf32>
    %449 = tpu.matmul %447, %448, %cst_240 {dimension_numbers = #tpu.dot_dimension_numbers<[1], [0], [0], [1], [0, 0, 1, 1], [], []>} : vector<1x157xbf16>, vector<157x256xbf16>, vector<1x256xf32> -> vector<1x256xf32>
    %450 = arith.addf %408, %449 : vector<1x256xf32>
    %cst_241 = arith.constant 0.000000e+00 : f32
    %451 = vector.broadcast %cst_241 : f32 to vector<1x256xf32>
    %452 = arith.maximumf %450, %451 : vector<1x256xf32>
    %453 = arith.truncf %452 : vector<1x256xf32> to vector<1x256xbf16>
    %c0_242 = arith.constant 0 : index
    %c0_243 = arith.constant 0 : index
    %454 = vector.load %arg33[%c0_242, %c0_243] : memref<256x256xbf16, #tpu.memory_space<vmem>>, vector<256x256xbf16>
    %cst_244 = arith.constant dense<0.000000e+00> : vector<1x256xf32>
    %455 = tpu.matmul %453, %454, %cst_244 {dimension_numbers = #tpu.dot_dimension_numbers<[1], [0], [0], [1], [0, 0, 1, 1], [], []>} : vector<1x256xbf16>, vector<256x256xbf16>, vector<1x256xf32> -> vector<1x256xf32>
    %c0_245 = arith.constant 0 : index
    %c0_246 = arith.constant 0 : index
    %456 = vector.load %arg34[%c0_245, %c0_246] : memref<1x256xf32, #tpu.memory_space<vmem>>, vector<1x256xf32>
    %457 = arith.addf %455, %456 : vector<1x256xf32>
    %cst_247 = arith.constant 0.000000e+00 : f32
    %458 = vector.broadcast %cst_247 : f32 to vector<1x256xf32>
    %459 = arith.maximumf %457, %458 : vector<1x256xf32>
    %460 = arith.truncf %459 : vector<1x256xf32> to vector<1x256xbf16>
    %c0_248 = arith.constant 0 : index
    %c0_249 = arith.constant 0 : index
    %461 = vector.load %arg35[%c0_248, %c0_249] : memref<256x157xbf16, #tpu.memory_space<vmem>>, vector<256x157xbf16>
    %cst_250 = arith.constant dense<0.000000e+00> : vector<1x157xf32>
    %462 = tpu.matmul %460, %461, %cst_250 {dimension_numbers = #tpu.dot_dimension_numbers<[1], [0], [0], [1], [0, 0, 1, 1], [], []>} : vector<1x256xbf16>, vector<256x157xbf16>, vector<1x157xf32> -> vector<1x157xf32>
    %c0_251 = arith.constant 0 : index
    %c0_252 = arith.constant 0 : index
    %463 = vector.load %arg36[%c0_251, %c0_252] : memref<1x157xf32, #tpu.memory_space<vmem>>, vector<1x157xf32>
    %464 = arith.addf %462, %463 : vector<1x157xf32>
    %465 = arith.addf %446, %464 : vector<1x157xf32>
    %c0_253 = arith.constant 0 : index
    %c0_254 = arith.constant 0 : index
    %c0_255 = arith.constant 0 : index
    %466 = vector.load %arg38[%c0_253, %c0_254, %c0_255] : memref<1x1x157xf32, #tpu.memory_space<vmem>>, vector<1x1x157xf32>
    %467 = vector.shape_cast %466 : vector<1x1x157xf32> to vector<1x157xf32>
    %468 = vector.shape_cast %465 : vector<1x157xf32> to vector<1x1x157xf32>
    tpu.vector_store %arg38[%c0_253, %c0_254, %c0_255], %468 {strides = array<i32>} : memref<1x1x157xf32, #tpu.memory_space<vmem>>, vector<1x1x157xf32>,
    return
  }
  func.func @transform_0(%arg0: i32) -> (i32, i32, i32) {
    %c0_i32 = arith.constant 0 : i32
    %c0_i32_0 = arith.constant 0 : i32
    %c0_i32_1 = arith.constant 0 : i32
    return %arg0, %c0_i32, %c0_i32_0 : i32, i32, i32
  }
  func.func @transform_1(%arg0: i32) -> (i32, i32) {
    %c0_i32 = arith.constant 0 : i32
    %c0_i32_0 = arith.constant 0 : i32
    %c0_i32_1 = arith.constant 0 : i32
    return %c0_i32, %c0_i32_0 : i32, i32
  }
  func.func @transform_2(%arg0: i32) -> (i32, i32) {
    %c0_i32 = arith.constant 0 : i32
    %c0_i32_0 = arith.constant 0 : i32
    %c0_i32_1 = arith.constant 0 : i32
    return %c0_i32, %c0_i32_0 : i32, i32
  }
  func.func @transform_3(%arg0: i32) -> (i32, i32) {
    %c0_i32 = arith.constant 0 : i32
    %c0_i32_0 = arith.constant 0 : i32
    %c0_i32_1 = arith.constant 0 : i32
    return %c0_i32, %c0_i32_0 : i32, i32
  }
  func.func @transform_4(%arg0: i32) -> (i32, i32, i32) {
    %c0_i32 = arith.constant 0 : i32
    %c0_i32_0 = arith.constant 0 : i32
    %c0_i32_1 = arith.constant 0 : i32
    %c0_i32_2 = arith.constant 0 : i32
    return %c0_i32, %c0_i32_0, %c0_i32_1 : i32, i32, i32
  }
  func.func @transform_5(%arg0: i32) -> (i32, i32, i32) {
    %c0_i32 = arith.constant 0 : i32
    %c0_i32_0 = arith.constant 0 : i32
    %c0_i32_1 = arith.constant 0 : i32
    %c0_i32_2 = arith.constant 0 : i32
    return %c0_i32, %c0_i32_0, %c0_i32_1 : i32, i32, i32
  }
  func.func @transform_6(%arg0: i32) -> (i32, i32, i32) {
    %c0_i32 = arith.constant 0 : i32
    %c0_i32_0 = arith.constant 0 : i32
    %c0_i32_1 = arith.constant 0 : i32
    %c0_i32_2 = arith.constant 0 : i32
    return %c0_i32, %c0_i32_0, %c0_i32_1 : i32, i32, i32
  }
  func.func @transform_7(%arg0: i32) -> (i32, i32, i32) {
    %c0_i32 = arith.constant 0 : i32
    %c0_i32_0 = arith.constant 0 : i32
    %c0_i32_1 = arith.constant 0 : i32
    %c0_i32_2 = arith.constant 0 : i32
    return %c0_i32, %c0_i32_0, %c0_i32_1 : i32, i32, i32
  }
  func.func @transform_8(%arg0: i32) -> (i32, i32, i32) {
    %c0_i32 = arith.constant 0 : i32
    %c0_i32_0 = arith.constant 0 : i32
    %c0_i32_1 = arith.constant 0 : i32
    %c0_i32_2 = arith.constant 0 : i32
    return %c0_i32, %c0_i32_0, %c0_i32_1 : i32, i32, i32
  }
  func.func @transform_9(%arg0: i32) -> (i32, i32, i32) {
    %c0_i32 = arith.constant 0 : i32
    %c0_i32_0 = arith.constant 0 : i32
    %c0_i32_1 = arith.constant 0 : i32
    %c0_i32_2 = arith.constant 0 : i32
    return %c0_i32, %c0_i32_0, %c0_i32_1 : i32, i32, i32
  }
  func.func @transform_10(%arg0: i32) -> (i32, i32, i32) {
    %c0_i32 = arith.constant 0 : i32
    %c0_i32_0 = arith.constant 0 : i32
    %c0_i32_1 = arith.constant 0 : i32
    %c0_i32_2 = arith.constant 0 : i32
    return %c0_i32, %c0_i32_0, %c0_i32_1 : i32, i32, i32
  }
  func.func @transform_11(%arg0: i32) -> (i32, i32, i32) {
    %c0_i32 = arith.constant 0 : i32
    %c0_i32_0 = arith.constant 0 : i32
    %c0_i32_1 = arith.constant 0 : i32
    %c0_i32_2 = arith.constant 0 : i32
    return %c0_i32, %c0_i32_0, %c0_i32_1 : i32, i32, i32
  }
  func.func @transform_12(%arg0: i32) -> (i32, i32, i32) {
    %c0_i32 = arith.constant 0 : i32
    %c0_i32_0 = arith.constant 0 : i32
    %c0_i32_1 = arith.constant 0 : i32
    %c0_i32_2 = arith.constant 0 : i32
    return %c0_i32, %c0_i32_0, %c0_i32_1 : i32, i32, i32
  }
  func.func @transform_13(%arg0: i32) -> (i32, i32, i32) {
    %c0_i32 = arith.constant 0 : i32
    %c0_i32_0 = arith.constant 0 : i32
    %c0_i32_1 = arith.constant 0 : i32
    %c0_i32_2 = arith.constant 0 : i32
    return %c0_i32, %c0_i32_0, %c0_i32_1 : i32, i32, i32
  }
  func.func @transform_14(%arg0: i32) -> (i32, i32, i32) {
    %c0_i32 = arith.constant 0 : i32
    %c0_i32_0 = arith.constant 0 : i32
    %c0_i32_1 = arith.constant 0 : i32
    %c0_i32_2 = arith.constant 0 : i32
    return %c0_i32, %c0_i32_0, %c0_i32_1 : i32, i32, i32
  }
  func.func @transform_15(%arg0: i32) -> (i32, i32, i32) {
    %c0_i32 = arith.constant 0 : i32
    %c0_i32_0 = arith.constant 0 : i32
    %c0_i32_1 = arith.constant 0 : i32
    %c0_i32_2 = arith.constant 0 : i32
    return %c0_i32, %c0_i32_0, %c0_i32_1 : i32, i32, i32
  }
  func.func @transform_16(%arg0: i32) -> (i32, i32, i32) {
    %c0_i32 = arith.constant 0 : i32
    %c0_i32_0 = arith.constant 0 : i32
    %c0_i32_1 = arith.constant 0 : i32
    %c0_i32_2 = arith.constant 0 : i32
    return %c0_i32, %c0_i32_0, %c0_i32_1 : i32, i32, i32
  }
  func.func @transform_17(%arg0: i32) -> (i32, i32, i32) {
    %c0_i32 = arith.constant 0 : i32
    %c0_i32_0 = arith.constant 0 : i32
    %c0_i32_1 = arith.constant 0 : i32
    %c0_i32_2 = arith.constant 0 : i32
    return %c0_i32, %c0_i32_0, %c0_i32_1 : i32, i32, i32
  }
  func.func @transform_18(%arg0: i32) -> (i32, i32, i32) {
    %c0_i32 = arith.constant 0 : i32
    %c0_i32_0 = arith.constant 0 : i32
    %c0_i32_1 = arith.constant 0 : i32
    %c0_i32_2 = arith.constant 0 : i32
    return %c0_i32, %c0_i32_0, %c0_i32_1 : i32, i32, i32
  }
  func.func @transform_19(%arg0: i32) -> (i32, i32, i32) {
    %c0_i32 = arith.constant 0 : i32
    %c0_i32_0 = arith.constant 0 : i32
    %c0_i32_1 = arith.constant 0 : i32
    %c0_i32_2 = arith.constant 0 : i32
    return %c0_i32, %c0_i32_0, %c0_i32_1 : i32, i32, i32
  }
  func.func @transform_20(%arg0: i32) -> (i32, i32) {
    %c0_i32 = arith.constant 0 : i32
    %c0_i32_0 = arith.constant 0 : i32
    %c0_i32_1 = arith.constant 0 : i32
    return %c0_i32, %c0_i32_0 : i32, i32
  }
  func.func @transform_21(%arg0: i32) -> (i32, i32) {
    %c0_i32 = arith.constant 0 : i32
    %c0_i32_0 = arith.constant 0 : i32
    %c0_i32_1 = arith.constant 0 : i32
    return %c0_i32, %c0_i32_0 : i32, i32
  }
  func.func @transform_22(%arg0: i32) -> (i32, i32) {
    %c0_i32 = arith.constant 0 : i32
    %c0_i32_0 = arith.constant 0 : i32
    %c0_i32_1 = arith.constant 0 : i32
    return %c0_i32, %c0_i32_0 : i32, i32
  }
  func.func @transform_23(%arg0: i32) -> (i32, i32) {
    %c0_i32 = arith.constant 0 : i32
    %c0_i32_0 = arith.constant 0 : i32
    %c0_i32_1 = arith.constant 0 : i32
    return %c0_i32, %c0_i32_0 : i32, i32
  }
  func.func @transform_24(%arg0: i32) -> (i32, i32) {
    %c0_i32 = arith.constant 0 : i32
    %c0_i32_0 = arith.constant 0 : i32
    %c0_i32_1 = arith.constant 0 : i32
    return %c0_i32, %c0_i32_0 : i32, i32
  }
  func.func @transform_25(%arg0: i32) -> (i32, i32) {
    %c0_i32 = arith.constant 0 : i32
    %c0_i32_0 = arith.constant 0 : i32
    %c0_i32_1 = arith.constant 0 : i32
    return %c0_i32, %c0_i32_0 : i32, i32
  }
  func.func @transform_26(%arg0: i32) -> (i32, i32) {
    %c0_i32 = arith.constant 0 : i32
    %c0_i32_0 = arith.constant 0 : i32
    %c0_i32_1 = arith.constant 0 : i32
    return %c0_i32, %c0_i32_0 : i32, i32
  }
  func.func @transform_27(%arg0: i32) -> (i32, i32) {
    %c0_i32 = arith.constant 0 : i32
    %c0_i32_0 = arith.constant 0 : i32
    %c0_i32_1 = arith.constant 0 : i32
    return %c0_i32, %c0_i32_0 : i32, i32
  }
  func.func @transform_28(%arg0: i32) -> (i32, i32) {
    %c0_i32 = arith.constant 0 : i32
    %c0_i32_0 = arith.constant 0 : i32
    %c0_i32_1 = arith.constant 0 : i32
    return %c0_i32, %c0_i32_0 : i32, i32
  }
  func.func @transform_29(%arg0: i32) -> (i32, i32) {
    %c0_i32 = arith.constant 0 : i32
    %c0_i32_0 = arith.constant 0 : i32
    %c0_i32_1 = arith.constant 0 : i32
    return %c0_i32, %c0_i32_0 : i32, i32
  }
  func.func @transform_30(%arg0: i32) -> (i32, i32) {
    %c0_i32 = arith.constant 0 : i32
    %c0_i32_0 = arith.constant 0 : i32
    %c0_i32_1 = arith.constant 0 : i32
    return %c0_i32, %c0_i32_0 : i32, i32
  }
  func.func @transform_31(%arg0: i32) -> (i32, i32) {
    %c0_i32 = arith.constant 0 : i32
    %c0_i32_0 = arith.constant 0 : i32
    %c0_i32_1 = arith.constant 0 : i32
    return %c0_i32, %c0_i32_0 : i32, i32
  }
  func.func @transform_32(%arg0: i32) -> (i32, i32) {
    %c0_i32 = arith.constant 0 : i32
    %c0_i32_0 = arith.constant 0 : i32
    %c0_i32_1 = arith.constant 0 : i32
    return %c0_i32, %c0_i32_0 : i32, i32
  }
  func.func @transform_33(%arg0: i32) -> (i32, i32) {
    %c0_i32 = arith.constant 0 : i32
    %c0_i32_0 = arith.constant 0 : i32
    %c0_i32_1 = arith.constant 0 : i32
    return %c0_i32, %c0_i32_0 : i32, i32
  }
  func.func @transform_34(%arg0: i32) -> (i32, i32) {
    %c0_i32 = arith.constant 0 : i32
    %c0_i32_0 = arith.constant 0 : i32
    %c0_i32_1 = arith.constant 0 : i32
    return %c0_i32, %c0_i32_0 : i32, i32
  }
  func.func @transform_35(%arg0: i32) -> (i32, i32) {
    %c0_i32 = arith.constant 0 : i32
    %c0_i32_0 = arith.constant 0 : i32
    %c0_i32_1 = arith.constant 0 : i32
    return %c0_i32, %c0_i32_0 : i32, i32
  }
  func.func @transform_36(%arg0: i32) -> (i32, i32, i32) {
    %c0_i32 = arith.constant 0 : i32
    %c0_i32_0 = arith.constant 0 : i32
    %c0_i32_1 = arith.constant 0 : i32
    return %arg0, %c0_i32, %c0_i32_0 : i32, i32, i32
  }
  func.func @transform_37(%arg0: i32) -> (i32, i32, i32) {
    %c0_i32 = arith.constant 0 : i32
    %c0_i32_0 = arith.constant 0 : i32
    %c0_i32_1 = arith.constant 0 : i32
    return %arg0, %c0_i32, %c0_i32_0 : i32, i32, i32
  }
}

</mosaic_0001>

<bundles_post_ra>
// kernel: _lambda_.1
= control target key start
LH: loop header
LB: loop body
LE: loop exit
PB: predicated region body
PF: predicated region fallthrough
CT: control target
= control target key end

     0   :  { %s9848_s6 = smov 1   ;;  %s9849_s10 = smov 2   ;;  %s11262_s0 = inlined_call_operand.smem [shape: u32[38], index: -1, kind: input, shape index: {}] }
   0x1   :  { %s9922_s5 = sld [smem:[%s11262_s0]]   ;;  %s9850_s14 = smov 3  }
   0x2   :  { %s9927_s9 = sld [smem:[%s11262_s0 + %s9848_s6]]   ;;  %s9851_s18 = smov 4  }
   0x3   :  { %s9932_s13 = sld [smem:[%s11262_s0 + %s9849_s10]]   ;;  %s9852_s22 = smov 5  }
   0x4   :  { %s9937_s17 = sld [smem:[%s11262_s0 + %s9850_s14]]   ;;  %s9853_s26 = smov 6  }
   0x5   :  { %s9942_s21 = sld [smem:[%s11262_s0 + %s9851_s18]]   ;;  %s9854_s30 = smov 7  }
   0x6   :  { %s9947_s25 = sld [smem:[%s11262_s0 + %s9852_s22]]   ;;  %s9855_s4 = smov 8  }
   0x7   :  { %11388 = sst [smem:[#allocation37_spill]] %s9922_s5  ;;  %s9856_s10 = smov 9  }
   0x8   :  { %11389 = sst [smem:[#allocation38_spill]] %s9927_s9  ;;  %s9857_s15 = smov 10  }
   0x9   :  { %11390 = sst [smem:[#allocation39_spill]] %s9932_s13  ;;  %s9858_s20 = smov 11  }
   0xa   :  { %s9952_s29 = sld [smem:[%s11262_s0 + %s9853_s26]]   ;;  %s9859_s26 = smov 12  }
   0xb   :  { %11391 = sst [smem:[#allocation40_spill]] %s9942_s21  ;;  %s9860_s1 = smov 13  }
   0xc   :  { %11392 = sst [smem:[#allocation41_spill]] %s9947_s25  ;;  %s9861_s7 = smov 14  }
   0xd   :  { %s9957_s3 = sld [smem:[%s11262_s0 + %s9854_s30]]   ;;  %s9863_s22 = smov 16  }
   0xe   :  { %s9962_s8 = sld [smem:[%s11262_s0 + %s9855_s4]]   ;;  %s9864_s28 = smov 17  }
   0xf   :  { %s9967_s14 = sld [smem:[%s11262_s0 + %s9856_s10]]  }
  0x10   :  { %s9972_s19 = sld [smem:[%s11262_s0 + %s9857_s15]]   ;;  %s9862_s15 = smov 15  }
  0x11   :  { %s9977_s24 = sld [smem:[%s11262_s0 + %s9858_s20]]  }
  0x12   :  { %s9982_s30 = sld [smem:[%s11262_s0 + %s9859_s26]]  }
  0x13   :  { %11393 = sst [smem:[#allocation42_spill]] %s9957_s3 }
  0x14   :  { %s9987_s6 = sld [smem:[%s11262_s0 + %s9860_s1]]  }
  0x15   :  { %11394 = sst [smem:[#allocation43_spill]] %s9967_s14 }
  0x16   :  { %11395 = sst [smem:[#allocation44_spill]] %s9972_s19 }
  0x17   :  { %11396 = sst [smem:[#allocation45_spill]] %s9977_s24 }
  0x18   :  { %s9992_s12 = sld [smem:[%s11262_s0 + %s9861_s7]]   ;;  %s9865_s7 = smov 18  }
  0x19   :  { %s9997_s20 = sld [smem:[%s11262_s0 + %s9862_s15]]   ;;  %s9866_s15 = smov 19  }
  0x1a   :  { %11397 = sst [smem:[#allocation46_spill]] %s9987_s6 }
  0x1b   :  { %s10002_s27 = sld [smem:[%s11262_s0 + %s9863_s22]]   ;;  %s9867_s22 = smov 20  }
  0x1c   :  { %s10007_s4 = sld [smem:[%s11262_s0 + %s9864_s28]]   ;;  %s9868_s28 = smov 21  }
  0x1d   :  { %s10022_s6 = sld [smem:[%s11262_s0 + %s9867_s22]]   ;;  %s9871_s22 = smov 24  }
  0x1e   :  { %11398 = sst [smem:[#allocation47_spill]] %s9992_s12 }
  0x1f   :  { %11399 = sst [smem:[#allocation48_spill]] %s9997_s20 }
  0x20   :  { %s10012_s12 = sld [smem:[%s11262_s0 + %s9865_s7]]   ;;  %s9869_s7 = smov 22  }
  0x21   :  { %s10017_s20 = sld [smem:[%s11262_s0 + %s9866_s15]]   ;;  %s9870_s15 = smov 23  }
  0x22   :  { %11400 = sst [smem:[#allocation49_spill]] %s10007_s4 }
  0x23   :  { %11402 = sst [smem:[#allocation51_spill]] %s10022_s6 }
  0x24   :  { %s10027_s4 = sld [smem:[%s11262_s0 + %s9868_s28]]   ;;  %s9872_s28 = smov 25  }
  0x25   :  { %s10032_s24 = sld [smem:[%s11262_s0 + %s9869_s7]]   ;;  %s9873_s7 = smov 26  }
  0x26   :  { %s10042_s6 = sld [smem:[%s11262_s0 + %s9871_s22]]   ;;  %s9875_s22 = smov 28  }
  0x27   :  { %11401 = sst [smem:[#allocation50_spill]] %s10017_s20 }
  0x28   :  { %s10037_s20 = sld [smem:[%s11262_s0 + %s9870_s15]]   ;;  %s9874_s15 = smov 27  }
  0x29   :  { %s10052_s14 = sld [smem:[%s11262_s0 + %s9873_s7]]   ;;  %s9877_s7 = smov 30  }
  0x2a   :  { %11403 = sst [smem:[#allocation52_spill]] %s10027_s4 }
  0x2b   :  { %s10047_s4 = sld [smem:[%s11262_s0 + %s9872_s28]]   ;;  %s9876_s28 = smov 29  }
  0x2c   :  { %s10062_s19 = sld [smem:[%s11262_s0 + %s9875_s22]]   ;;  %s9879_s22 = smov 32  }
  0x2d   :  { %s10072_s25 = sld [smem:[%s11262_s0 + %s9877_s7]]   ;;  %s9881_s7 = smov 34  }
  0x2e   :  { %11404 = sst [smem:[#allocation53_spill]] %s10037_s20 }
  0x2f   :  { %s10057_s20 = sld [smem:[%s11262_s0 + %s9874_s15]]   ;;  %s9878_s15 = smov 31  }
  0x30   :  { %s10082_s21 = sld [smem:[%s11262_s0 + %s9879_s22]]   ;;  %s9883_s22 = smov 36  }
  0x31   :  { %11405 = sst [smem:[#allocation54_spill]] %s10047_s4 }
  0x32   :  { %s10067_s4 = sld [smem:[%s11262_s0 + %s9876_s28]]   ;;  %s9880_s28 = smov 33  }
  0x33   :  { %11407 = sst [smem:[#allocation56_spill]] %s10072_s25 }
  0x34   :  { %s10087_s13 = sld [smem:[%s11262_s0 + %s9880_s28]]   ;;  %s9884_s28 = smov 37  }
  0x35   :  { %11406 = sst [smem:[#allocation55_spill]] %s10057_s20 }
  0x36   :  { %s10077_s20 = sld [smem:[%s11262_s0 + %s9878_s15]]   ;;  %s9882_s15 = smov 35  }
  0x37   :  { %s10092_s5 = sld [smem:[%s11262_s0 + %s9881_s7]]  }
  0x38   :  { %s10102_s25 = sld [smem:[%s11262_s0 + %s9883_s22]]  }
  0x3a   :  { %11409 = sst [smem:[#allocation58_spill]] %s10087_s13 }
  0x3b   :  { %s10107_s13 = sld [smem:[%s11262_s0 + %s9884_s28]]  }
  0x3c   :  { %11408 = sst [smem:[#allocation57_spill]] %s10077_s20 }
  0x3d   :  { %s10097_s20 = sld [smem:[%s11262_s0 + %s9882_s15]]  }
  0x3e   :  { %11411 = sst [smem:[#allocation60_spill]] %s10102_s25 }
  0x41   :  { %11412 = sst [smem:[#allocation61_spill]] %s10107_s13 }
  0x43   :  { %11410 = sst [smem:[#allocation59_spill]] %s10097_s20 }
  0x44   :  { %81 = vsyncpa [#allocation3], 0 }
  0x45   :  { %83 = vsyncpa [#allocation3 + $0x1], 0 }
  0x46   :  { %84 = vsyncpa [#allocation5], 0 }
  0x47   :  { %85 = vsyncpa [#allocation8], 0 }
  0x48   :  { %86 = vsyncpa [#allocation11], 0 }
  0x49   :  { %87 = vsyncpa [#allocation14], 0 }
  0x4a   :  { %88 = vsyncpa [#allocation17], 0 }
  0x4b   :  { %89 = vsyncpa [#allocation20], 0 }
  0x4c   :  { %90 = vsyncpa [#allocation23], 0 }
  0x4d   :  { %91 = vsyncpa [#allocation26], 0  ;;  %s10109_s7 = smov 0   ;;  %s10111_s10 = smov 0  }
  0x4e   :  { %s10113_s11 = smov 0   ;;  %s10115_s15 = smov 0  }
  0x4f LB: > { %s11413_s3 = sld [smem:[#allocation42_spill]]  ;;  %s10133_s16 = sadd.s32 4294967295, %s9846_s15   ;;  %s9838_s10 = sphi %s10111_s10, %s11600_s10   ;;  %s9834_s7 = sphi %s10109_s7, %s11599_s7   ;;  %s9846_s15 = sphi %s10115_s15, %s11602_s15   ;;  %s9842_s11 = sphi %s10113_s11, %s11601_s11  }
  0x50   : > { %s11414_s9 = sld [smem:[#allocation38_spill]]  ;;  %p6857_p0 = scmp.ge.s32.totalorder %s9846_s15, 1 }
  0x51   : > { %11415 = sst [smem:[#allocation62_spill]] %s10133_s16  ;;  %p118_p1 = scmp.eq.s32.totalorder %s10133_s16, 0 }
  0x52   : > { %p915_p2 = scmp.lt.s32.totalorder %s9846_s15, 3  ;;  %s9885_s22 = smov [#allocation4]  }
  0x53   : > { %s928_s23 = sshll.u32 %s9885_s22, 4  ;;  %s961_s26 = sshll.u32 %s9952_s29, 4  ;;  %s929_s23 = int_to_ptr.vmem [resolvable:$true] %s928_s23  ;;  %s10151_s26 = int_to_ptr.hbm [resolvable:$true] %s961_s26 }
  0x54   : > { %p10138_p3 = pnand %p6857_p0, %p915_p2  ;;  %s989_s1 = sshll.u32 %s9962_s8, 4  ;;  %s10174_s1 = int_to_ptr.hbm [resolvable:$true] %s989_s1 }
  0x55   : > { %s9886_s2 = smov [#allocation7]  }
  0x56   : > { %s926_s0 = sshll.u32 %s11414_s9, 4  ;;  %p9017_p4 = pneg %p10138_p3  ;;  %s10130_s0 = int_to_ptr.hbm [resolvable:$true] %s926_s0 }
  0x57   : > { %s11416_s18 = scalar_select %p10138_p3, 1, 0 }
  0x58   : > { %p10147_p5 = pnand %p9017_p4, %p118_p1  ;;  %s10154_s13 = sshll.u32 %s9886_s2, 4  ;;  %s964_s13 = int_to_ptr.vmem [resolvable:$true] %s10154_s13 }
  0x59   : > { %11417 = sst [smem:[#allocation63_spill]] %s11416_s18  ;;  %s9270_s20 = sshra.s32 %s10130_s0, 4  ;;  %s9271_s20 = int_to_ptr.hbm [resolvable:$true] %s9270_s20 }
  0x5a   : > { %s9272_s22 = scalar_lea.hbm %s9271_s20, 1024  ;;  %p10159_p7 = pneg %p10147_p5 }
  0x5b   : > { %p9273_p6 = scmp.ne.s32.totalorder %s9271_s20, %s9272_s22  ;;  %s9277_s18 = scalar_lea.hbm %s11414_s9, 1024 }
  0x5c   : > { %p9278_p10 = scmp.lt.s32.totalorder %s9271_s20, %s11414_s9  ;;  %p9279_p11 = scmp.lt.s32.totalorder %s9277_s18, %s9272_s22 }
  0x5d   : > { %p9275_p8 = pnand %p10159_p7, %p9273_p6 }
  0x5e   : > { %p9280_p12 = por %p9279_p11, %p9278_p10 }
  0x5f   : > { %p9276_p9 = pneg %p9275_p8 }
  0x61   : > { %p9281_p13 = pnand %p9280_p12, %p9276_p9 }
  0x63   : > { %9284 = shalt.err (!%p9281_p13)
}
  0x64   : > { %s11280_s2 = smov 64   ;;  %s11282_s16 = smov 4  }
  0x65   : > { %9020 = dma.hbm_to_vmem [thread:$0]  (!%p10147_p5), %s10130_s0, 16384, %s929_s23, [#allocation5], %s11280_s2, %s11280_s2, %s11282_s16  }
  0x66   : > { %s9300_s20 = sshra.s32 %s10151_s26, 4  ;;  %s9307_s22 = scalar_lea.hbm %s9952_s29, 32  ;;  %s9301_s20 = int_to_ptr.hbm [resolvable:$true] %s9300_s20 }
  0x67   : > { %s9302_s18 = scalar_lea.hbm %s9301_s20, 32  ;;  %p9308_p6 = scmp.lt.s32.totalorder %s9301_s20, %s9952_s29 }
  0x68   : > { %p9303_p0 = scmp.ne.s32.totalorder %s9301_s20, %s9302_s18  ;;  %p9309_p8 = scmp.lt.s32.totalorder %s9307_s22, %s9302_s18 }
  0x6a   : > { %p9305_p2 = pnand %p9303_p0, %p10159_p7  ;;  %p9310_p9 = por %p9309_p8, %p9308_p6 }
  0x6c   : > { %p9306_p4 = pneg %p9305_p2 }
  0x6e   : > { %p9311_p10 = pnand %p9310_p9, %p9306_p4 }
  0x70   : > { %9314 = shalt.err (!%p9311_p10)
}
  0x71   : > { %9026 = dma.hbm_to_vmem [thread:$0]  (!%p10147_p5), %s10151_s26, 512, %s964_s13, [#allocation8], %s11280_s2, %s11280_s2, %s11282_s16  }
  0x72   : > { %s1035_s0 = sshll.u32 %s10002_s27, 4  ;;  %s9889_s23 = smov [#allocation10]   ;;  %s10188_s0 = int_to_ptr.hbm [resolvable:$true] %s1035_s0 }
  0x73   : > { %s991_s9 = sshll.u32 %s9889_s23, 4  ;;  %s9330_s20 = sshra.s32 %s10174_s1, 4  ;;  %s992_s9 = int_to_ptr.vmem [resolvable:$true] %s991_s9  ;;  %s9331_s20 = int_to_ptr.hbm [resolvable:$true] %s9330_s20 }
  0x74   : > { %s9332_s18 = scalar_lea.hbm %s9331_s20, 32  ;;  %s9337_s22 = scalar_lea.hbm %s9962_s8, 32 }
  0x75   : > { %p9333_p11 = scmp.ne.s32.totalorder %s9331_s20, %s9332_s18  ;;  %p9338_p0 = scmp.lt.s32.totalorder %s9331_s20, %s9962_s8 }
  0x76   : > { %p9339_p2 = scmp.lt.s32.totalorder %s9337_s22, %s9332_s18 }
  0x77   : > { %p9335_p12 = pnand %p9333_p11, %p10159_p7 }
  0x78   : > { %p9340_p4 = por %p9339_p2, %p9338_p0 }
  0x79   : > { %p9336_p13 = pneg %p9335_p12 }
  0x7b   : > { %p9341_p6 = pnand %p9340_p4, %p9336_p13 }
  0x7d   : > { %9344 = shalt.err (!%p9341_p6)
}
  0x7e   : > { %9032 = dma.hbm_to_vmem [thread:$0]  (!%p10147_p5), %s10174_s1, 512, %s992_s9, [#allocation11], %s11280_s2, %s11280_s2, %s11282_s16  }
  0x7f   : > { %s9890_s13 = smov [#allocation13]   ;;  %s1075_s23 = sshll.u32 %s10032_s24, 4  ;;  %s10202_s23 = int_to_ptr.hbm [resolvable:$true] %s1075_s23 }
  0x80   : > { %s1037_s26 = sshll.u32 %s9890_s13, 4  ;;  %s9360_s20 = sshra.s32 %s10188_s0, 4  ;;  %s1038_s26 = int_to_ptr.vmem [resolvable:$true] %s1037_s26  ;;  %s9361_s20 = int_to_ptr.hbm [resolvable:$true] %s9360_s20 }
  0x81   : > { %s9362_s18 = scalar_lea.hbm %s9361_s20, 32  ;;  %s9367_s22 = scalar_lea.hbm %s10002_s27, 32 }
  0x82   : > { %p9363_p8 = scmp.ne.s32.totalorder %s9361_s20, %s9362_s18  ;;  %p9368_p11 = scmp.lt.s32.totalorder %s9361_s20, %s10002_s27 }
  0x83   : > { %p9369_p12 = scmp.lt.s32.totalorder %s9367_s22, %s9362_s18 }
  0x84   : > { %p9365_p9 = pnand %p9363_p8, %p10159_p7 }
  0x85   : > { %p9370_p13 = por %p9369_p12, %p9368_p11 }
  0x86   : > { %p9366_p10 = pneg %p9365_p9 }
  0x88   : > { %p9371_p0 = pnand %p9370_p13, %p9366_p10 }
  0x8a   : > { %9374 = shalt.err (!%p9371_p0)
}
  0x8b   : > { %9038 = dma.hbm_to_vmem [thread:$0]  (!%p10147_p5), %s10188_s0, 512, %s1038_s26, [#allocation14], %s11280_s2, %s11280_s2, %s11282_s16  }
  0x8c   : > { %s1109_s9 = sshll.u32 %s10052_s14, 4  ;;  %s9891_s1 = smov [#allocation16]   ;;  %s10216_s9 = int_to_ptr.hbm [resolvable:$true] %s1109_s9 }
  0x8d   : > { %s1077_s13 = sshll.u32 %s9891_s1, 4  ;;  %s9390_s20 = sshra.s32 %s10202_s23, 4  ;;  %s1078_s13 = int_to_ptr.vmem [resolvable:$true] %s1077_s13  ;;  %s9391_s20 = int_to_ptr.hbm [resolvable:$true] %s9390_s20 }
  0x8e   : > { %s9392_s18 = scalar_lea.hbm %s9391_s20, 1024  ;;  %s9397_s22 = scalar_lea.hbm %s10032_s24, 1024 }
  0x8f   : > { %p9393_p2 = scmp.ne.s32.totalorder %s9391_s20, %s9392_s18  ;;  %p9398_p8 = scmp.lt.s32.totalorder %s9391_s20, %s10032_s24 }
  0x90   : > { %p9399_p9 = scmp.lt.s32.totalorder %s9397_s22, %s9392_s18 }
  0x91   : > { %p9395_p4 = pnand %p9393_p2, %p10159_p7 }
  0x92   : > { %p9400_p10 = por %p9399_p9, %p9398_p8 }
  0x93   : > { %p9396_p6 = pneg %p9395_p4 }
  0x95   : > { %p9401_p11 = pnand %p9400_p10, %p9396_p6 }
  0x97   : > { %9404 = shalt.err (!%p9401_p11)
}
  0x98   : > { %9044 = dma.hbm_to_vmem [thread:$0]  (!%p10147_p5), %s10202_s23, 16384, %s1078_s13, [#allocation17], %s11280_s2, %s11280_s2, %s11282_s16  }
  0x99   : > { %s9892_s0 = smov [#allocation19]   ;;  %s9420_s1 = sshra.s32 %s10216_s9, 4  ;;  %s9421_s1 = int_to_ptr.hbm [resolvable:$true] %s9420_s1 }
  0x9a   : > { %s1111_s26 = sshll.u32 %s9892_s0, 4  ;;  %s9422_s20 = scalar_lea.hbm %s9421_s1, 32  ;;  %s1112_s26 = int_to_ptr.vmem [resolvable:$true] %s1111_s26 }
  0x9b   : > { %p9423_p12 = scmp.ne.s32.totalorder %s9421_s1, %s9422_s20  ;;  %s9427_s18 = scalar_lea.hbm %s10052_s14, 32 }
  0x9c   : > { %p9428_p2 = scmp.lt.s32.totalorder %s9421_s1, %s10052_s14  ;;  %p9429_p4 = scmp.lt.s32.totalorder %s9427_s18, %s9422_s20 }
  0x9d   : > { %p9425_p13 = pnand %p9423_p12, %p10159_p7 }
  0x9e   : > { %p9430_p6 = por %p9429_p4, %p9428_p2 }
  0x9f   : > { %p9426_p0 = pneg %p9425_p13 }
  0xa1   : > { %p9431_p8 = pnand %p9430_p6, %p9426_p0 }
  0xa3   : > { %9434 = shalt.err (!%p9431_p8)
}
  0xa4   : > { %9050 = dma.hbm_to_vmem [thread:$0]  (!%p10147_p5), %s10216_s9, 512, %s1112_s26, [#allocation20], %s11280_s2, %s11280_s2, %s11282_s16  }
  0xa5   : > { %s1140_s23 = sshll.u32 %s10067_s4, 4  ;;  %s9893_s13 = smov [#allocation22]   ;;  %s1141_s23 = int_to_ptr.hbm [resolvable:$true] %s1140_s23 }
  0xa6   : > { %s1142_s22 = sshll.u32 %s9893_s13, 4  ;;  %s1171_s0 = sshll.u32 %s10082_s21, 4  ;;  %s1143_s22 = int_to_ptr.vmem [resolvable:$true] %s1142_s22  ;;  %s1172_s0 = int_to_ptr.hbm [resolvable:$true] %s1171_s0 }
  0xa7   : > { %s9450_s1 = sshra.s32 %s1141_s23, 4  ;;  %s9457_s18 = scalar_lea.hbm %s10067_s4, 32  ;;  %s9451_s1 = int_to_ptr.hbm [resolvable:$true] %s9450_s1 }
  0xa8   : > { %s9452_s20 = scalar_lea.hbm %s9451_s1, 32  ;;  %p9458_p12 = scmp.lt.s32.totalorder %s9451_s1, %s10067_s4 }
  0xa9   : > { %p9453_p9 = scmp.ne.s32.totalorder %s9451_s1, %s9452_s20  ;;  %p9459_p13 = scmp.lt.s32.totalorder %s9457_s18, %s9452_s20 }
  0xab   : > { %p9455_p10 = pnand %p9453_p9, %p10159_p7  ;;  %p9460_p0 = por %p9459_p13, %p9458_p12 }
  0xad   : > { %p9456_p11 = pneg %p9455_p10 }
  0xaf   : > { %p9461_p2 = pnand %p9460_p0, %p9456_p11 }
  0xb1   : > { %9464 = shalt.err (!%p9461_p2)
}
  0xb2   : > { %s11284_s9 = smov 128   ;;  %s11286_s26 = smov 8  }
  0xb3   : > { %9056 = dma.hbm_to_vmem [thread:$0]  (!%p10147_p5), %s1141_s23, 512, %s1143_s22, [#allocation23], %s11284_s9, %s11284_s9, %s11286_s26  }
  0xb4   : > { %s9896_s13 = smov [#allocation25]   ;;  %s944_s1 = sshll.u32 %s9937_s17, 4  ;;  %s10252_s1 = int_to_ptr.hbm [resolvable:$true] %s944_s1 }
  0xb5   : > { %s1173_s2 = sshll.u32 %s9896_s13, 4  ;;  %s9480_s20 = sshra.s32 %s1172_s0, 4  ;;  %s1174_s2 = int_to_ptr.vmem [resolvable:$true] %s1173_s2  ;;  %s9481_s20 = int_to_ptr.hbm [resolvable:$true] %s9480_s20 }
  0xb6   : > { %s9482_s18 = scalar_lea.hbm %s9481_s20, 256  ;;  %s9487_s16 = scalar_lea.hbm %s10082_s21, 256 }
  0xb7   : > { %p9483_p4 = scmp.ne.s32.totalorder %s9481_s20, %s9482_s18  ;;  %p9488_p9 = scmp.lt.s32.totalorder %s9481_s20, %s10082_s21 }
  0xb8   : > { %p9489_p10 = scmp.lt.s32.totalorder %s9487_s16, %s9482_s18 }
  0xb9   : > { %p9485_p6 = pnand %p9483_p4, %p10159_p7 }
  0xba   : > { %p9490_p11 = por %p9489_p10, %p9488_p9 }
  0xbb   : > { %p9486_p8 = pneg %p9485_p6 }
  0xbd   : > { %p9491_p12 = pnand %p9490_p11, %p9486_p8 }
  0xbf   : > { %9494 = shalt.err (!%p9491_p12)
}
  0xc0   : > { %9062 = dma.hbm_to_vmem [thread:$0]  (!%p10147_p5), %s1172_s0, 4096, %s1174_s2, [#allocation26], %s11284_s9, %s11284_s9, %s11286_s26  }
  0xc1   : > { %s975_s23 = sshll.u32 %s11413_s3, 4  ;;  %s9897_s22 = smov [#allocation6]   ;;  %s10264_s23 = int_to_ptr.hbm [resolvable:$true] %s975_s23 }
  0xc2   : > { %s946_s13 = sshll.u32 %s9897_s22, 4  ;;  %s9510_s16 = sshra.s32 %s10252_s1, 4  ;;  %s947_s13 = int_to_ptr.vmem [resolvable:$true] %s946_s13  ;;  %s9511_s16 = int_to_ptr.hbm [resolvable:$true] %s9510_s16 }
  0xc3   : > { %s9512_s20 = scalar_lea.hbm %s9511_s16, 8  ;;  %s9517_s18 = scalar_lea.hbm %s9937_s17, 8 }
  0xc4   : > { %p9513_p13 = scmp.ne.s32.totalorder %s9511_s16, %s9512_s20  ;;  %p9518_p4 = scmp.lt.s32.totalorder %s9511_s16, %s9937_s17 }
  0xc5   : > { %p9519_p6 = scmp.lt.s32.totalorder %s9517_s18, %s9512_s20 }
  0xc6   : > { %p9515_p0 = pnand %p9513_p13, %p10159_p7 }
  0xc7   : > { %p9520_p8 = por %p9519_p6, %p9518_p4 }
  0xc8   : > { %p9516_p2 = pneg %p9515_p0 }
  0xca   : > { %p9521_p9 = pnand %p9520_p8, %p9516_p2 }
  0xcc   : > { %9524 = shalt.err (!%p9521_p9)
}
  0xcd   : > { %9023 = dma.hbm_to_vmem [thread:$0]  (!%p10147_p5), %s10252_s1, 128, %s947_s13, [#allocation5]  }
  0xce   : > { %s9898_s2 = smov [#allocation9]   ;;  %s1012_s22 = sshll.u32 %s9982_s30, 4  ;;  %s10275_s22 = int_to_ptr.hbm [resolvable:$true] %s1012_s22 }
  0xcf   : > { %s977_s0 = sshll.u32 %s9898_s2, 4  ;;  %s9540_s16 = sshra.s32 %s10264_s23, 4  ;;  %s978_s0 = int_to_ptr.vmem [resolvable:$true] %s977_s0  ;;  %s9541_s16 = int_to_ptr.hbm [resolvable:$true] %s9540_s16 }
  0xd0   : > { %s9542_s20 = scalar_lea.hbm %s9541_s16, 32  ;;  %s9547_s18 = scalar_lea.hbm %s11413_s3, 32 }
  0xd1   : > { %p9543_p10 = scmp.ne.s32.totalorder %s9541_s16, %s9542_s20  ;;  %p9548_p13 = scmp.lt.s32.totalorder %s9541_s16, %s11413_s3 }
  0xd2   : > { %p9549_p0 = scmp.lt.s32.totalorder %s9547_s18, %s9542_s20 }
  0xd3   : > { %p9545_p11 = pnand %p9543_p10, %p10159_p7 }
  0xd4   : > { %p9550_p2 = por %p9549_p0, %p9548_p13 }
  0xd5   : > { %p9546_p12 = pneg %p9545_p11 }
  0xd7   : > { %p9551_p4 = pnand %p9550_p2, %p9546_p12 }
  0xd9   : > { %9554 = shalt.err (!%p9551_p4)
}
  0xda   : > { %s11420_s1 = smov 4   ;;  %s11421_s13 = smov 64  }
  0xdb   : > { %9029 = dma.hbm_to_vmem [thread:$0]  (!%p10147_p5), %s10264_s23, 512, %s978_s0, [#allocation8], %s11421_s13, %s11421_s13, %s11420_s1  }
  0xdc   : > { %s1052_s2 = sshll.u32 %s10012_s12, 4  ;;  %s9899_s9 = smov [#allocation12]   ;;  %s10289_s2 = int_to_ptr.hbm [resolvable:$true] %s1052_s2 }
  0xdd   : > { %s1014_s26 = sshll.u32 %s9899_s9, 4  ;;  %s9570_s16 = sshra.s32 %s10275_s22, 4  ;;  %s1015_s26 = int_to_ptr.vmem [resolvable:$true] %s1014_s26  ;;  %s9571_s16 = int_to_ptr.hbm [resolvable:$true] %s9570_s16 }
  0xde   : > { %s9572_s20 = scalar_lea.hbm %s9571_s16, 32  ;;  %s9577_s18 = scalar_lea.hbm %s9982_s30, 32 }
  0xdf   : > { %p9573_p6 = scmp.ne.s32.totalorder %s9571_s16, %s9572_s20  ;;  %p9578_p10 = scmp.lt.s32.totalorder %s9571_s16, %s9982_s30 }
  0xe0   : > { %p9579_p11 = scmp.lt.s32.totalorder %s9577_s18, %s9572_s20 }
  0xe1   : > { %p9575_p8 = pnand %p9573_p6, %p10159_p7 }
  0xe2   : > { %p9580_p12 = por %p9579_p11, %p9578_p10 }
  0xe3   : > { %p9576_p9 = pneg %p9575_p8 }
  0xe5   : > { %p9581_p13 = pnand %p9580_p12, %p9576_p9 }
  0xe7   : > { %9584 = shalt.err (!%p9581_p13)
}
  0xe8   : > { %9035 = dma.hbm_to_vmem [thread:$0]  (!%p10147_p5), %s10275_s22, 512, %s1015_s26, [#allocation11], %s11421_s13, %s11421_s13, %s11420_s1  }
  0xe9   : > { %s9900_s9 = smov [#allocation15]   ;;  %s1092_s0 = sshll.u32 %s10042_s6, 4  ;;  %s10303_s0 = int_to_ptr.hbm [resolvable:$true] %s1092_s0 }
  0xea   : > { %s1054_s23 = sshll.u32 %s9900_s9, 4  ;;  %s9600_s16 = sshra.s32 %s10289_s2, 4  ;;  %s1055_s23 = int_to_ptr.vmem [resolvable:$true] %s1054_s23  ;;  %s9601_s16 = int_to_ptr.hbm [resolvable:$true] %s9600_s16 }
  0xeb   : > { %s9602_s20 = scalar_lea.hbm %s9601_s16, 128  ;;  %s9607_s18 = scalar_lea.hbm %s10012_s12, 128 }
  0xec   : > { %p9603_p0 = scmp.ne.s32.totalorder %s9601_s16, %s9602_s20  ;;  %p9608_p6 = scmp.lt.s32.totalorder %s9601_s16, %s10012_s12 }
  0xed   : > { %p9609_p8 = scmp.lt.s32.totalorder %s9607_s18, %s9602_s20 }
  0xee   : > { %p9605_p2 = pnand %p9603_p0, %p10159_p7 }
  0xef   : > { %p9610_p9 = por %p9609_p8, %p9608_p6 }
  0xf0   : > { %p9606_p4 = pneg %p9605_p2 }
  0xf2   : > { %p9611_p10 = pnand %p9610_p9, %p9606_p4 }
  0xf4   : > { %9614 = shalt.err (!%p9611_p10)
}
  0xf5   : > { %9041 = dma.hbm_to_vmem [thread:$0]  (!%p10147_p5), %s10289_s2, 2048, %s1055_s23, [#allocation14], %s11421_s13, %s11421_s13, %s11420_s1  }
  0xf6   : > { %s1126_s26 = sshll.u32 %s10062_s19, 4  ;;  %s9901_s22 = smov [#allocation18]   ;;  %s10317_s26 = int_to_ptr.hbm [resolvable:$true] %s1126_s26 }
  0xf7   : > { %s1094_s9 = sshll.u32 %s9901_s22, 4  ;;  %s9630_s16 = sshra.s32 %s10303_s0, 4  ;;  %s1095_s9 = int_to_ptr.vmem [resolvable:$true] %s1094_s9  ;;  %s9631_s16 = int_to_ptr.hbm [resolvable:$true] %s9630_s16 }
  0xf8   : > { %s9632_s20 = scalar_lea.hbm %s9631_s16, 32  ;;  %s9637_s18 = scalar_lea.hbm %s10042_s6, 32 }
  0xf9   : > { %p9633_p11 = scmp.ne.s32.totalorder %s9631_s16, %s9632_s20  ;;  %p9638_p0 = scmp.lt.s32.totalorder %s9631_s16, %s10042_s6 }
  0xfa   : > { %p9639_p2 = scmp.lt.s32.totalorder %s9637_s18, %s9632_s20 }
  0xfb   : > { %p9635_p12 = pnand %p9633_p11, %p10159_p7 }
  0xfc   : > { %p9640_p4 = por %p9639_p2, %p9638_p0 }
  0xfd   : > { %p9636_p13 = pneg %p9635_p12 }
  0xff   : > { %p9641_p6 = pnand %p9640_p4, %p9636_p13 }
 0x101   : > { %9644 = shalt.err (!%p9641_p6)
}
 0x102   : > { %s11422_s2 = sld [smem:[#allocation56_spill]]  ;;  %s9902_s23 = smov [#allocation21]  }
 0x103   : > { %9047 = dma.hbm_to_vmem [thread:$0]  (!%p10147_p5), %s10303_s0, 512, %s1095_s9, [#allocation17], %s11421_s13, %s11421_s13, %s11420_s1  }
 0x104   : > { %s1128_s22 = sshll.u32 %s9902_s23, 4  ;;  %s9660_s16 = sshra.s32 %s10317_s26, 4  ;;  %s1129_s22 = int_to_ptr.vmem [resolvable:$true] %s1128_s22  ;;  %s9661_s16 = int_to_ptr.hbm [resolvable:$true] %s9660_s16 }
 0x105   : > { %s9662_s20 = scalar_lea.hbm %s9661_s16, 64  ;;  %s9667_s18 = scalar_lea.hbm %s10062_s19, 64 }
 0x106   : > { %p9663_p8 = scmp.ne.s32.totalorder %s9661_s16, %s9662_s20  ;;  %p9668_p11 = scmp.lt.s32.totalorder %s9661_s16, %s10062_s19 }
 0x107   : > { %p9669_p12 = scmp.lt.s32.totalorder %s9667_s18, %s9662_s20 }
 0x108   : > { %s1154_s3 = sshll.u32 %s11422_s2, 4  ;;  %p9665_p9 = pnand %p9663_p8, %p10159_p7  ;;  %s10331_s3 = int_to_ptr.hbm [resolvable:$true] %s1154_s3 }
 0x109   : > { %p9670_p13 = por %p9669_p12, %p9668_p11 }
 0x10a   : > { %p9666_p10 = pneg %p9665_p9 }
 0x10c   : > { %p9671_p0 = pnand %p9670_p13, %p9666_p10 }
 0x10e   : > { %9674 = shalt.err (!%p9671_p0)
}
 0x10f   : > { %s11423_s1 = smov 8   ;;  %s11424_s13 = smov 128  }
 0x110   : > { %9053 = dma.hbm_to_vmem [thread:$0]  (!%p10147_p5), %s10317_s26, 1024, %s1129_s22, [#allocation20], %s11424_s13, %s11424_s13, %s11423_s1  }
 0x111   : > { %s1188_s0 = sshll.u32 %s10092_s5, 4  ;;  %s9903_s9 = smov [#allocation24]   ;;  %s10345_s0 = int_to_ptr.hbm [resolvable:$true] %s1188_s0 }
 0x112   : > { %s1156_s23 = sshll.u32 %s9903_s9, 4  ;;  %s9690_s16 = sshra.s32 %s10331_s3, 4  ;;  %s1157_s23 = int_to_ptr.vmem [resolvable:$true] %s1156_s23  ;;  %s9691_s16 = int_to_ptr.hbm [resolvable:$true] %s9690_s16 }
 0x113   : > { %s9692_s20 = scalar_lea.hbm %s9691_s16, 160  ;;  %s9697_s18 = scalar_lea.hbm %s11422_s2, 160 }
 0x114   : > { %p9693_p2 = scmp.ne.s32.totalorder %s9691_s16, %s9692_s20  ;;  %p9698_p8 = scmp.lt.s32.totalorder %s9691_s16, %s11422_s2 }
 0x115   : > { %p9699_p9 = scmp.lt.s32.totalorder %s9697_s18, %s9692_s20 }
 0x116   : > { %p9695_p4 = pnand %p9693_p2, %p10159_p7 }
 0x117   : > { %p9700_p10 = por %p9699_p9, %p9698_p8 }
 0x118   : > { %p9696_p6 = pneg %p9695_p4 }
 0x11a   : > { %p9701_p11 = pnand %p9700_p10, %p9696_p6 }
 0x11c   : > { %9704 = shalt.err (!%p9701_p11)
}
 0x11d   : > { %9059 = dma.hbm_to_vmem [thread:$0]  (!%p10147_p5), %s10331_s3, 2560, %s1157_s23, [#allocation23], %s11424_s13, %s11424_s13, %s11423_s1  }
 0x11e   : > { %s9904_s26 = smov [#allocation27]   ;;  %s9720_s9 = sshra.s32 %s10345_s0, 4  ;;  %s9721_s9 = int_to_ptr.hbm [resolvable:$true] %s9720_s9 }
 0x11f   : > { %s1190_s22 = sshll.u32 %s9904_s26, 4  ;;  %s9722_s16 = scalar_lea.hbm %s9721_s9, 256  ;;  %s1191_s22 = int_to_ptr.vmem [resolvable:$true] %s1190_s22 }
 0x120   : > { %p9723_p12 = scmp.ne.s32.totalorder %s9721_s9, %s9722_s16  ;;  %s9727_s20 = scalar_lea.hbm %s10092_s5, 256 }
 0x121   : > { %p9728_p2 = scmp.lt.s32.totalorder %s9721_s9, %s10092_s5  ;;  %p9729_p4 = scmp.lt.s32.totalorder %s9727_s20, %s9722_s16 }
 0x122   : > { %p9725_p13 = pnand %p9723_p12, %p10159_p7 }
 0x123   : > { %p9730_p6 = por %p9729_p4, %p9728_p2 }
 0x124   : > { %p9726_p0 = pneg %p9725_p13 }
 0x126   : > { %p9731_p8 = pnand %p9730_p6, %p9726_p0 }
 0x128   : > { %9734 = shalt.err (!%p9731_p8)
}
 0x129   : > { %s11426_s3 = sld [smem:[#allocation37_spill]]  ;;  %s10370_s28 = sadd.s32 1, %s9846_s15  }
 0x12a   : > { %9065 = dma.hbm_to_vmem [thread:$0]  (!%p10147_p5), %s10345_s0, 4096, %s1191_s22, [#allocation26], %s11424_s13, %s11424_s13, %s11423_s1  }
 0x12b   : > { %s101_s23 = ssub.s32 %s9846_s15, %s10370_s28  ;;  %s104_s18 = sadd.s32 1, %s9842_s11 }
 0x12c   : > { %p102_p7 = scmp.eq.s32.totalorder %s101_s23, 0  ;;  %p111_p9 = scmp.ne.s32.totalorder %s9842_s11, %s9838_s10 }
 0x12d   : > { %p112_p10 = scmp.eq.s32.totalorder %s9846_s15, 0  ;;  %p117_p11 = scmp.ne.s32.totalorder %s9838_s10, %s9834_s7 }
 0x12e   : > { %s10381_s26 = scalar_select %p102_p7, %s9842_s11, %s104_s18  }
 0x12f   : > { %p10385_p12 = por %p118_p1, %p117_p11  ;;  %p9086_p13 = scmp.lt.s32.totalorder %s9846_s15, 2 }
 0x130   : > { %s1207_s16 = sand.u32 1, %s9842_s11   ;;  %s8550_s20 = sshll.u32 %s9846_s15, 7 }
 0x131   : > { %p113_p5 = por %p112_p10, %p111_p9  ;;  %s6875_s1 = sshll.u32 %s1207_s16, 7 }
 0x132   : > { %s1216_s13 = scalar_lea.hbm %s11426_s3, %s8550_s20  ;;  %s1211_s22 = scalar_lea.vmem [#allocation2], %s6875_s1 }
 0x133   : > { %s1218_s0 = sshll.u32 %s1216_s13, 4  ;;  %s1220_s23 = sshll.u32 %s1211_s22, 4  ;;  %s1219_s0 = int_to_ptr.hbm [resolvable:$true] %s1218_s0  ;;  %s1221_s23 = int_to_ptr.vmem [resolvable:$true] %s1220_s23 }
 0x134   : > { %p10393_p0 = pnand %p9086_p13, %p113_p5  ;;  %s1208_s25 = scalar_lea.sflag [#allocation3], %s1207_s16 }
 0x135   : > { %s9750_s18 = sshra.s32 %s1219_s0, 4  ;;  %s9757_s15 = scalar_lea.hbm %s11426_s3, 256  ;;  %s9751_s18 = int_to_ptr.hbm [resolvable:$true] %s9750_s18 }
 0x136   : > { %s9752_s2 = scalar_lea.hbm %s9751_s18, 128  ;;  %p9754_p4 = pneg %p10393_p0 }
 0x137   : > { %p9753_p2 = scmp.ne.s32.totalorder %s9751_s18, %s9752_s2  ;;  %p9758_p7 = scmp.lt.s32.totalorder %s9751_s18, %s11426_s3 }
 0x138   : > { %p9759_p9 = scmp.lt.s32.totalorder %s9757_s15, %s9752_s2 }
 0x139   : > { %p9755_p6 = pnand %p9754_p4, %p9753_p2 }
 0x13a   : > { %p9760_p10 = por %p9759_p9, %p9758_p7 }
 0x13b   : > { %p9756_p8 = pneg %p9755_p6 }
 0x13d   : > { %p9761_p11 = pnand %p9760_p10, %p9756_p8 }
 0x13f   : > { %9764 = shalt.err (!%p9761_p11)
}
 0x140   : > { %9069 = dma.hbm_to_vmem [thread:$0]  (!%p10393_p0), %s1219_s0, 2048, %s1221_s23, %s1208_s25  }
 0x141   : > { %1229 = sbr.rel (%p10138_p3) target bundleno = 6142 (0x17fe), region = 164 }
 0x146   : > { %s1231_s16 = sand.u32 1, %s9838_s10  }
 0x147   : > { %s6879_s1 = sshll.u32 %s1231_s16, 7  ;;  %s1232_s13 = scalar_lea.sflag [#allocation3], %s1231_s16 }
 0x148   : > { %s10406_s22 = scalar_lea.vmem [#allocation2], %s6879_s1 }
 0x149   : > { %9797 = dma.done.wait (%p10385_p12), %s1232_s13, 2048  }
 0x14a   : > { %9799 = vsyncadd (%p10385_p12), %s1232_s13, 4294965248  ;;  %s11430_s2 = sld [smem:[#allocation62_spill]] }
 0x14b   : > { %9801 = dma.done.wait (%p118_p1), [#allocation5], 16512  }
 0x14c   : > { %9803 = vsyncadd (%p118_p1), [#allocation5], 4294950784 }
 0x14d   : > { %9805 = dma.done.wait (%p118_p1), [#allocation8], 1024  }
 0x14e   : > { %9807 = vsyncadd (%p118_p1), [#allocation8], 4294966272 }
 0x14f   : > { %9809 = dma.done.wait (%p118_p1), [#allocation11], 1024  }
 0x150   : > { %9811 = vsyncadd (%p118_p1), [#allocation11], 4294966272 }
 0x151   : > { %9813 = dma.done.wait (%p118_p1), [#allocation14], 2560  }
 0x152   : > { %9815 = vsyncadd (%p118_p1), [#allocation14], 4294964736 }
 0x153   : > { %9817 = dma.done.wait (%p118_p1), [#allocation17], 16896  }
 0x154   : > { %9819 = vsyncadd (%p118_p1), [#allocation17], 4294950400 }
 0x155   : > { %9821 = dma.done.wait (%p118_p1), [#allocation20], 1536  }
 0x156   : > { %9823 = vsyncadd (%p118_p1), [#allocation20], 4294965760 }
 0x157   : > { %9825 = dma.done.wait (%p118_p1), [#allocation23], 3072  }
 0x158   : > { %9827 = vsyncadd (%p118_p1), [#allocation23], 4294964224 }
 0x159   : > { %9829 = dma.done.wait (%p118_p1), [#allocation26], 8192  }
 0x15a   : > { %9831 = vsyncadd (%p118_p1), [#allocation26], 4294959104  ;;  %v8558_v0 = vld [vmem:[#allocation4 + $0x38] sm:$0xff]  ;;  %v8557_v4 = vld [vmem:[#allocation4 + $0x30] sm:$0xff]  ;;  %s11431_s9 = sld [smem:[#allocation39_spill]]  ;;  %vm2739_vm0 = vcmask 261120  }
 0x15b   : > { %v8566_v1 = vld [vmem:[#allocation4 + $0x78] sm:$0xff]  ;;  %2527 = vmatpush.bf16.msra.mxu0 %v8558_v0  ;;  %v8565_v5 = vld [vmem:[#allocation4 + $0x70] sm:$0xff]  ;;  %v8556_v8 = vld [vmem:[#allocation4 + $0x28] sm:$0xff]  ;;  %s11432_s0 = sld [smem:[#allocation40_spill]]  ;;  %vm2883_vm5 = vcmask 64512   ;;  %vm2918_vm6 = vcmask 1043456  }
 0x15c   : > { %v8574_v2 = vld [vmem:[#allocation4 + $0xb8] sm:$0xff]  ;;  %2540 = vmatpush.bf16.msra.mxu1 %v8566_v1  ;;  %v8573_v6 = vld [vmem:[#allocation4 + $0xb0] sm:$0xff]  ;;  %v8564_v9 = vld [vmem:[#allocation4 + $0x68] sm:$0xff]  ;;  %s11433_s23 = sld [smem:[#allocation41_spill]]  ;;  %s11295_s16 = smov 112   ;;  %vm3125_vm7 = vcmask 130048  }
 0x15d   : > { %v8582_v3 = vld [vmem:[#allocation4 + $0xf8] sm:$0xff]  ;;  %2553 = vmatpush.bf16.msra.mxu2 %v8574_v2  ;;  %v8581_v7 = vld [vmem:[#allocation4 + $0xf0] sm:$0xff]  ;;  %v8572_v10 = vld [vmem:[#allocation4 + $0xa8] sm:$0xff]  ;;  %s11434_s7 = sld [smem:[#allocation44_spill]]  ;;  %s11297_s1 = smov 120   ;;  %vm3127_vm8 = vcmask 195584  }
 0x15e   : > { %2566 = vmatpush.bf16.msra.mxu3 %v8582_v3  ;;  %v8580_v11 = vld [vmem:[#allocation4 + $0xe8] sm:$0xff]  ;;  %v8555_v12 = vld [vmem:[#allocation4 + $0x20] sm:$0xff]  ;;  %v8554_v16 = vld [vmem:[#allocation4 + $0x18] sm:$0xff]  ;;  %s11436_s18 = sld [smem:[#allocation43_spill]]  ;;  %s11290_s13 = smov 104  }
 0x15f   : > { %2528 = vmatpush.bf16.msra.mxu0 %v8557_v4  ;;  %v8563_v13 = vld [vmem:[#allocation4 + $0x60] sm:$0xff]  ;;  %v8562_v17 = vld [vmem:[#allocation4 + $0x58] sm:$0xff]  ;;  %v8553_v20 = vld [vmem:[#allocation4 + $0x10] sm:$0xff]  ;;  %s11437_s15 = sld [smem:[#allocation45_spill]]  ;;  %p1410_p1 = scmp.lt.s32.totalorder %s11430_s2, 1 }
 0x160   : > { %2541 = vmatpush.bf16.msra.mxu1 %v8565_v5  ;;  %v8571_v14 = vld [vmem:[#allocation4 + $0xa0] sm:$0xff]  ;;  %v8570_v18 = vld [vmem:[#allocation4 + $0x98] sm:$0xff]  ;;  %v8561_v21 = vld [vmem:[#allocation4 + $0x50] sm:$0xff] }
 0x161   : > { %2554 = vmatpush.bf16.msra.mxu2 %v8573_v6  ;;  %v8579_v15 = vld [vmem:[#allocation4 + $0xe0] sm:$0xff]  ;;  %v8578_v19 = vld [vmem:[#allocation4 + $0xd8] sm:$0xff]  ;;  %v8569_v22 = vld [vmem:[#allocation4 + $0x90] sm:$0xff]  ;;  %s11604_s2 = smov (!%p1410_p1, %s11430_s2), 1 }
 0x162   : > { %2567 = vmatpush.bf16.msra.mxu3 %v8581_v7  ;;  %v8577_v23 = vld [vmem:[#allocation4 + $0xd0] sm:$0xff]  ;;  %v1422_v25 = vld [vmem:[%s10406_s22 + $0x18] sm:$0xff]  ;;  %v1419_v26 = vld [vmem:[%s10406_s22] sm:$0xff] }
 0x163   : > { %2529 = vmatpush.bf16.msra.mxu0 %v8556_v8  ;;  %v1421_v24 = vld [vmem:[%s10406_s22 + $0x10] sm:$0xff]  ;;  %v1420_v27 = vld [vmem:[%s10406_s22 + $0x8] sm:$0xff]  ;;  %v8551_v34 = vld [vmem:[#allocation4] sm:$0xff]  ;;  %s11435_s25 = smov %s11434_s7 }
 0x164   : > { %2542 = vmatpush.bf16.msra.mxu1 %v8564_v9  ;;  %v8552_v28 = vld [vmem:[#allocation4 + $0x8] sm:$0xff]  ;;  %v1436_v30 = vpack.c.bf16 %v1422_v25, %v1421_v24  ;;  %v1435_v31 = vpack.c.bf16 %v1420_v27, %v1419_v26  ;;  %v8559_v35 = vld [vmem:[#allocation4 + $0x40] sm:$0xff]  ;;  %v8590_v42 = vld [vmem:[#allocation4 + $0x138] sm:$0xff] }
 0x165   : > { %2555 = vmatpush.bf16.msra.mxu2 %v8572_v10  ;;  %v8560_v29 = vld [vmem:[#allocation4 + $0x48] sm:$0xff]  ;;  %v8567_v38 = vld [vmem:[#allocation4 + $0x80] sm:$0xff]  ;;  %v8598_v43 = vld [vmem:[#allocation4 + $0x178] sm:$0xff]  ;;  %s11438_s20 = smov %s11437_s15 }
 0x166   : > { %2568 = vmatpush.bf16.msra.mxu3 %v8580_v11  ;;  %v8568_v32 = vld [vmem:[#allocation4 + $0x88] sm:$0xff]  ;;  %v1713_v36 = vunpack.c.l.b16 %v1436_v30  ;;  %v1711_v37 = vunpack.c.l.b16 %v1435_v31  ;;  %v8575_v39 = vld [vmem:[#allocation4 + $0xc0] sm:$0xff]  ;;  %v1714_v40 = vunpack.c.h.b16 %v1436_v30  ;;  %v1712_v41 = vunpack.c.h.b16 %v1435_v31  ;;  %v8606_v44 = vld [vmem:[#allocation4 + $0x1b8] sm:$0xff] }
 0x167   : > { %2530 = vmatpush.bf16.msra.mxu0 %v8555_v12  ;;  %v8576_v33 = vld [vmem:[#allocation4 + $0xc8] sm:$0xff]  ;;  %v8614_v45 = vld [vmem:[#allocation4 + $0x1f8] sm:$0xff]  ;;  %v8589_v50 = vld [vmem:[#allocation4 + $0x130] sm:$0xff] }
 0x168   : > { %2543 = vmatpush.bf16.msra.mxu1 %v8563_v13  ;;  %v10448_v46 = vpack.c.b16 %v1713_v36, %v1713_v36  ;;  %v10450_v47 = vpack.c.b16 %v1711_v37, %v1711_v37  ;;  %v10452_v48 = vpack.c.b16 %v1714_v40, %v1714_v40  ;;  %v10454_v49 = vpack.c.b16 %v1712_v41, %v1712_v41  ;;  %v8597_v51 = vld [vmem:[#allocation4 + $0x170] sm:$0xff]  ;;  %v8588_v54 = vld [vmem:[#allocation4 + $0x128] sm:$0xff]  ;;  %v8587_v58 = vld [vmem:[#allocation4 + $0x120] sm:$0xff] }
 0x169   : > { %2556 = vmatpush.bf16.msra.mxu2 %v8571_v14  ;;  %v8605_v52 = vld [vmem:[#allocation4 + $0x1b0] sm:$0xff]  ;;  %v8596_v55 = vld [vmem:[#allocation4 + $0x168] sm:$0xff]  ;;  %v8595_v59 = vld [vmem:[#allocation4 + $0x160] sm:$0xff] }
 0x16a   : > { %2569 = vmatpush.bf16.msra.mxu3 %v8579_v15  ;;  %v8613_v53 = vld [vmem:[#allocation4 + $0x1f0] sm:$0xff]  ;;  %v8604_v56 = vld [vmem:[#allocation4 + $0x1a8] sm:$0xff]  ;;  %v8603_v60 = vld [vmem:[#allocation4 + $0x1a0] sm:$0xff] }
 0x16b   : > { %2531 = vmatpush.bf16.msra.mxu0 %v8554_v16  ;;  %v8612_v57 = vld [vmem:[#allocation4 + $0x1e8] sm:$0xff]  ;;  %v8611_v61 = vld [vmem:[#allocation4 + $0x1e0] sm:$0xff]  ;;  %v8586_v62 = vld [vmem:[#allocation4 + $0x118] sm:$0xff] }
 0x16c   : > { %2544 = vmatpush.bf16.msra.mxu1 %v8562_v17  ;;  %v8594_v63 = vld [vmem:[#allocation4 + $0x158] sm:$0xff]  ;;  %v8585_v2 = vld [vmem:[#allocation4 + $0x110] sm:$0xff]  ;;  %v1423_v8 = vld [vmem:[%s10406_s22 + $0x20] sm:$0xff] }
 0x16d   : > { %2557 = vmatpush.bf16.msra.mxu2 %v8570_v18  ;;  %v8602_v0 = vld [vmem:[#allocation4 + $0x198] sm:$0xff]  ;;  %v8593_v3 = vld [vmem:[#allocation4 + $0x150] sm:$0xff]  ;;  %v1424_v9 = vld [vmem:[%s10406_s22 + $0x28] sm:$0xff] }
 0x16e   : > { %2570 = vmatpush.bf16.msra.mxu3 %v8578_v19  ;;  %v8610_v1 = vld [vmem:[#allocation4 + $0x1d8] sm:$0xff]  ;;  %v8601_v4 = vld [vmem:[#allocation4 + $0x190] sm:$0xff]  ;;  %v8584_v10 = vld [vmem:[#allocation4 + $0x108] sm:$0xff]  ;;  %v1437_v13 = vpack.c.bf16 %v1424_v9, %v1423_v8 }
 0x16f   : > { %2532 = vmatpush.bf16.msra.mxu0 %v8553_v20  ;;  %v8609_v5 = vld [vmem:[#allocation4 + $0x1d0] sm:$0xff]  ;;  %v1426_v7 = vld [vmem:[%s10406_s22 + $0x38] sm:$0xff]  ;;  %v8592_v11 = vld [vmem:[#allocation4 + $0x148] sm:$0xff] }
 0x170   : > { %2545 = vmatpush.bf16.msra.mxu1 %v8561_v21  ;;  %v1425_v6 = vld [vmem:[%s10406_s22 + $0x30] sm:$0xff]  ;;  %v8600_v14 = vld [vmem:[#allocation4 + $0x188] sm:$0xff]  ;;  %v8583_v16 = vld [vmem:[#allocation4 + $0x100] sm:$0xff]  ;;  %v1715_v19 = vunpack.c.l.b16 %v1437_v13 }
 0x171   : > { %2558 = vmatpush.bf16.msra.mxu2 %v8569_v22  ;;  %v1438_v12 = vpack.c.bf16 %v1426_v7, %v1425_v6  ;;  %v8608_v15 = vld [vmem:[#allocation4 + $0x1c8] sm:$0xff]  ;;  %v8591_v17 = vld [vmem:[#allocation4 + $0x140] sm:$0xff]  ;;  %v8622_v24 = vld [vmem:[#allocation4 + $0x238] sm:$0xff] }
 0x172   : > { %2571 = vmatpush.bf16.msra.mxu3 %v8577_v23  ;;  %v8599_v20 = vld [vmem:[#allocation4 + $0x180] sm:$0xff]  ;;  %v1716_v23 = vunpack.c.h.b16 %v1437_v13  ;;  %v8630_v25 = vld [vmem:[#allocation4 + $0x278] sm:$0xff]  ;;  %v8620_v36 = vld [vmem:[#allocation4 + $0x228] sm:$0xff] }
 0x173   : > { %2533 = vmatpush.bf16.msra.mxu0 %v8552_v28  ;;  %v1717_v18 = vunpack.c.l.b16 %v1438_v12  ;;  %v8607_v21 = vld [vmem:[#allocation4 + $0x1c0] sm:$0xff]  ;;  %v1718_v22 = vunpack.c.h.b16 %v1438_v12  ;;  %v8638_v26 = vld [vmem:[#allocation4 + $0x2b8] sm:$0xff]  ;;  %v8628_v37 = vld [vmem:[#allocation4 + $0x268] sm:$0xff] }
 0x174   : > { %2546 = vmatpush.bf16.msra.mxu1 %v8560_v29  ;;  %v8646_v27 = vld [vmem:[#allocation4 + $0x2f8] sm:$0xff]  ;;  %v10466_v29 = vpack.c.b16 %v1715_v19, %v1715_v19  ;;  %v10470_v31 = vpack.c.b16 %v1716_v23, %v1716_v23  ;;  %v8619_v40 = vld [vmem:[#allocation4 + $0x220] sm:$0xff]  ;;  %v8661_v19 = vld [vmem:[#allocation4 + $0x370] sm:$0xff] }
 0x175   : > { %2559 = vmatpush.bf16.msra.mxu2 %v8568_v32  ;;  %v10464_v28 = vpack.c.b16 %v1717_v18, %v1717_v18  ;;  %v10468_v30 = vpack.c.b16 %v1718_v22, %v1718_v22  ;;  %v8621_v32 = vld [vmem:[#allocation4 + $0x230] sm:$0xff]  ;;  %v8627_v41 = vld [vmem:[#allocation4 + $0x260] sm:$0xff]  ;;  %v8670_v12 = vld [vmem:[#allocation4 + $0x3b8] sm:$0xff] }
 0x176   : > { %2572 = vmatpush.bf16.msra.mxu3 %v8576_v33  ;;  %v8629_v33 = vld [vmem:[#allocation4 + $0x270] sm:$0xff]  ;;  %v8631_v6 = vld [vmem:[#allocation4 + $0x280] sm:$0xff]  ;;  %v8678_v13 = vld [vmem:[#allocation4 + $0x3f8] sm:$0xff] }
 0x177   : > { %2534 = vmatpush.bf16.msra.mxu0 %v8551_v34  ;;  %v8637_v34 = vld [vmem:[#allocation4 + $0x2b0] sm:$0xff]  ;;  %v8639_v7 = vld [vmem:[#allocation4 + $0x2c0] sm:$0xff]  ;;  %v8652_v22 = vld [vmem:[#allocation4 + $0x328] sm:$0xff] }
 0x178   : > { %2547 = vmatpush.bf16.msra.mxu1 %v8559_v35  ;;  %v8645_v35 = vld [vmem:[#allocation4 + $0x2f0] sm:$0xff]  ;;  %v8660_v23 = vld [vmem:[#allocation4 + $0x368] sm:$0xff] }
 0x179   : > { %2560 = vmatpush.bf16.msra.mxu2 %v8567_v38  ;;  %v8636_v38 = vld [vmem:[#allocation4 + $0x2a8] sm:$0xff]  ;;  %v8653_v18 = vld [vmem:[#allocation4 + $0x330] sm:$0xff] }
 0x17a   : > { %2573 = vmatpush.bf16.msra.mxu3 %v8575_v39  ;;  %2535 = vmatmul.bf16.vlgmr.msra.gmra.mxu0 %v10450_v47  ;;  %v8644_v39 = vld [vmem:[#allocation4 + $0x2e8] sm:$0xff] }
 0x17b   : > { %2579 = vmatpush.bf16.msrb.mxu0 %v8590_v42  ;;  %2548 = vmatmul.bf16.vlgmr.msra.gmra.mxu1 %v10454_v49  ;;  %v8635_v42 = vld [vmem:[#allocation4 + $0x2a0] sm:$0xff] }
 0x17c   : > { %2592 = vmatpush.bf16.msrb.mxu1 %v8598_v43  ;;  %2561 = vmatmul.bf16.vlgmr.msra.gmra.mxu2 %v10448_v46  ;;  %v8643_v43 = vld [vmem:[#allocation4 + $0x2e0] sm:$0xff] }
 0x17d   : > { %2605 = vmatpush.bf16.msrb.mxu2 %v8606_v44  ;;  %2574 = vmatmul.bf16.vlgmr.msra.gmra.mxu3 %v10452_v48  ;;  %v8618_v44 = vld [vmem:[#allocation4 + $0x218] sm:$0xff] }
 0x17e   : > { %2618 = vmatpush.bf16.msrb.mxu3 %v8614_v45  ;;  %v8626_v45 = vld [vmem:[#allocation4 + $0x258] sm:$0xff] }
 0x17f   : > { %2580 = vmatpush.bf16.msrb.mxu0 %v8589_v50  ;;  %v8634_v50 = vld [vmem:[#allocation4 + $0x298] sm:$0xff] }
 0x180   : > { %2593 = vmatpush.bf16.msrb.mxu1 %v8597_v51  ;;  %v8642_v51 = vld [vmem:[#allocation4 + $0x2d8] sm:$0xff] }
 0x181   : > { %2606 = vmatpush.bf16.msrb.mxu2 %v8605_v52  ;;  %v8617_v52 = vld [vmem:[#allocation4 + $0x210] sm:$0xff] }
 0x182   : > { %2619 = vmatpush.bf16.msrb.mxu3 %v8613_v53  ;;  %v8625_v53 = vld [vmem:[#allocation4 + $0x250] sm:$0xff] }
 0x183   : > { %2581 = vmatpush.bf16.msrb.mxu0 %v8588_v54  ;;  %v8633_v54 = vld [vmem:[#allocation4 + $0x290] sm:$0xff] }
 0x184   : > { %2594 = vmatpush.bf16.msrb.mxu1 %v8596_v55  ;;  %v8641_v55 = vld [vmem:[#allocation4 + $0x2d0] sm:$0xff] }
 0x185   : > { %2607 = vmatpush.bf16.msrb.mxu2 %v8604_v56  ;;  %v1427_v56 = vld [vmem:[%s10406_s22 + $0x40] sm:$0xff] }
 0x186   : > { %2620 = vmatpush.bf16.msrb.mxu3 %v8612_v57  ;;  %v1428_v57 = vld [vmem:[%s10406_s22 + $0x48] sm:$0xff] }
 0x187   : > { %2582 = vmatpush.bf16.msrb.mxu0 %v8587_v58  ;;  %v1429_v58 = vld [vmem:[%s10406_s22 + $0x50] sm:$0xff] }
 0x188   : > { %2595 = vmatpush.bf16.msrb.mxu1 %v8595_v59  ;;  %v1430_v59 = vld [vmem:[%s10406_s22 + $0x58] sm:$0xff] }
 0x189   : > { %2608 = vmatpush.bf16.msrb.mxu2 %v8603_v60  ;;  %v8616_v60 = vld [vmem:[#allocation4 + $0x208] sm:$0xff] }
 0x18a   : > { %2621 = vmatpush.bf16.msrb.mxu3 %v8611_v61  ;;  %v8624_v61 = vld [vmem:[#allocation4 + $0x248] sm:$0xff] }
 0x18b   : > { %2583 = vmatpush.bf16.msrb.mxu0 %v8586_v62  ;;  %v1439_v62 = vpack.c.bf16 %v1428_v57, %v1427_v56 }
 0x18c   : > { %2596 = vmatpush.bf16.msrb.mxu1 %v8594_v63  ;;  %v1440_v63 = vpack.c.bf16 %v1430_v59, %v1429_v58  ;;  %v8647_v58 = vld [vmem:[#allocation4 + $0x300] sm:$0xff] }
 0x18d   : > { %2609 = vmatpush.bf16.msrb.mxu2 %v8602_v0  ;;  %v8632_v0 = vld [vmem:[#allocation4 + $0x288] sm:$0xff]  ;;  %v1720_v8 = vunpack.c.h.b16 %v1439_v62  ;;  %v8655_v59 = vld [vmem:[#allocation4 + $0x340] sm:$0xff] }
 0x18e   : > { %2622 = vmatpush.bf16.msrb.mxu3 %v8610_v1  ;;  %v8640_v1 = vld [vmem:[#allocation4 + $0x2c8] sm:$0xff]  ;;  %v1722_v9 = vunpack.c.h.b16 %v1440_v63 }
 0x18f   : > { %2584 = vmatpush.bf16.msrb.mxu0 %v8585_v2  ;;  %v8615_v2 = vld [vmem:[#allocation4 + $0x200] sm:$0xff] }
 0x190   : > { %2597 = vmatpush.bf16.msrb.mxu1 %v8593_v3  ;;  %v8623_v3 = vld [vmem:[#allocation4 + $0x240] sm:$0xff] }
 0x191   : > { %2610 = vmatpush.bf16.msrb.mxu2 %v8601_v4  ;;  %v1719_v4 = vunpack.c.l.b16 %v1439_v62  ;;  %v8663_v62 = vld [vmem:[#allocation4 + $0x380] sm:$0xff] }
 0x192   : > { %2623 = vmatpush.bf16.msrb.mxu3 %v8609_v5  ;;  %v1721_v5 = vunpack.c.l.b16 %v1440_v63  ;;  %v8671_v63 = vld [vmem:[#allocation4 + $0x3c0] sm:$0xff] }
 0x193   : > { %2585 = vmatpush.bf16.msrb.mxu0 %v8584_v10  ;;  %v8654_v10 = vld [vmem:[#allocation4 + $0x338] sm:$0xff] }
 0x194   : > { %2598 = vmatpush.bf16.msrb.mxu1 %v8592_v11  ;;  %v8662_v11 = vld [vmem:[#allocation4 + $0x378] sm:$0xff] }
 0x195   : > { %2611 = vmatpush.bf16.msrb.mxu2 %v8600_v14  ;;  %v10480_v14 = vpack.c.b16 %v1719_v4, %v1719_v4  ;;  %v9201_v4 = vld [vmem:[%s11431_s9] ss:$0 sm:$0xff]  ;;  %s11292_s9 = smov 16  }
 0x196   : > { %2624 = vmatpush.bf16.msrb.mxu3 %v8608_v15  ;;  %v10482_v15 = vpack.c.b16 %v1721_v5, %v1721_v5 }
 0x197   : > { %2586 = vmatpush.bf16.msrb.mxu0 %v8583_v16  ;;  %v10484_v16 = vpack.c.b16 %v1720_v8, %v1720_v8 }
 0x198   : > { %2599 = vmatpush.bf16.msrb.mxu1 %v8591_v17  ;;  %v10486_v17 = vpack.c.b16 %v1722_v9, %v1722_v9 }
 0x199   : > { %2612 = vmatpush.bf16.msrb.mxu2 %v8599_v20  ;;  %v8669_v20 = vld [vmem:[#allocation4 + $0x3b0] sm:$0xff] }
 0x19a   : > { %2625 = vmatpush.bf16.msrb.mxu3 %v8607_v21  ;;  %2587 = vmatmul.bf16.vlgmr.msrb.gmra.mxu0 %v10466_v29  ;;  %v8677_v21 = vld [vmem:[#allocation4 + $0x3f0] sm:$0xff] }
 0x19b   : > { %2631 = vmatpush.bf16.msra.mxu0 %v8622_v24  ;;  %2600 = vmatmul.bf16.vlgmr.msrb.gmra.mxu1 %v10470_v31  ;;  %v8668_v24 = vld [vmem:[#allocation4 + $0x3a8] sm:$0xff] }
 0x19c   : > { %2644 = vmatpush.bf16.msra.mxu1 %v8630_v25  ;;  %2613 = vmatmul.bf16.vlgmr.msrb.gmra.mxu2 %v10464_v28  ;;  %v8676_v25 = vld [vmem:[#allocation4 + $0x3e8] sm:$0xff] }
 0x19d   : > { %2657 = vmatpush.bf16.msra.mxu2 %v8638_v26  ;;  %2626 = vmatmul.bf16.vlgmr.msrb.gmra.mxu3 %v10468_v30  ;;  %v8651_v26 = vld [vmem:[#allocation4 + $0x320] sm:$0xff] }
 0x19e   : > { %2670 = vmatpush.bf16.msra.mxu3 %v8646_v27  ;;  %v8659_v27 = vld [vmem:[#allocation4 + $0x360] sm:$0xff] }
 0x19f   : > { %2632 = vmatpush.bf16.msra.mxu0 %v8621_v32  ;;  %v8667_v32 = vld [vmem:[#allocation4 + $0x3a0] sm:$0xff] }
 0x1a0   : > { %2645 = vmatpush.bf16.msra.mxu1 %v8629_v33  ;;  %v8675_v33 = vld [vmem:[#allocation4 + $0x3e0] sm:$0xff] }
 0x1a1   : > { %2658 = vmatpush.bf16.msra.mxu2 %v8637_v34  ;;  %v8650_v34 = vld [vmem:[#allocation4 + $0x318] sm:$0xff] }
 0x1a2   : > { %2671 = vmatpush.bf16.msra.mxu3 %v8645_v35  ;;  %v8658_v35 = vld [vmem:[#allocation4 + $0x358] sm:$0xff] }
 0x1a3   : > { %2633 = vmatpush.bf16.msra.mxu0 %v8620_v36  ;;  %v8666_v36 = vld [vmem:[#allocation4 + $0x398] sm:$0xff] }
 0x1a4   : > { %2646 = vmatpush.bf16.msra.mxu1 %v8628_v37  ;;  %v8674_v37 = vld [vmem:[#allocation4 + $0x3d8] sm:$0xff] }
 0x1a5   : > { %2659 = vmatpush.bf16.msra.mxu2 %v8636_v38  ;;  %v8649_v38 = vld [vmem:[#allocation4 + $0x310] sm:$0xff] }
 0x1a6   : > { %2672 = vmatpush.bf16.msra.mxu3 %v8644_v39  ;;  %v8657_v39 = vld [vmem:[#allocation4 + $0x350] sm:$0xff] }
 0x1a7   : > { %2634 = vmatpush.bf16.msra.mxu0 %v8619_v40  ;;  %v8665_v40 = vld [vmem:[#allocation4 + $0x390] sm:$0xff] }
 0x1a8   : > { %2647 = vmatpush.bf16.msra.mxu1 %v8627_v41  ;;  %v1431_v41 = vld [vmem:[%s10406_s22 + $0x60] sm:$0xff] }
 0x1a9   : > { %2660 = vmatpush.bf16.msra.mxu2 %v8635_v42  ;;  %v1432_v42 = vld [vmem:[%s10406_s22 + $0x68] sm:$0xff] }
 0x1aa   : > { %2673 = vmatpush.bf16.msra.mxu3 %v8643_v43  ;;  %v8673_v43 = vld [vmem:[#allocation4 + $0x3d0] sm:$0xff] }
 0x1ab   : > { %2635 = vmatpush.bf16.msra.mxu0 %v8618_v44  ;;  %v1433_v44 = vld [vmem:[%s10406_s22 + $0x70] sm:$0xff] }
 0x1ac   : > { %2648 = vmatpush.bf16.msra.mxu1 %v8626_v45  ;;  %v1434_v45 = vld [vmem:[%s10406_s22 + $0x78] sm:$0xff]  ;;  %s11294_s22 = smov 8  }
 0x1ad   : > { %2661 = vmatpush.bf16.msra.mxu2 %v8634_v50  ;;  %v1441_v50 = vpack.c.bf16 %v1432_v42, %v1431_v41 }
 0x1ae   : > { %2674 = vmatpush.bf16.msra.mxu3 %v8642_v51  ;;  %v8648_v51 = vld [vmem:[#allocation4 + $0x308] sm:$0xff] }
 0x1af   : > { %2636 = vmatpush.bf16.msra.mxu0 %v8617_v52  ;;  %v8656_v52 = vld [vmem:[#allocation4 + $0x348] sm:$0xff]  ;;  %v1723_v56 = vunpack.c.l.b16 %v1441_v50  ;;  %v1724_v57 = vunpack.c.h.b16 %v1441_v50 }
 0x1b0   : > { %2649 = vmatpush.bf16.msra.mxu1 %v8625_v53  ;;  %v1442_v53 = vpack.c.bf16 %v1434_v45, %v1433_v44 }
 0x1b1   : > { %2662 = vmatpush.bf16.msra.mxu2 %v8633_v54  ;;  %v8664_v54 = vld [vmem:[#allocation4 + $0x388] sm:$0xff] }
 0x1b2   : > { %2675 = vmatpush.bf16.msra.mxu3 %v8641_v55  ;;  %v8672_v55 = vld [vmem:[#allocation4 + $0x3c8] sm:$0xff] }
 0x1b3   : > { %2637 = vmatpush.bf16.msra.mxu0 %v8616_v60  ;;  %v1725_v60 = vunpack.c.l.b16 %v1442_v53 }
 0x1b4   : > { %2650 = vmatpush.bf16.msra.mxu1 %v8624_v61  ;;  %v1726_v61 = vunpack.c.h.b16 %v1442_v53 }
 0x1b5   : > { %2663 = vmatpush.bf16.msra.mxu2 %v8632_v0  ;;  %v10496_v0 = vpack.c.b16 %v1723_v56, %v1723_v56 }
 0x1b6   : > { %2676 = vmatpush.bf16.msra.mxu3 %v8640_v1  ;;  %v10498_v1 = vpack.c.b16 %v1724_v57, %v1724_v57 }
 0x1b7   : > { %2638 = vmatpush.bf16.msra.mxu0 %v8615_v2  ;;  %v10500_v2 = vpack.c.b16 %v1725_v60, %v1725_v60 }
 0x1b8   : > { %2651 = vmatpush.bf16.msra.mxu1 %v8623_v3  ;;  %v10502_v3 = vpack.c.b16 %v1726_v61, %v1726_v61 }
 0x1b9   : > { %2664 = vmatpush.bf16.msra.mxu2 %v8631_v6 }
 0x1ba   : > { %2677 = vmatpush.bf16.msra.mxu3 %v8639_v7  ;;  %2639 = vmatmul.bf16.vlgmr.msra.gmra.mxu0 %v10480_v14 }
 0x1bb   : > { %2683 = vmatpush.bf16.msrb.mxu0 %v8654_v10  ;;  %2652 = vmatmul.bf16.vlgmr.msra.gmra.mxu1 %v10484_v16 }
 0x1bc   : > { %2696 = vmatpush.bf16.msrb.mxu1 %v8662_v11  ;;  %2665 = vmatmul.bf16.vlgmr.msra.gmra.mxu2 %v10482_v15 }
 0x1bd   : > { %2709 = vmatpush.bf16.msrb.mxu2 %v8670_v12  ;;  %2678 = vmatmul.bf16.vlgmr.msra.gmra.mxu3 %v10486_v17 }
 0x1be   : > { %2722 = vmatpush.bf16.msrb.mxu3 %v8678_v13 }
 0x1bf   : > { %2684 = vmatpush.bf16.msrb.mxu0 %v8653_v18 }
 0x1c0   : > { %2697 = vmatpush.bf16.msrb.mxu1 %v8661_v19 }
 0x1c1   : > { %2710 = vmatpush.bf16.msrb.mxu2 %v8669_v20 }
 0x1c2   : > { %2723 = vmatpush.bf16.msrb.mxu3 %v8677_v21 }
 0x1c3   : > { %2685 = vmatpush.bf16.msrb.mxu0 %v8652_v22 }
 0x1c4   : > { %2698 = vmatpush.bf16.msrb.mxu1 %v8660_v23 }
 0x1c5   : > { %2711 = vmatpush.bf16.msrb.mxu2 %v8668_v24 }
 0x1c6   : > { %2724 = vmatpush.bf16.msrb.mxu3 %v8676_v25 }
 0x1c7   : > { %2686 = vmatpush.bf16.msrb.mxu0 %v8651_v26 }
 0x1c8   : > { %2699 = vmatpush.bf16.msrb.mxu1 %v8659_v27 }
 0x1c9   : > { %2712 = vmatpush.bf16.msrb.mxu2 %v8667_v32 }
 0x1ca   : > { %2725 = vmatpush.bf16.msrb.mxu3 %v8675_v33 }
 0x1cb   : > { %2687 = vmatpush.bf16.msrb.mxu0 %v8650_v34 }
 0x1cc   : > { %2700 = vmatpush.bf16.msrb.mxu1 %v8658_v35 }
 0x1cd   : > { %2713 = vmatpush.bf16.msrb.mxu2 %v8666_v36 }
 0x1ce   : > { %2726 = vmatpush.bf16.msrb.mxu3 %v8674_v37 }
 0x1cf   : > { %2688 = vmatpush.bf16.msrb.mxu0 %v8649_v38 }
 0x1d0   : > { %2701 = vmatpush.bf16.msrb.mxu1 %v8657_v39 }
 0x1d1   : > { %2714 = vmatpush.bf16.msrb.mxu2 %v8665_v40 }
 0x1d2   : > { %2727 = vmatpush.bf16.msrb.mxu3 %v8673_v43 }
 0x1d3   : > { %2689 = vmatpush.bf16.msrb.mxu0 %v8648_v51 }
 0x1d4   : > { %2702 = vmatpush.bf16.msrb.mxu1 %v8656_v52 }
 0x1d5   : > { %2715 = vmatpush.bf16.msrb.mxu2 %v8664_v54 }
 0x1d6   : > { %2728 = vmatpush.bf16.msrb.mxu3 %v8672_v55 }
 0x1d7   : > { %2690 = vmatpush.bf16.msrb.mxu0 %v8647_v58 }
 0x1d8   : > { %2703 = vmatpush.bf16.msrb.mxu1 %v8655_v59 }
 0x1d9   : > { %2716 = vmatpush.bf16.msrb.mxu2 %v8663_v62  ;;  %v2735_v62 = vld [vmem:[#allocation6] sm:$0xff] }
 0x1da   : > { %2729 = vmatpush.bf16.msrb.mxu3 %v8671_v63  ;;  %2691 = vmatmul.bf16.vlgmr.msrb.gmra.mxu0 %v10496_v0 }
 0x1db   : > { %2704 = vmatmul.bf16.vlgmr.msrb.gmra.mxu1 %v10498_v1 }
 0x1dc   : > { %2717 = vmatmul.bf16.vlgmr.msrb.gmra.mxu2 %v10500_v2 }
 0x1dd   : > { %2730 = vmatmul.bf16.vlgmr.msrb.gmra.mxu3 %v10502_v3 }
 0x1f7   : > { %v2536_v5 = vpop.f32.mrf.mxu0 }
 0x1f8   : > { %v2537_v6 = vadd.f32 %v9201_v4, %v2536_v5  ;;  %v2549_v7 = vpop.f32.mrf.mxu1 }
 0x1fa   : > { %v2550_v8 = vadd.f32 %v2549_v7, %v2537_v6 }
 0x1ff   : > { %v2562_v9 = vpop.f32.mrf.mxu2  ;;  %v2538_v12 = vpop.f32.mrf.mxu0 }
 0x200   : > { %v2563_v10 = vadd.f32 %v2562_v9, %v2550_v8  ;;  %v2575_v11 = vpop.f32.mrf.mxu3  ;;  %v2551_v18 = vpop.f32.mrf.mxu1  ;;  %v9905_v8 = vmov 32.0  }
 0x201   : > { %9222 = vrcp.f32 %v9905_v8 }
 0x202   : > { %v2576_v13 = vadd.f32 %v2575_v11, %v2563_v10 }
 0x207   : > { %v2564_v19 = vpop.f32.mrf.mxu2  ;;  %v9223_v9 = vpop.eup %9222 }
 0x208   : > { %v2577_v20 = vpop.f32.mrf.mxu3  ;;  %v2744_v10 = vmul.f32 32.0, %v9223_v9  ;;  %vm2748_vm1 = vweird.f32 %v9223_v9 }
 0x20a   : > { %v2745_v11 = vsub.f32 1.0, %v2744_v10 }
 0x20c   : > { %v2746_v12 = vmul.f32 %v9223_v9, %v2745_v11 }
 0x217   : > { %v2588_v21 = vpop.f32.mrf.mxu0 }
 0x218   : > { %v2601_v22 = vpop.f32.mrf.mxu1  ;;  %v2589_v35 = vadd.f32 %v2588_v21, %v2576_v13  ;;  %v2747_v13 = vadd.f32 %v9223_v9, %v2746_v12 }
 0x21a   : > { %v2602_v39 = vadd.f32 %v2601_v22, %v2589_v35  ;;  %v10513_v18 = vsel %vm2748_vm1, %v9223_v9, %v2747_v13 }
 0x21f   : > { %v2614_v23 = vpop.f32.mrf.mxu2  ;;  %v2590_v25 = vpop.f32.mrf.mxu0 }
 0x220   : > { %v2627_v24 = vpop.f32.mrf.mxu3  ;;  %v2603_v26 = vpop.f32.mrf.mxu1  ;;  %v2615_v41 = vadd.f32 %v2614_v23, %v2602_v39  ;;  %v8682_v25 = vld [vmem:[#allocation9 + $0x8] sm:$0xff] }
 0x221   : > { %v8684_v26 = vld [vmem:[#allocation10 + $0x8] sm:$0xff]  ;;  %2841 = vmatpush.bf16.msra.mxu1 %v8682_v25 }
 0x222   : > { %v2628_v44 = vadd.f32 %v2627_v24, %v2615_v41  ;;  %v8680_v24 = vld [vmem:[#allocation7 + $0x8] sm:$0xff]  ;;  %2875 = vmatpush.bf16.msra.mxu2 %v8684_v26 }
 0x223   : > { %2807 = vmatpush.bf16.msra.mxu3 %v8680_v24 }
 0x227   : > { %v2616_v27 = vpop.f32.mrf.mxu2 }
 0x228   : > { %v2629_v32 = vpop.f32.mrf.mxu3  ;;  %v8679_v27 = vld [vmem:[#allocation7] sm:$0xff] }
 0x229   : > { %v8681_v32 = vld [vmem:[#allocation9] sm:$0xff]  ;;  %2808 = vmatpush.bf16.msra.mxu3 %v8679_v27 }
 0x22a   : > { %2842 = vmatpush.bf16.msra.mxu1 %v8681_v32 }
 0x237   : > { %v2640_v33 = vpop.f32.mrf.mxu0 }
 0x238   : > { %v2653_v34 = vpop.f32.mrf.mxu1  ;;  %v2641_v45 = vadd.f32 %v2640_v33, %v2628_v44  ;;  %v8683_v33 = vld [vmem:[#allocation10] sm:$0xff] }
 0x239   : > { %2876 = vmatpush.bf16.msra.mxu2 %v8683_v33 }
 0x23a   : > { %v2654_v50 = vadd.f32 %v2653_v34, %v2641_v45 }
 0x23f   : > { %v2666_v36 = vpop.f32.mrf.mxu2  ;;  %v2642_v38 = vpop.f32.mrf.mxu0 }
 0x240   : > { %v2679_v37 = vpop.f32.mrf.mxu3  ;;  %v2655_v40 = vpop.f32.mrf.mxu1  ;;  %v2667_v51 = vadd.f32 %v2666_v36, %v2654_v50  ;;  %v9203_v50 = vld [vmem:[%s11433_s23] ss:$0 sm:$0xff] }
 0x242   : > { %v2680_v52 = vadd.f32 %v2679_v37, %v2667_v51 }
 0x247   : > { %v2668_v42 = vpop.f32.mrf.mxu2 }
 0x248   : > { %v2681_v43 = vpop.f32.mrf.mxu3 }
 0x249   : > { %v9202_v43 = vld [vmem:[%s11432_s0] ss:$0 sm:$0xff] }
 0x257   : > { %v2692_v53 = vpop.f32.mrf.mxu0 }
 0x258   : > { %v2705_v54 = vpop.f32.mrf.mxu1  ;;  %v2693_v55 = vadd.f32 %v2692_v53, %v2680_v52 }
 0x25a   : > { %v2706_v56 = vadd.f32 %v2705_v54, %v2693_v55  ;;  %v9204_v54 = vld [vmem:[%s11434_s7] ss:$0 sm:$0xff]  ;;  %s11293_s7 = smov 24  }
 0x25f   : > { %v2718_v57 = vpop.f32.mrf.mxu2  ;;  %v2694_v60 = vpop.f32.mrf.mxu0 }
 0x260   : > { %v2731_v58 = vpop.f32.mrf.mxu3  ;;  %v2719_v59 = vadd.f32 %v2718_v57, %v2706_v56  ;;  %v2707_v61 = vpop.f32.mrf.mxu1 }
 0x262   : > { %v2732_v63 = vadd.f32 %v2731_v58, %v2719_v59  ;;  %v9205_v58 = vld [vmem:[%s11436_s18] ss:$0 sm:$0xff] }
 0x263   : > { %v9206_v59 = vld [vmem:[%s11437_s15] ss:$0 sm:$0xff]  ;;  %s11439_s15 = sld [smem:[#allocation46_spill]] }
 0x264   : > { %v10509_v4 = vadd.f32 %v2735_v62, %v2732_v63 }
 0x266   : > { %v2740_v5 = vsel %vm2739_vm0, %v10509_v4, 0.0 }
 0x267   : > { %v2720_v6 = vpop.f32.mrf.mxu2  ;;  %2741 = vadd.xlane.f32.xlu0 %v2740_v5 }
 0x268   : > { %v2733_v7 = vpop.f32.mrf.mxu3 }
 0x2da   : > { %v2742_v19 = vpop.xlane.xlu0 %2741 }
 0x2db   : > { %v2750_v20 = vmul.f32 %v10513_v18, %v2742_v19 }
 0x2dd   : > { %v2751_v21 = vsub.f32 %v10509_v4, %v2750_v20 }
 0x2df   : > { %v2752_v22 = vmul.f32 %v2751_v21, %v2751_v21 }
 0x2e1   : > { %v2753_v23 = vsel %vm2739_vm0, %v2752_v22, 0.0 }
 0x2e2   : > { %2754 = vadd.xlane.f32.xlu0 %v2753_v23 }
 0x355   : > { %v2755_v34 = vpop.xlane.xlu0 %2754 }
 0x356   : > { %v2756_v35 = vmul.f32 %v2755_v34, %v10513_v18 }
 0x358   : > { %v2757_v36 = vadd.f32 1e-05, %v2756_v35 }
 0x35a   : > { %9224 = vrsqrt.f32 %v2757_v36  ;;  %vm2764_vm3 = vweird.f32 %v2757_v36 }
 0x360   : > { %v9225_v37 = vpop.eup %9224 }
 0x361   : > { %v2759_v38 = vmul.f32 %v9225_v37, %v2757_v36  ;;  %vm2765_vm2 = vweird.f32 %v9225_v37 }
 0x362   : > { %vm2766_vm4 = vmor %vm2764_vm3, %vm2765_vm2 }
 0x363   : > { %v2760_v39 = vmul.f32 %v9225_v37, %v2759_v38 }
 0x365   : > { %v2761_v40 = vmul.f32 0.5, %v2760_v39 }
 0x367   : > { %v2762_v41 = vsub.f32 1.5, %v2761_v40 }
 0x369   : > { %v2763_v42 = vmul.f32 %v9225_v37, %v2762_v41 }
 0x36b   : > { %v2767_v44 = vsel %vm2766_vm4, %v9225_v37, %v2763_v42  ;;  %vm4005_vm4 = vcmask 1040384  }
 0x36c   : > { %v2768_v45 = vmul.f32 %v2767_v44, %v2751_v21 }
 0x36e   : > { %v2772_v51 = vmul.f32 %v9202_v43, %v2768_v45 }
 0x370   : > { %v2776_v52 = vadd.f32 %v9203_v50, %v2772_v51 }
 0x372   : > { %v2777_v53 = vpack.c.bf16 %v2776_v52, %v2776_v52 }
 0x374   : > { %7418 = vmatmul.msk.bf16.vlgmr.msra.gmra.mxu3 %vm2739_vm0, %v2777_v53  ;;  %7427 = vmatmul.msk.bf16.vlgmr.msra.gmra.mxu1 %vm2739_vm0, %v2777_v53 }
 0x375   : > { %7436 = vmatmul.msk.bf16.vlgmr.msra.gmra.mxu2 %vm2739_vm0, %v2777_v53 }
 0x3f1   : > { %v2844_v55 = vpop.f32.mrf.mxu1 }
 0x3f2   : > { %v2845_v56 = vadd.f32 %v9204_v54, %v2844_v55 }
 0x3f4   : > { %v2848_v57 = vpack.c.bf16 %v2845_v56, %v2845_v56 }
 0x3f6   : > { %v2888_v60 = vsel %vm2883_vm5, %v2848_v57, 0  ;;  %v2941_v61 = vunpack.c.l.b16 %v2848_v57 }
 0x3f7   : > { %v2810_v62 = vpop.f32.mrf.mxu3  ;;  %2897 = vmatpush.bf16.xpose.msrb.mxu3 %v2888_v60 }
 0x3f8   : > { %v2942_v63 = vpack.c.b16 %v2941_v61, %v2941_v61  ;;  %v2811_v5 = vadd.f32 %v9205_v58, %v2810_v62  ;;  %v2878_v6 = vpop.f32.mrf.mxu2 }
 0x3f9   : > { %v2879_v7 = vadd.f32 %v9206_v59, %v2878_v6  ;;  %v2846_v8 = vpop.f32.mrf.mxu1 }
 0x3fa   : > { %v2814_v9 = vpack.c.bf16 %v2811_v5, %v2811_v5  ;;  %3002 = vrot.lane.b32.xlu2 %v2942_v63, %s11295_s16  ;;  %2943 = vrot.lane.b32.xlu1 %v2942_v63, %s11297_s1 }
 0x3fb   : > { %v10530_v10 = vpack.c.bf16 %v2879_v7, %v2879_v7 }
 0x3fc   : > { %v2936_v11 = vunpack.c.l.b16 %v2814_v9 }
 0x3fd   : > { %v2920_v12 = vsel %vm2918_vm6, %v10530_v10, 0 }
 0x3fe   : > { %v2937_v13 = vpack.c.b16 %v2936_v11, %v2936_v11  ;;  %2929 = vmatpush.bf16.msra.mxu0 %v2920_v12  ;;  %7437 = vmatmul.msk.bf16.vlgmr.msrb.gmra.mxu3 %vm2883_vm5, %v2814_v9 }
 0x3ff   : > { %v2812_v19 = vpop.f32.mrf.mxu3 }
 0x400   : > { %v2880_v20 = vpop.f32.mrf.mxu2  ;;  %3000 = vrot.lane.b32.xlu0 %v2937_v13, %s11295_s16 }
 0x402   : > { %3058 = vrot.lane.b32.xlu2 %v2942_v63, %s11290_s13  ;;  %2938 = vrot.lane.b32.xlu1 %v2937_v13, %s11297_s1 }
 0x40a   : > { %3056 = vrot.lane.b32.xlu1 %v2937_v13, %s11290_s13 }
 0x454   : > { %v3003_v21 = vpop.permute.xlu2 %3002 }
 0x455   : > { %v3008_v22 = vsel %vm2883_vm5, %v3003_v21, 0  ;;  %v2977_v21 = vunpack.c.l.b16 %v10530_v10 }
 0x456   : > { %3017 = vmatpush.bf16.xpose.msra.mxu3 %v3008_v22 }
 0x457   : > { %v2978_v22 = vpack.c.b16 %v2977_v21, %v2977_v21 }
 0x45c   : > { %v3059_v23 = vpop.permute.xlu2 %3058 }
 0x45d   : > { %v3064_v26 = vsel %vm2883_vm5, %v3059_v23, 0 }
 0x46c   : > { %v2944_v24 = vpop.permute.xlu1 %2943 }
 0x46d   : > { %v2949_v25 = vsel %vm2883_vm5, %v2944_v24, 0 }
 0x46e   : > { %2958 = vmatpush.bf16.xpose.msrb.mxu1 %v2949_v25 }
 0x472   : > { %v3001_v27 = vpop.permute.xlu0 %3000 }
 0x473   : > { %7441 = vmatmul.msk.bf16.vlgmr.msra.gmra.mxu3 %vm2883_vm5, %v3001_v27 }
 0x474   : > { %v2939_v32 = vpop.permute.xlu1 %2938 }
 0x475   : > { %7439 = vmatmul.msk.bf16.vlgmr.msrb.gmra.mxu1 %vm2883_vm5, %v2939_v32 }
 0x476   : > { %3073 = vmatpush.bf16.xpose.msra.mxu1 %v3064_v26 }
 0x47c   : > { %v3057_v35 = vpop.permute.xlu1 %3056 }
 0x481   : > { %v2899_v33 = vpop.f32.mrf.mxu3 }
 0x482   : > { %v2903_v34 = vsel %vm2883_vm5, %v2899_v33, -inf }
 0x483   : > { %2904 = vmax.xlane.f32.xlu1 %v2903_v34 }
 0x485   : > { %7443 = vmatmul.msk.bf16.vlgmr.msra.gmra.mxu1 %vm2883_vm5, %v3057_v35 }
 0x489   : > { %v2901_v36 = vpop.f32.mrf.mxu3 }
 0x4f2   : > { %v2960_v37 = vpop.f32.mrf.mxu1 }
 0x4f3   : > { %v2964_v38 = vsel %vm2883_vm5, %v2960_v37, -inf }
 0x4f4   : > { %2965 = vmax.xlane.f32.xlu2 %v2964_v38 }
 0x4f6   : > { %v2905_v39 = vpop.xlane.xlu1 %2904  ;;  %v3019_v40 = vpop.f32.mrf.mxu3 }
 0x4f7   : > { %v2906_v41 = vsub.f32 %v2899_v33, %v2905_v39  ;;  %v3023_v44 = vsel %vm2883_vm5, %v3019_v40, -inf }
 0x4f9   : > { %v2907_v42 = vmul.f32 1.442695, %v2906_v41 }
 0x4fa   : > { %v2962_v43 = vpop.f32.mrf.mxu1 }
 0x4fb   : > { %9226 = vpow2.f32 %v2907_v42 }
 0x4fc   : > { %3024 = vmax.xlane.f32.xlu2 %v3023_v44 }
 0x4fe   : > { %v3021_v45 = vpop.f32.mrf.mxu3 }
 0x501   : > { %v9227_v50 = vpop.eup %9226 }
 0x502   : > { %v3075_v51 = vpop.f32.mrf.mxu1  ;;  %v2909_v52 = vsel %vm2883_vm5, %v9227_v50, 0.0 }
 0x503   : > { %2910 = vadd.xlane.f32.xlu1 %v2909_v52  ;;  %v3079_v53 = vsel %vm2883_vm5, %v3075_v51, -inf }
 0x504   : > { %3080 = vmax.xlane.f32.xlu0 %v3079_v53 }
 0x50a   : > { %v3077_v54 = vpop.f32.mrf.mxu1 }
 0x567   : > { %v2966_v55 = vpop.xlane.xlu2 %2965 }
 0x568   : > { %v2967_v56 = vsub.f32 %v2960_v37, %v2966_v55 }
 0x56a   : > { %v2968_v57 = vmul.f32 1.442695, %v2967_v56  ;;  %v8686_v56 = vld [vmem:[#allocation12 + $0x8] sm:$0xff] }
 0x56b   : > { %3155 = vmatpush.bf16.msrb.mxu3 %v8686_v56 }
 0x56c   : > { %9228 = vpow2.f32 %v2968_v57  ;;  %v8685_v57 = vld [vmem:[#allocation12] sm:$0xff] }
 0x56f   : > { %v3025_v58 = vpop.xlane.xlu2 %3024  ;;  %3156 = vmatpush.bf16.msrb.mxu3 %v8685_v57 }
 0x570   : > { %v3026_v59 = vsub.f32 %v3019_v40, %v3025_v58 }
 0x572   : > { %v9229_v60 = vpop.eup %9228  ;;  %v3027_v61 = vmul.f32 1.442695, %v3026_v59 }
 0x573   : > { %v2970_v62 = vsel %vm2883_vm5, %v9229_v60, 0.0 }
 0x574   : > { %9230 = vpow2.f32 %v3027_v61  ;;  %2971 = vadd.xlane.f32.xlu2 %v2970_v62 }
 0x576   : > { %v2911_v63 = vpop.xlane.xlu1 %2910 }
 0x577   : > { %9232 = vrcp.f32 %v2911_v63  ;;  %v3081_v5 = vpop.xlane.xlu0 %3080 }
 0x578   : > { %v3082_v6 = vsub.f32 %v3075_v51, %v3081_v5 }
 0x57a   : > { %v9231_v7 = vpop.eup %9230  ;;  %v3083_v8 = vmul.f32 1.442695, %v3082_v6  ;;  %v9207_v6 = vld [vmem:[%s11439_s15] ss:$0 sm:$0xff] }
 0x57b   : > { %v3029_v9 = vsel %vm2883_vm5, %v9231_v7, 0.0 }
 0x57c   : > { %9234 = vpow2.f32 %v3083_v8  ;;  %3030 = vadd.xlane.f32.xlu0 %v3029_v9 }
 0x57d   : > { %v9233_v11 = vpop.eup %9232 }
 0x57e   : > { %v2913_v12 = vmul.f32 %v9233_v11, %v9227_v50 }
 0x580   : > { %v2914_v13 = vpack.c.bf16 %v2913_v12, %v2913_v12 }
 0x582   : > { %v9235_v19 = vpop.eup %9234  ;;  %7438 = vmatmul.msk.bf16.vlgmr.msra.gmra.mxu0 %vm2883_vm5, %v2914_v13 }
 0x583   : > { %v3085_v20 = vsel %vm2883_vm5, %v9235_v19, 0.0 }
 0x584   : > { %3086 = vadd.xlane.f32.xlu1 %v3085_v20 }
 0x58c   : > { %2979 = vrot.lane.b32.xlu2 %v2978_v22, %s11297_s1 }
 0x590   : > { %3035 = vrot.lane.b32.xlu0 %v2978_v22, %s11295_s16  ;;  %s11445_s16 = sld [smem:[#allocation49_spill]] }
 0x59d   : > { %3091 = vrot.lane.b32.xlu1 %v2978_v22, %s11290_s13  ;;  %s11440_s13 = smov %s11439_s15  ;;  %s11441_s15 = sld [smem:[#allocation47_spill]] }
 0x5e7   : > { %v2972_v23 = vpop.xlane.xlu2 %2971 }
 0x5e8   : > { %9236 = vrcp.f32 %v2972_v23  ;;  %v8688_v23 = vld [vmem:[#allocation13 + $0x8] sm:$0xff] }
 0x5ee   : > { %v9237_v24 = vpop.eup %9236 }
 0x5ef   : > { %v2974_v25 = vmul.f32 %v9237_v24, %v9229_v60  ;;  %v2980_v26 = vpop.permute.xlu2 %2979  ;;  %v3031_v33 = vpop.xlane.xlu0 %3030  ;;  %v8687_v24 = vld [vmem:[#allocation13] sm:$0xff] }
 0x5f0   : > { %v2985_v27 = vsel %vm2918_vm6, %v2980_v26, 0  ;;  %9238 = vrcp.f32 %v3031_v33 }
 0x5f1   : > { %v2975_v32 = vpack.c.bf16 %v2974_v25, %v2974_v25  ;;  %2994 = vmatpush.bf16.msrb.mxu2 %v2985_v27 }
 0x5f4   : > { %7440 = vmatmul.msk.bf16.vlgmr.msrb.gmra.mxu2 %vm2883_vm5, %v2975_v32 }
 0x5f6   : > { %v9239_v10 = vpop.eup %9238 }
 0x5f7   : > { %v3033_v35 = vmul.f32 %v9239_v10, %v9231_v7  ;;  %v3087_v36 = vpop.xlane.xlu1 %3086 }
 0x5f8   : > { %9240 = vrcp.f32 %v3087_v36 }
 0x5f9   : > { %v3034_v39 = vpack.c.bf16 %v3033_v35, %v3033_v35 }
 0x5fe   : > { %v9241_v41 = vpop.eup %9240 }
 0x5ff   : > { %v2931_v34 = vpop.f32.mrf.mxu0  ;;  %v3089_v42 = vmul.f32 %v9241_v41, %v9235_v19 }
 0x601   : > { %v3090_v45 = vpack.c.bf16 %v3089_v42, %v3089_v42 }
 0x602   : > { %v3036_v37 = vpop.permute.xlu0 %3035 }
 0x603   : > { %v3041_v38 = vsel %vm2918_vm6, %v3036_v37, 0  ;;  %v9208_v37 = vld [vmem:[%s11441_s15] ss:$0 sm:$0xff] }
 0x604   : > { %3050 = vmatpush.bf16.msrb.mxu0 %v3041_v38 }
 0x607   : > { %v2933_v40 = vpop.f32.mrf.mxu0  ;;  %7442 = vmatmul.msk.bf16.vlgmr.msrb.gmra.mxu0 %vm2883_vm5, %v3034_v39 }
 0x608   : > { %3230 = vmatpush.bf16.msra.mxu0 %v8688_v23 }
 0x60c   : > { %3231 = vmatpush.bf16.msra.mxu0 %v8687_v24 }
 0x60f   : > { %v3092_v43 = vpop.permute.xlu1 %3091 }
 0x610   : > { %v3097_v44 = vsel %vm2918_vm6, %v3092_v43, 0 }
 0x611   : > { %3106 = vmatpush.bf16.msra.mxu2 %v3097_v44  ;;  %v8695_v44 = vld [vmem:[#allocation15 + $0x30] sm:$0xff] }
 0x614   : > { %7444 = vmatmul.msk.bf16.vlgmr.msra.gmra.mxu2 %vm2883_vm5, %v3090_v45  ;;  %v8694_v45 = vld [vmem:[#allocation15 + $0x28] sm:$0xff] }
 0x677   : > { %v2996_v50 = vpop.f32.mrf.mxu2 }
 0x678   : > { %3113 = vrot.lane.b32.xlu2 %v2996_v50, %s11294_s22  ;;  %v8693_v50 = vld [vmem:[#allocation15 + $0x20] sm:$0xff] }
 0x67f   : > { %v2998_v51 = vpop.f32.mrf.mxu2 }
 0x680   : > { %v8692_v51 = vld [vmem:[#allocation15 + $0x18] sm:$0xff] }
 0x684   : > { %v3052_v52 = vpop.f32.mrf.mxu0 }
 0x685   : > { %3117 = vrot.lane.b32.xlu2 %v3052_v52, %s11292_s9  ;;  %s11442_s9 = smov %s11441_s15  ;;  %v8691_v52 = vld [vmem:[#allocation15 + $0x10] sm:$0xff]  ;;  %s11448_s15 = smov 120  }
 0x68c   : > { %v3054_v53 = vpop.f32.mrf.mxu0 }
 0x68d   : > { %v8690_v53 = vld [vmem:[#allocation15 + $0x8] sm:$0xff] }
 0x697   : > { %v3108_v54 = vpop.f32.mrf.mxu2 }
 0x698   : > { %3121 = vrot.lane.b32.xlu0 %v3108_v54, %s11293_s7  ;;  %s11443_s7 = sld [smem:[#allocation48_spill]]  ;;  %v8689_v54 = vld [vmem:[#allocation15] sm:$0xff] }
 0x69e   : > { %s11444_s22 = smov %s11443_s7  ;;  %v9209_v40 = vld [vmem:[%s11443_s7] ss:$0 sm:$0xff]  ;;  %s11446_s7 = sld [smem:[#allocation50_spill]] }
 0x69f   : > { %v3110_v55 = vpop.f32.mrf.mxu2 }
 0x6a0   : > { %v9210_v55 = vld [vmem:[%s11445_s16] ss:$0 sm:$0xff] }
 0x6a4   : > { %s11447_s1 = smov %s11446_s7 }
 0x6d2   : > { %v3114_v58 = vpop.permute.xlu2 %3113 }
 0x6d3   : > { %v3124_v60 = vsel %vm2883_vm5, %v2931_v34, %v3114_v58 }
 0x6df   : > { %v3118_v59 = vpop.permute.xlu2 %3117 }
 0x6e0   : > { %v3126_v61 = vsel %vm3125_vm7, %v3124_v60, %v3118_v59 }
 0x70a   : > { %v3122_v62 = vpop.permute.xlu0 %3121 }
 0x70b   : > { %v3128_v63 = vsel %vm3127_vm8, %v3126_v61, %v3122_v62 }
 0x70c   : > { %v3129_v5 = vpack.c.bf16 %v3128_v63, %v3128_v63 }
 0x70e   : > { %7453 = vmatmul.msk.bf16.vlgmr.msrb.gmra.mxu3 %vm2739_vm0, %v3129_v5 }
 0x791   : > { %v3158_v7 = vpop.f32.mrf.mxu3 }
 0x792   : > { %v3162_v8 = vadd.f32 %v3158_v7, %v10509_v4  ;;  %v8696_v4 = vld [vmem:[#allocation15 + $0x38] sm:$0xff] }
 0x793   : > { %3311 = vmatpush.bf16.msrb.mxu1 %v8696_v4 }
 0x794   : > { %v10573_v9 = vadd.f32 %v9207_v6, %v3162_v8 }
 0x796   : > { %v3170_v11 = vsel %vm2739_vm0, %v10573_v9, 0.0 }
 0x797   : > { %3171 = vadd.xlane.f32.xlu1 %v3170_v11  ;;  %3312 = vmatpush.bf16.msrb.mxu1 %v8695_v44  ;;  %v9212_v44 = vld [vmem:[%s11432_s0 + $0x1] ss:$0 sm:$0xff]  ;;  %s11450_s0 = smov 104  }
 0x799   : > { %v3160_v12 = vpop.f32.mrf.mxu3 }
 0x79a   : > { %v9211_v12 = vld [vmem:[%s11446_s7] ss:$0 sm:$0xff]  ;;  %s11449_s7 = smov 112  }
 0x79b   : > { %3313 = vmatpush.bf16.msrb.mxu1 %v8694_v45 }
 0x79f   : > { %3314 = vmatpush.bf16.msrb.mxu1 %v8693_v50 }
 0x7a3   : > { %3315 = vmatpush.bf16.msrb.mxu1 %v8692_v51  ;;  %v9213_v51 = vld [vmem:[%s11433_s23 + $0x1] ss:$0 sm:$0xff] }
 0x7a7   : > { %3316 = vmatpush.bf16.msrb.mxu1 %v8691_v52 }
 0x7ab   : > { %3317 = vmatpush.bf16.msrb.mxu1 %v8690_v53 }
 0x7af   : > { %3318 = vmatpush.bf16.msrb.mxu1 %v8689_v54 }
 0x80a   : > { %v3172_v13 = vpop.xlane.xlu1 %3171 }
 0x80b   : > { %v3173_v19 = vmul.f32 %v3172_v13, %v10513_v18 }
 0x80d   : > { %v3174_v20 = vsub.f32 %v10573_v9, %v3173_v19 }
 0x80f   : > { %v3175_v21 = vmul.f32 %v3174_v20, %v3174_v20 }
 0x811   : > { %v3176_v22 = vsel %vm2739_vm0, %v3175_v21, 0.0 }
 0x812   : > { %3177 = vadd.xlane.f32.xlu2 %v3176_v22 }
 0x885   : > { %v3178_v25 = vpop.xlane.xlu2 %3177 }
 0x886   : > { %v3179_v26 = vmul.f32 %v3178_v25, %v10513_v18 }
 0x888   : > { %v3180_v27 = vadd.f32 1e-05, %v3179_v26 }
 0x88a   : > { %9242 = vrsqrt.f32 %v3180_v27  ;;  %vm3187_vm10 = vweird.f32 %v3180_v27 }
 0x890   : > { %v9243_v32 = vpop.eup %9242 }
 0x891   : > { %v3182_v33 = vmul.f32 %v9243_v32, %v3180_v27  ;;  %vm3188_vm9 = vweird.f32 %v9243_v32  ;;  %v8698_v27 = vld [vmem:[#allocation7 + $0x18] sm:$0xff] }
 0x892   : > { %vm3189_vm11 = vmor %vm3187_vm10, %vm3188_vm9  ;;  %3396 = vmatpush.bf16.msrb.mxu2 %v8698_v27  ;;  %vm5641_vm9 = vcmask 236544  }
 0x893   : > { %v3183_v10 = vmul.f32 %v9243_v32, %v3182_v33  ;;  %v8702_v33 = vld [vmem:[#allocation10 + $0x18] sm:$0xff] }
 0x894   : > { %3468 = vmatpush.bf16.msrb.mxu0 %v8702_v33 }
 0x895   : > { %v3184_v34 = vmul.f32 0.5, %v3183_v10  ;;  %v8699_v10 = vld [vmem:[#allocation9 + $0x10] sm:$0xff] }
 0x897   : > { %v3185_v35 = vsub.f32 1.5, %v3184_v34  ;;  %v8701_v34 = vld [vmem:[#allocation10 + $0x10] sm:$0xff] }
 0x898   : > { %3469 = vmatpush.bf16.msrb.mxu0 %v8701_v34 }
 0x899   : > { %v3186_v36 = vmul.f32 %v9243_v32, %v3185_v35 }
 0x89b   : > { %v3190_v38 = vsel %vm3189_vm11, %v9243_v32, %v3186_v36  ;;  %v8700_v32 = vld [vmem:[#allocation9 + $0x18] sm:$0xff] }
 0x89c   : > { %v3191_v39 = vmul.f32 %v3190_v38, %v3174_v20  ;;  %3432 = vmatpush.bf16.msra.mxu3 %v8700_v32 }
 0x89e   : > { %v3195_v41 = vmul.f32 %v9208_v37, %v3191_v39 }
 0x8a0   : > { %v3199_v42 = vadd.f32 %v9209_v40, %v3195_v41  ;;  %3433 = vmatpush.bf16.msra.mxu3 %v8699_v10 }
 0x8a2   : > { %v3200_v43 = vpack.c.bf16 %v3199_v42, %v3199_v42 }
 0x8a4   : > { %7462 = vmatmul.msk.bf16.vlgmr.msra.gmra.mxu0 %vm2739_vm0, %v3200_v43 }
 0x921   : > { %v3233_v56 = vpop.f32.mrf.mxu0 }
 0x922   : > { %v3234_v57 = vadd.f32 %v9210_v55, %v3233_v56  ;;  %v9214_v55 = vld [vmem:[%s11438_s20 + $0x1] ss:$0 sm:$0xff] }
 0x924   : > { %v3237_v58 = vmul.f32 %v3234_v57, %v3234_v57 }
 0x926   : > { %v3238_v59 = vmul.f32 %v3237_v58, %v3234_v57  ;;  %v9215_v58 = vld [vmem:[%s11436_s18 + $0x1] ss:$0 sm:$0xff] }
 0x928   : > { %v3239_v60 = vmul.f32 0.044715, %v3238_v59  ;;  %v9216_v59 = vld [vmem:[%s11435_s25 + $0x1] ss:$0 sm:$0xff] }
 0x929   : > { %v3235_v61 = vpop.f32.mrf.mxu0 }
 0x92a   : > { %v3240_v62 = vadd.f32 %v3239_v60, %v3234_v57 }
 0x92c   : > { %v3241_v63 = vmul.f32 0.7978846, %v3240_v62 }
 0x92e   : > { %9244 = vtanh.f32 %v3241_v63 }
 0x934   : > { %v9245_v5 = vpop.eup %9244 }
 0x935   : > { %v3243_v6 = vadd.f32 1.0, %v9245_v5 }
 0x937   : > { %v3244_v7 = vmul.f32 0.5, %v3243_v6 }
 0x939   : > { %v3245_v8 = vmul.f32 %v3244_v7, %v3234_v57 }
 0x93b   : > { %v3246_v11 = vpack.c.bf16 %v3245_v8, %v3245_v8 }
 0x93d   : > { %3319 = vmatmul.bf16.vlgmr.msrb.gmra.mxu1 %v3246_v11 }
 0x9ba   : > { %v3320_v13 = vpop.f32.mrf.mxu1 }
 0x9bb   : > { %v3324_v19 = vadd.f32 %v3320_v13, %v10573_v9  ;;  %v8697_v9 = vld [vmem:[#allocation7 + $0x10] sm:$0xff] }
 0x9bc   : > { %3397 = vmatpush.bf16.msrb.mxu2 %v8697_v9 }
 0x9bd   : > { %v10587_v20 = vadd.f32 %v9211_v12, %v3324_v19 }
 0x9bf   : > { %v3334_v21 = vsel %vm2739_vm0, %v10587_v20, 0.0 }
 0x9c0   : > { %3335 = vadd.xlane.f32.xlu0 %v3334_v21 }
 0x9c2   : > { %v3322_v22 = vpop.f32.mrf.mxu1 }
 0xa33   : > { %v3336_v23 = vpop.xlane.xlu0 %3335 }
 0xa34   : > { %v3337_v24 = vmul.f32 %v3336_v23, %v10513_v18 }
 0xa36   : > { %v3338_v4 = vsub.f32 %v10587_v20, %v3337_v24 }
 0xa38   : > { %v3339_v25 = vmul.f32 %v3338_v4, %v3338_v4 }
 0xa3a   : > { %v3340_v26 = vsel %vm2739_vm0, %v3339_v25, 0.0 }
 0xa3b   : > { %3341 = vadd.xlane.f32.xlu1 %v3340_v26 }
 0xaae   : > { %v3342_v35 = vpop.xlane.xlu1 %3341 }
 0xaaf   : > { %v3343_v36 = vmul.f32 %v3342_v35, %v10513_v18 }
 0xab1   : > { %v3344_v37 = vadd.f32 1e-05, %v3343_v36 }
 0xab3   : > { %9246 = vrsqrt.f32 %v3344_v37  ;;  %vm3351_vm13 = vweird.f32 %v3344_v37 }
 0xab9   : > { %v9247_v38 = vpop.eup %9246 }
 0xaba   : > { %v3346_v39 = vmul.f32 %v9247_v38, %v3344_v37  ;;  %vm3352_vm12 = vweird.f32 %v9247_v38 }
 0xabb   : > { %vm3353_vm14 = vmor %vm3351_vm13, %vm3352_vm12 }
 0xabc   : > { %v3347_v40 = vmul.f32 %v9247_v38, %v3346_v39 }
 0xabe   : > { %v3348_v41 = vmul.f32 0.5, %v3347_v40 }
 0xac0   : > { %v3349_v42 = vsub.f32 1.5, %v3348_v41 }
 0xac2   : > { %v3350_v43 = vmul.f32 %v9247_v38, %v3349_v42 }
 0xac4   : > { %v3354_v45 = vsel %vm3353_vm14, %v9247_v38, %v3350_v43 }
 0xac5   : > { %v3355_v50 = vmul.f32 %v3354_v45, %v3338_v4 }
 0xac7   : > { %v3359_v52 = vmul.f32 %v9212_v44, %v3355_v50 }
 0xac9   : > { %v3363_v53 = vadd.f32 %v9213_v51, %v3359_v52 }
 0xacb   : > { %v3364_v54 = vpack.c.bf16 %v3363_v53, %v3363_v53 }
 0xacd   : > { %7506 = vmatmul.msk.bf16.vlgmr.msrb.gmra.mxu2 %vm2739_vm0, %v3364_v54  ;;  %7516 = vmatmul.msk.bf16.vlgmr.msra.gmra.mxu3 %vm2739_vm0, %v3364_v54 }
 0xace   : > { %7526 = vmatmul.msk.bf16.vlgmr.msrb.gmra.mxu0 %vm2739_vm0, %v3364_v54 }
 0xb4b   : > { %v3471_v56 = vpop.f32.mrf.mxu0 }
 0xb4c   : > { %v3472_v57 = vadd.f32 %v9214_v55, %v3471_v56 }
 0xb4e   : > { %v10603_v60 = vpack.c.bf16 %v3472_v57, %v3472_v57 }
 0xb50   : > { %v3511_v61 = vsel %vm2918_vm6, %v10603_v60, 0  ;;  %v3399_v62 = vpop.f32.mrf.mxu2  ;;  %v3435_v63 = vpop.f32.mrf.mxu3  ;;  %v3568_v56 = vunpack.c.l.b16 %v10603_v60 }
 0xb51   : > { %v3400_v5 = vadd.f32 %v9215_v58, %v3399_v62  ;;  %v3436_v6 = vadd.f32 %v9216_v59, %v3435_v63  ;;  %3520 = vmatpush.bf16.msrb.mxu3 %v3511_v61 }
 0xb52   : > { %v3569_v57 = vpack.c.b16 %v3568_v56, %v3568_v56 }
 0xb53   : > { %v3403_v7 = vpack.c.bf16 %v3400_v5, %v3400_v5  ;;  %v3439_v8 = vpack.c.bf16 %v3436_v6, %v3436_v6  ;;  %v3473_v11 = vpop.f32.mrf.mxu0 }
 0xb55   : > { %v3527_v12 = vunpack.c.l.b16 %v3403_v7  ;;  %v3480_v13 = vsel %vm2883_vm5, %v3439_v8, 0  ;;  %v3532_v19 = vunpack.c.l.b16 %v3439_v8 }
 0xb56   : > { %3489 = vmatpush.bf16.xpose.msra.mxu2 %v3480_v13 }
 0xb57   : > { %v3528_v21 = vpack.c.b16 %v3527_v12, %v3527_v12  ;;  %v3533_v22 = vpack.c.b16 %v3532_v19, %v3532_v19 }
 0xb58   : > { %v3401_v23 = vpop.f32.mrf.mxu2  ;;  %v3437_v24 = vpop.f32.mrf.mxu3 }
 0xb59   : > { %3529 = vrot.lane.b32.xlu1 %v3528_v21, %s11448_s15  ;;  %3593 = vrot.lane.b32.xlu0 %v3533_v22, %s11449_s7 }
 0xb5a   : > { %3534 = vrot.lane.b32.xlu2 %v3533_v22, %s11448_s15 }
 0xb5d   : > { %7527 = vmatmul.msk.bf16.vlgmr.msra.gmra.mxu2 %vm2883_vm5, %v3403_v7 }
 0xb61   : > { %3647 = vrot.lane.b32.xlu1 %v3528_v21, %s11450_s0  ;;  %3591 = vrot.lane.b32.xlu0 %v3528_v21, %s11449_s7 }
 0xb62   : > { %3649 = vrot.lane.b32.xlu2 %v3533_v22, %s11450_s0 }
 0xbb4   : > { %v3535_v4 = vpop.permute.xlu2 %3534 }
 0xbb5   : > { %v3540_v25 = vsel %vm2883_vm5, %v3535_v4, 0 }
 0xbb6   : > { %3549 = vmatpush.bf16.xpose.msra.mxu0 %v3540_v25 }
 0xbbc   : > { %v3650_v26 = vpop.permute.xlu2 %3649 }
 0xbbd   : > { %v3655_v27 = vsel %vm2883_vm5, %v3650_v26, 0 }
 0xbbe   : > { %3664 = vmatpush.bf16.xpose.msrb.mxu0 %v3655_v27 }
 0xbcb   : > { %v3530_v32 = vpop.permute.xlu1 %3529  ;;  %v3594_v33 = vpop.permute.xlu0 %3593 }
 0xbcc   : > { %v3599_v9 = vsel %vm2883_vm5, %v3594_v33, 0  ;;  %7529 = vmatmul.msk.bf16.vlgmr.msra.gmra.mxu0 %vm2883_vm5, %v3530_v32 }
 0xbcd   : > { %3608 = vmatpush.bf16.xpose.msrb.mxu2 %v3599_v9 }
 0xbd3   : > { %v3592_v10 = vpop.permute.xlu0 %3591  ;;  %v3648_v34 = vpop.permute.xlu1 %3647 }
 0xbd4   : > { %7531 = vmatmul.msk.bf16.vlgmr.msrb.gmra.mxu2 %vm2883_vm5, %v3592_v10 }
 0xbdc   : > { %7533 = vmatmul.msk.bf16.vlgmr.msrb.gmra.mxu0 %vm2883_vm5, %v3648_v34 }
 0xbe0   : > { %v3491_v35 = vpop.f32.mrf.mxu2 }
 0xbe1   : > { %v3495_v36 = vsel %vm2883_vm5, %v3491_v35, -inf }
 0xbe2   : > { %3496 = vmax.xlane.f32.xlu0 %v3495_v36 }
 0xbe8   : > { %v3493_v37 = vpop.f32.mrf.mxu2 }
 0xc49   : > { %v3551_v38 = vpop.f32.mrf.mxu0 }
 0xc4a   : > { %v3555_v39 = vsel %vm2883_vm5, %v3551_v38, -inf }
 0xc4b   : > { %3556 = vmax.xlane.f32.xlu2 %v3555_v39 }
 0xc51   : > { %v3553_v40 = vpop.f32.mrf.mxu0 }
 0xc55   : > { %v3497_v41 = vpop.xlane.xlu0 %3496 }
 0xc56   : > { %v3498_v42 = vsub.f32 %v3491_v35, %v3497_v41 }
 0xc57   : > { %v3610_v43 = vpop.f32.mrf.mxu2 }
 0xc58   : > { %v3499_v44 = vmul.f32 1.442695, %v3498_v42  ;;  %v3614_v45 = vsel %vm2883_vm5, %v3610_v43, -inf }
 0xc59   : > { %v3666_v50 = vpop.f32.mrf.mxu0  ;;  %3615 = vmax.xlane.f32.xlu1 %v3614_v45 }
 0xc5a   : > { %9248 = vpow2.f32 %v3499_v44  ;;  %v3670_v51 = vsel %vm2883_vm5, %v3666_v50, -inf }
 0xc5b   : > { %3671 = vmax.xlane.f32.xlu0 %v3670_v51 }
 0xc5f   : > { %v3612_v52 = vpop.f32.mrf.mxu2 }
 0xc60   : > { %v9249_v53 = vpop.eup %9248 }
 0xc61   : > { %v3668_v54 = vpop.f32.mrf.mxu0  ;;  %v3501_v55 = vsel %vm2883_vm5, %v9249_v53, 0.0 }
 0xc62   : > { %3502 = vadd.xlane.f32.xlu2 %v3501_v55 }
 0xc6f   : > { %3570 = vrot.lane.b32.xlu0 %v3569_v57, %s11448_s15  ;;  %s11452_s15 = smov 16  }
 0xcbe   : > { %v3557_v58 = vpop.xlane.xlu2 %3556 }
 0xcbf   : > { %v3558_v59 = vsub.f32 %v3551_v38, %v3557_v58  ;;  %v8703_v58 = vld [vmem:[#allocation12 + $0x10] sm:$0xff] }
 0xcc1   : > { %v3559_v61 = vmul.f32 1.442695, %v3558_v59 }
 0xcc3   : > { %9250 = vpow2.f32 %v3559_v61 }
 0xcc9   : > { %v9251_v62 = vpop.eup %9250 }
 0xcca   : > { %v3561_v63 = vsel %vm2883_vm5, %v9251_v62, 0.0 }
 0xccb   : > { %3562 = vadd.xlane.f32.xlu1 %v3561_v63 }
 0xccc   : > { %v3616_v5 = vpop.xlane.xlu1 %3615 }
 0xccd   : > { %v3617_v6 = vsub.f32 %v3610_v43, %v3616_v5 }
 0xcce   : > { %v3672_v7 = vpop.xlane.xlu0 %3671 }
 0xccf   : > { %v3618_v8 = vmul.f32 1.442695, %v3617_v6  ;;  %v3673_v11 = vsub.f32 %v3666_v50, %v3672_v7 }
 0xcd1   : > { %9252 = vpow2.f32 %v3618_v8  ;;  %v3674_v12 = vmul.f32 1.442695, %v3673_v11  ;;  %v9217_v8 = vld [vmem:[%s11440_s13 + $0x1] ss:$0 sm:$0xff] }
 0xcd3   : > { %9254 = vpow2.f32 %v3674_v12 }
 0xcd5   : > { %v3503_v60 = vpop.xlane.xlu2 %3502 }
 0xcd6   : > { %9256 = vrcp.f32 %v3503_v60 }
 0xcd7   : > { %v9253_v13 = vpop.eup %9252 }
 0xcd8   : > { %v3620_v19 = vsel %vm2883_vm5, %v9253_v13, 0.0 }
 0xcd9   : > { %v9255_v21 = vpop.eup %9254  ;;  %3621 = vadd.xlane.f32.xlu2 %v3620_v19 }
 0xcda   : > { %v3676_v22 = vsel %vm2883_vm5, %v9255_v21, 0.0 }
 0xcdb   : > { %3677 = vadd.xlane.f32.xlu1 %v3676_v22 }
 0xcdc   : > { %v9257_v23 = vpop.eup %9256 }
 0xcdd   : > { %v3505_v24 = vmul.f32 %v9257_v23, %v9249_v53 }
 0xcdf   : > { %v3506_v4 = vpack.c.bf16 %v3505_v24, %v3505_v24 }
 0xce1   : > { %7528 = vmatmul.msk.bf16.vlgmr.msrb.gmra.mxu3 %vm2883_vm5, %v3506_v4  ;;  %v3571_v25 = vpop.permute.xlu0 %3570 }
 0xce2   : > { %v3576_v26 = vsel %vm2918_vm6, %v3571_v25, 0  ;;  %v8706_v25 = vld [vmem:[#allocation13 + $0x18] sm:$0xff] }
 0xce3   : > { %3585 = vmatpush.bf16.msra.mxu1 %v3576_v26  ;;  %v8705_v26 = vld [vmem:[#allocation13 + $0x10] sm:$0xff] }
 0xcf1   : > { %3626 = vrot.lane.b32.xlu2 %v3569_v57, %s11449_s7  ;;  %s11453_s7 = smov 24  }
 0xcf4   : > { %3682 = vrot.lane.b32.xlu1 %v3569_v57, %s11450_s0  ;;  %s11451_s0 = smov 8   ;;  %v8704_v57 = vld [vmem:[#allocation12 + $0x18] sm:$0xff] }
 0xcf5   : > { %3745 = vmatpush.bf16.msra.mxu2 %v8704_v57  ;;  %v8725_v57 = vld [vmem:[#allocation16 + $0x30] sm:$0xff] }
 0xcf9   : > { %3746 = vmatpush.bf16.msra.mxu2 %v8703_v58 }
 0xd3e   : > { %v3563_v27 = vpop.xlane.xlu1 %3562 }
 0xd3f   : > { %9258 = vrcp.f32 %v3563_v27 }
 0xd45   : > { %v9259_v32 = vpop.eup %9258 }
 0xd46   : > { %v3565_v33 = vmul.f32 %v9259_v32, %v9251_v62 }
 0xd48   : > { %v3566_v9 = vpack.c.bf16 %v3565_v33, %v3565_v33 }
 0xd4a   : > { %7530 = vmatmul.msk.bf16.vlgmr.msra.gmra.mxu1 %vm2883_vm5, %v3566_v9 }
 0xd4c   : > { %v3622_v10 = vpop.xlane.xlu2 %3621 }
 0xd4d   : > { %9260 = vrcp.f32 %v3622_v10 }
 0xd4e   : > { %v3678_v39 = vpop.xlane.xlu1 %3677 }
 0xd4f   : > { %9262 = vrcp.f32 %v3678_v39 }
 0xd53   : > { %v9261_v34 = vpop.eup %9260 }
 0xd54   : > { %v3624_v35 = vmul.f32 %v9261_v34, %v9253_v13  ;;  %v3627_v36 = vpop.permute.xlu2 %3626 }
 0xd55   : > { %v3632_v37 = vsel %vm2918_vm6, %v3627_v36, 0  ;;  %v9263_v40 = vpop.eup %9262 }
 0xd56   : > { %v3625_v38 = vpack.c.bf16 %v3624_v35, %v3624_v35  ;;  %3641 = vmatpush.bf16.msra.mxu3 %v3632_v37  ;;  %v3680_v42 = vmul.f32 %v9263_v40, %v9255_v21 }
 0xd58   : > { %v3681_v45 = vpack.c.bf16 %v3680_v42, %v3680_v42 }
 0xd59   : > { %7532 = vmatmul.msk.bf16.vlgmr.msra.gmra.mxu3 %vm2883_vm5, %v3625_v38  ;;  %v9218_v38 = vld [vmem:[%s11442_s9 + $0x1] ss:$0 sm:$0xff] }
 0xd5a   : > { %3825 = vmatpush.bf16.msrb.mxu3 %v8706_v25  ;;  %v8742_v25 = vld [vmem:[#allocation16 + $0xb8] sm:$0xff] }
 0xd5e   : > { %3826 = vmatpush.bf16.msrb.mxu3 %v8705_v26  ;;  %v8749_v26 = vld [vmem:[#allocation16 + $0xf0] sm:$0xff] }
 0xd64   : > { %v3522_v41 = vpop.f32.mrf.mxu3 }
 0xd66   : > { %v3683_v43 = vpop.permute.xlu1 %3682 }
 0xd67   : > { %v3688_v44 = vsel %vm2918_vm6, %v3683_v43, 0  ;;  %vm5645_vm6 = vcmask 1045504  }
 0xd68   : > { %3697 = vmatpush.bf16.msrb.mxu1 %v3688_v44  ;;  %v8713_v44 = vld [vmem:[#allocation15 + $0x70] sm:$0xff] }
 0xd6b   : > { %7534 = vmatmul.msk.bf16.vlgmr.msrb.gmra.mxu1 %vm2883_vm5, %v3681_v45  ;;  %v8712_v45 = vld [vmem:[#allocation15 + $0x68] sm:$0xff] }
 0xd6c   : > { %v3524_v50 = vpop.f32.mrf.mxu3 }
 0xd6d   : > { %v8711_v50 = vld [vmem:[#allocation15 + $0x60] sm:$0xff] }
 0xdc7   : > { %v3587_v51 = vpop.f32.mrf.mxu1 }
 0xdc8   : > { %3704 = vrot.lane.b32.xlu0 %v3587_v51, %s11451_s0  ;;  %s11454_s0 = sld [smem:[#allocation51_spill]]  ;;  %v8710_v51 = vld [vmem:[#allocation15 + $0x58] sm:$0xff] }
 0xdce   : > { %v7600_v58 = vld [vmem:[%s11454_s0 + $0x10] sm:$0xf] }
 0xdcf   : > { %v3589_v52 = vpop.f32.mrf.mxu1 }
 0xdd0   : > { %v8709_v52 = vld [vmem:[#allocation15 + $0x50] sm:$0xff] }
 0xddc   : > { %v3643_v53 = vpop.f32.mrf.mxu3 }
 0xddd   : > { %3708 = vrot.lane.b32.xlu0 %v3643_v53, %s11452_s15  ;;  %v8708_v53 = vld [vmem:[#allocation15 + $0x48] sm:$0xff]  ;;  %s11458_s15 = sld [smem:[#allocation52_spill]] }
 0xde4   : > { %v3645_v54 = vpop.f32.mrf.mxu3 }
 0xde5   : > { %v8707_v54 = vld [vmem:[#allocation15 + $0x40] sm:$0xff] }
 0xde8   : > { %v3699_v55 = vpop.f32.mrf.mxu1 }
 0xde9   : > { %3712 = vrot.lane.b32.xlu2 %v3699_v55, %s11453_s7  ;;  %v8726_v55 = vld [vmem:[#allocation16 + $0x38] sm:$0xff]  ;;  %s11459_s7 = sld [smem:[#allocation60_spill]] }
 0xdea   : > { %5070 = vmatpush.bf16.msra.mxu3 %v8726_v55  ;;  %v8739_v55 = vld [vmem:[#allocation16 + $0xa0] sm:$0xff] }
 0xdee   : > { %5071 = vmatpush.bf16.msra.mxu3 %v8725_v57  ;;  %v8756_v57 = vld [vmem:[#allocation16 + $0x128] sm:$0xff] }
 0xdf0   : > { %v3701_v56 = vpop.f32.mrf.mxu1 }
 0xdf1   : > { %v9220_v56 = vld [vmem:[%s11445_s16 + $0x1] ss:$0 sm:$0xff] }
 0xe3a   : > { %v3705_v59 = vpop.permute.xlu0 %3704 }
 0xe3b   : > { %v3715_v61 = vsel %vm2883_vm5, %v3522_v41, %v3705_v59  ;;  %v9219_v41 = vld [vmem:[%s11444_s22 + $0x1] ss:$0 sm:$0xff]  ;;  %v8718_v59 = vld [vmem:[%s11454_s0 + $0x14] sm:$0xf0] }
 0xe43   : > { %v3713_v63 = vpop.permute.xlu2 %3712 }
 0xe4f   : > { %v3709_v62 = vpop.permute.xlu0 %3708 }
 0xe50   : > { %v3716_v5 = vsel %vm3125_vm7, %v3715_v61, %v3709_v62  ;;  %v8717_v61 = vld [vmem:[%s11454_s0 + $0x14] sm:$0xf]  ;;  %v7602_v62 = vld [vmem:[%s11454_s0 + $0x18] sm:$0xf0]  ;;  %vm5646_vm7 = vcmask 1046528  }
 0xe51   : > { %v3717_v6 = vsel %vm3127_vm8, %v3716_v5, %v3713_v63  ;;  %v7601_v63 = vor.u32 %v8718_v59, %v7600_v58  ;;  %v7605_v5 = vor.u32 %v8717_v61, %v7602_v62  ;;  %v8738_v58 = vld [vmem:[#allocation16 + $0x98] sm:$0xff]  ;;  %v8755_v61 = vld [vmem:[#allocation16 + $0x120] sm:$0xff]  ;;  %v8729_v62 = vld [vmem:[#allocation16 + $0x50] sm:$0xff]  ;;  %vm5312_vm8 = vcmask 523264  }
 0xe52   : > { %v3718_v7 = vpack.c.bf16 %v3717_v6, %v3717_v6  ;;  %v7592_v6 = vld [vmem:[%s11454_s0] sm:$0xf] }
 0xe53   : > { %3982 = vmatpush.bf16.msra.mxu1 %v7601_v63  ;;  %3995 = vmatpush.bf16.msrb.mxu2 %v7605_v5  ;;  %v8746_v59 = vld [vmem:[#allocation16 + $0xd8] sm:$0xff]  ;;  %v8737_v63 = vld [vmem:[#allocation16 + $0x90] sm:$0xff] }
 0xe54   : > { %7543 = vmatmul.msk.bf16.vlgmr.msra.gmra.mxu2 %vm2739_vm0, %v3718_v7  ;;  %v8716_v7 = vld [vmem:[%s11454_s0 + $0x4] sm:$0xf0]  ;;  %v8745_v5 = vld [vmem:[#allocation16 + $0xd0] sm:$0xff] }
 0xed7   : > { %v3748_v11 = vpop.f32.mrf.mxu2 }
 0xed8   : > { %v3752_v12 = vadd.f32 %v3748_v11, %v10587_v20  ;;  %v8714_v20 = vld [vmem:[#allocation15 + $0x78] sm:$0xff] }
 0xed9   : > { %3907 = vmatpush.bf16.msra.mxu0 %v8714_v20  ;;  %v8715_v11 = vld [vmem:[%s11454_s0 + $0x4] sm:$0xf] }
 0xeda   : > { %v10649_v60 = vadd.f32 %v9217_v8, %v3752_v12  ;;  %v7594_v12 = vld [vmem:[%s11454_s0 + $0x8] sm:$0xf0]  ;;  %s11461_s0 = sld [smem:[#allocation53_spill]] }
 0xedc   : > { %v3763_v13 = vsel %vm2739_vm0, %v10649_v60, 0.0 }
 0xedd   : > { %3764 = vadd.xlane.f32.xlu0 %v3763_v13  ;;  %3908 = vmatpush.bf16.msra.mxu0 %v8713_v44  ;;  %v4270_v44 = vrot.slane %v10450_v47, 2  ;;  %v8730_v47 = vld [vmem:[#allocation16 + $0x58] sm:$0xff] }
 0xedf   : > { %v3750_v19 = vpop.f32.mrf.mxu2 }
 0xee0   : > { %v7593_v19 = vor.u32 %v8716_v7, %v7592_v6  ;;  %v8754_v6 = vld [vmem:[#allocation16 + $0x118] sm:$0xff]  ;;  %v8728_v7 = vld [vmem:[#allocation16 + $0x48] sm:$0xff] }
 0xee1   : > { %3909 = vmatpush.bf16.msra.mxu0 %v8712_v45 }
 0xee2   : > { %3983 = vmatpush.bf16.msra.mxu1 %v7593_v19  ;;  %v8735_v19 = vld [vmem:[#allocation16 + $0x80] sm:$0xff] }
 0xee5   : > { %3910 = vmatpush.bf16.msra.mxu0 %v8711_v50  ;;  %v8732_v50 = vld [vmem:[#allocation16 + $0x68] sm:$0xff] }
 0xee9   : > { %3911 = vmatpush.bf16.msra.mxu0 %v8710_v51  ;;  %v8740_v51 = vld [vmem:[#allocation16 + $0xa8] sm:$0xff] }
 0xeed   : > { %3912 = vmatpush.bf16.msra.mxu0 %v8709_v52  ;;  %v8748_v52 = vld [vmem:[#allocation16 + $0xe8] sm:$0xff] }
 0xef1   : > { %3913 = vmatpush.bf16.msra.mxu0 %v8708_v53  ;;  %v8757_v53 = vld [vmem:[#allocation16 + $0x130] sm:$0xff] }
 0xef5   : > { %3914 = vmatpush.bf16.msra.mxu0 %v8707_v54  ;;  %v8731_v54 = vld [vmem:[#allocation16 + $0x60] sm:$0xff] }
 0xf50   : > { %v3765_v21 = vpop.xlane.xlu0 %3764 }
 0xf51   : > { %v3766_v22 = vmul.f32 %v3765_v21, %v10513_v18  ;;  %v7597_v21 = vor.u32 %v8715_v11, %v7594_v12  ;;  %v8744_v11 = vld [vmem:[#allocation16 + $0xc8] sm:$0xff]  ;;  %v8753_v12 = vld [vmem:[#allocation16 + $0x110] sm:$0xff] }
 0xf53   : > { %v3767_v23 = vsub.f32 %v10649_v60, %v3766_v22  ;;  %v8750_v22 = vld [vmem:[#allocation16 + $0xf8] sm:$0xff]  ;;  %3996 = vmatpush.bf16.msrb.mxu2 %v7597_v21  ;;  %v8743_v21 = vld [vmem:[#allocation16 + $0xc0] sm:$0xff] }
 0xf54   : > { %5109 = vmatpush.bf16.msrb.mxu0 %v8750_v22  ;;  %v8752_v22 = vld [vmem:[#allocation16 + $0x108] sm:$0xff] }
 0xf55   : > { %v3768_v24 = vmul.f32 %v3767_v23, %v3767_v23 }
 0xf57   : > { %v3769_v4 = vsel %vm2739_vm0, %v3768_v24, 0.0  ;;  %v8734_v24 = vld [vmem:[#allocation16 + $0x78] sm:$0xff]  ;;  %5096 = vmatpush.bf16.msra.mxu2 %v8742_v25  ;;  %v8751_v25 = vld [vmem:[#allocation16 + $0x100] sm:$0xff] }
 0xf58   : > { %3770 = vadd.xlane.f32.xlu1 %v3769_v4  ;;  %5083 = vmatpush.bf16.msrb.mxu1 %v8734_v24  ;;  %v4273_v24 = vrot.slane %v10452_v48, 2  ;;  %v8789_v48 = vld [vmem:[#allocation16 + $0x230] sm:$0xff] }
 0xf59   : > { %5110 = vmatpush.bf16.msrb.mxu0 %v8749_v26  ;;  %v8781_v26 = vld [vmem:[#allocation16 + $0x1f0] sm:$0xff] }
 0xf5d   : > { %5111 = vmatpush.bf16.msrb.mxu0 %v8748_v52 }
 0xfcb   : > { %v3771_v27 = vpop.xlane.xlu1 %3770 }
 0xfcc   : > { %v3772_v32 = vmul.f32 %v3771_v27, %v10513_v18  ;;  %v8723_v27 = vld [vmem:[#allocation16 + $0x20] sm:$0xff] }
 0xfce   : > { %v3773_v33 = vadd.f32 1e-05, %v3772_v32  ;;  %v8733_v32 = vld [vmem:[#allocation16 + $0x70] sm:$0xff] }
 0xfcf   : > { %5084 = vmatpush.bf16.msrb.mxu1 %v8733_v32 }
 0xfd0   : > { %9264 = vrsqrt.f32 %v3773_v33  ;;  %vm3780_vm1 = vweird.f32 %v3773_v33 }
 0xfd3   : > { %5085 = vmatpush.bf16.msrb.mxu1 %v8732_v50 }
 0xfd6   : > { %v9265_v9 = vpop.eup %9264 }
 0xfd7   : > { %v3775_v10 = vmul.f32 %v9265_v9, %v3773_v33  ;;  %vm3781_vm15 = vweird.f32 %v9265_v9  ;;  %5086 = vmatpush.bf16.msrb.mxu1 %v8731_v54  ;;  %v8785_v54 = vld [vmem:[#allocation16 + $0x210] sm:$0xff] }
 0xfd8   : > { %vm3782_vm2 = vmor %vm3780_vm1, %vm3781_vm15 }
 0xfd9   : > { %v3776_v34 = vmul.f32 %v9265_v9, %v3775_v10 }
 0xfdb   : > { %v3777_v35 = vmul.f32 0.5, %v3776_v34  ;;  %5087 = vmatpush.bf16.msrb.mxu1 %v8730_v47  ;;  %v8775_v47 = vld [vmem:[#allocation16 + $0x1c0] sm:$0xff] }
 0xfdd   : > { %v3778_v36 = vsub.f32 1.5, %v3777_v35  ;;  %v8722_v35 = vld [vmem:[#allocation16 + $0x18] sm:$0xff] }
 0xfdf   : > { %v3779_v37 = vmul.f32 %v9265_v9, %v3778_v36  ;;  %5088 = vmatpush.bf16.msrb.mxu1 %v8729_v62  ;;  %v8766_v62 = vld [vmem:[#allocation16 + $0x178] sm:$0xff] }
 0xfe1   : > { %v3783_v39 = vsel %vm3782_vm2, %v9265_v9, %v3779_v37  ;;  %v8741_v9 = vld [vmem:[#allocation16 + $0xb0] sm:$0xff] }
 0xfe2   : > { %v3784_v40 = vmul.f32 %v3783_v39, %v3767_v23  ;;  %v8724_v23 = vld [vmem:[#allocation16 + $0x28] sm:$0xff]  ;;  %5097 = vmatpush.bf16.msra.mxu2 %v8741_v9  ;;  %v8721_v37 = vld [vmem:[#allocation16 + $0x10] sm:$0xff]  ;;  %v9221_v9 = vld [vmem:[%s11447_s1 + $0x1] ss:$0 sm:$0xff] }
 0xfe3   : > { %5072 = vmatpush.bf16.msra.mxu3 %v8724_v23  ;;  %5089 = vmatpush.bf16.msrb.mxu1 %v8728_v7  ;;  %v8782_v23 = vld [vmem:[#allocation16 + $0x1f8] sm:$0xff]  ;;  %v8783_v7 = vld [vmem:[#allocation16 + $0x200] sm:$0xff] }
 0xfe4   : > { %v3788_v42 = vmul.f32 %v9218_v38, %v3784_v40  ;;  %v8720_v38 = vld [vmem:[#allocation16 + $0x8] sm:$0xff] }
 0xfe6   : > { %v3792_v43 = vadd.f32 %v9219_v41, %v3788_v42  ;;  %v8719_v42 = vld [vmem:[#allocation16] sm:$0xff]  ;;  %5098 = vmatpush.bf16.msra.mxu2 %v8740_v51 }
 0xfe7   : > { %5073 = vmatpush.bf16.msra.mxu3 %v8723_v27  ;;  %v4274_v27 = vrot.slane %v10466_v29, 2 }
 0xfe8   : > { %v3793_v18 = vpack.c.bf16 %v3792_v43, %v3792_v43  ;;  %v8758_v43 = vld [vmem:[#allocation16 + $0x138] sm:$0xff] }
 0xfea   : > { %7556 = vmatmul.msk.bf16.vlgmr.msrb.gmra.mxu3 %vm2739_vm0, %v3793_v18  ;;  %5099 = vmatpush.bf16.msra.mxu2 %v8739_v55 }
 0xfeb   : > { %5074 = vmatpush.bf16.msra.mxu3 %v8722_v35 }
 0xfee   : > { %5100 = vmatpush.bf16.msra.mxu2 %v8738_v58  ;;  %v8784_v58 = vld [vmem:[#allocation16 + $0x208] sm:$0xff] }
 0xfef   : > { %5075 = vmatpush.bf16.msra.mxu3 %v8721_v37  ;;  %v8788_v37 = vld [vmem:[#allocation16 + $0x228] sm:$0xff] }
 0xff2   : > { %5101 = vmatpush.bf16.msra.mxu2 %v8737_v63  ;;  %v8774_v63 = vld [vmem:[#allocation16 + $0x1b8] sm:$0xff] }
 0xff3   : > { %5076 = vmatpush.bf16.msra.mxu3 %v8720_v38 }
 0xff7   : > { %5077 = vmatpush.bf16.msra.mxu3 %v8719_v42 }
 0xffa   : > { %5078 = vmatmul.bf16.vlgmr.msra.gmra.mxu3 %v4270_v44 }
 0xffb   : > { %5122 = vmatpush.bf16.msrb.mxu3 %v8758_v43 }
 0xfff   : > { %5123 = vmatpush.bf16.msrb.mxu3 %v8757_v53  ;;  %v8776_v53 = vld [vmem:[#allocation16 + $0x1c8] sm:$0xff] }
0x1003   : > { %5124 = vmatpush.bf16.msrb.mxu3 %v8756_v57 }
0x1007   : > { %5125 = vmatpush.bf16.msrb.mxu3 %v8755_v61  ;;  %v8814_v61 = vld [vmem:[#allocation16 + $0x2f8] sm:$0xff] }
0x100b   : > { %5126 = vmatpush.bf16.msrb.mxu3 %v8754_v6 }
0x100f   : > { %5127 = vmatpush.bf16.msrb.mxu3 %v8753_v12  ;;  %v8765_v12 = vld [vmem:[#allocation16 + $0x170] sm:$0xff] }
0x1013   : > { %5128 = vmatpush.bf16.msrb.mxu3 %v8752_v22  ;;  %v8764_v22 = vld [vmem:[#allocation16 + $0x168] sm:$0xff] }
0x1017   : > { %5129 = vmatpush.bf16.msrb.mxu3 %v8751_v25  ;;  %v8763_v25 = vld [vmem:[#allocation16 + $0x160] sm:$0xff] }
0x101a   : > { %5130 = vmatmul.bf16.vlgmr.msrb.gmra.mxu3 %v4274_v27  ;;  %v8810_v27 = vld [vmem:[#allocation16 + $0x2d8] sm:$0xff] }
0x106d   : > { %v3828_v8 = vpop.f32.mrf.mxu3 }
0x106e   : > { %v3829_v13 = vadd.f32 %v9220_v56, %v3828_v8  ;;  %v8747_v56 = vld [vmem:[#allocation16 + $0xe0] sm:$0xff]  ;;  %v8736_v8 = vld [vmem:[#allocation16 + $0x88] sm:$0xff] }
0x106f   : > { %5112 = vmatpush.bf16.msrb.mxu0 %v8747_v56  ;;  %5102 = vmatpush.bf16.msra.mxu2 %v8736_v8  ;;  %v8813_v8 = vld [vmem:[#allocation16 + $0x2f0] sm:$0xff] }
0x1070   : > { %v3832_v4 = vmul.f32 %v3829_v13, %v3829_v13 }
0x1072   : > { %v3833_v20 = vmul.f32 %v3832_v4, %v3829_v13  ;;  %v9912_v4 = vmov 8.0  }
0x1073   : > { %5113 = vmatpush.bf16.msrb.mxu0 %v8746_v59  ;;  %5103 = vmatpush.bf16.msra.mxu2 %v8735_v19  ;;  %v4278_v19 = vrot.slane %v10480_v14, 2  ;;  %v4272_v14 = vrot.slane %v10448_v46, 2  ;;  %v8808_v46 = vld [vmem:[#allocation16 + $0x2c8] sm:$0xff] }
0x1074   : > { %v3834_v33 = vmul.f32 0.044715, %v3833_v20  ;;  %v8790_v20 = vld [vmem:[#allocation16 + $0x238] sm:$0xff] }
0x1075   : > { %v3830_v10 = vpop.f32.mrf.mxu3  ;;  %5174 = vmatpush.bf16.msra.mxu3 %v8790_v20  ;;  %v4271_v20 = vrot.slane %v10454_v49, 2  ;;  %v8817_v49 = vld [vmem:[#allocation16 + $0x310] sm:$0xff] }
0x1076   : > { %v3835_v34 = vadd.f32 %v3834_v33, %v3829_v13  ;;  %v8780_v33 = vld [vmem:[#allocation16 + $0x1e8] sm:$0xff] }
0x1077   : > { %5114 = vmatpush.bf16.msrb.mxu0 %v8745_v5  ;;  %v4277_v5 = vrot.slane %v10468_v30, 2  ;;  %v8812_v30 = vld [vmem:[#allocation16 + $0x2e8] sm:$0xff] }
0x1078   : > { %v3836_v36 = vmul.f32 0.7978846, %v3835_v34 }
0x1079   : > { %5175 = vmatpush.bf16.msra.mxu3 %v8789_v48  ;;  %v8770_v48 = vld [vmem:[#allocation16 + $0x198] sm:$0xff] }
0x107a   : > { %9266 = vtanh.f32 %v3836_v36  ;;  %v8779_v36 = vld [vmem:[#allocation16 + $0x1e0] sm:$0xff] }
0x107b   : > { %5115 = vmatpush.bf16.msrb.mxu0 %v8744_v11  ;;  %9268 = vrcp.f32 %v9912_v4  ;;  %v8822_v11 = vld [vmem:[#allocation16 + $0x338] sm:$0xff]  ;;  %v8820_v4 = vld [vmem:[#allocation16 + $0x328] sm:$0xff] }
0x107d   : > { %5176 = vmatpush.bf16.msra.mxu3 %v8788_v37  ;;  %v8768_v37 = vld [vmem:[#allocation16 + $0x188] sm:$0xff] }
0x107f   : > { %5116 = vmatpush.bf16.msrb.mxu0 %v8743_v21  ;;  %v8821_v21 = vld [vmem:[#allocation16 + $0x330] sm:$0xff] }
0x1080   : > { %v9267_v39 = vpop.eup %9266 }
0x1081   : > { %v3838_v40 = vadd.f32 1.0, %v9267_v39  ;;  %v9269_v32 = vpop.eup %9268 }
0x1082   : > { %v3935_v10 = vmul.f32 8.0, %v9269_v32  ;;  %vm3939_vm3 = vweird.f32 %v9269_v32 }
0x1083   : > { %v3839_v41 = vmul.f32 0.5, %v3838_v40  ;;  %v8778_v40 = vld [vmem:[#allocation16 + $0x1d8] sm:$0xff] }
0x1084   : > { %v3936_v29 = vsub.f32 1.0, %v3935_v10  ;;  %v8818_v10 = vld [vmem:[#allocation16 + $0x318] sm:$0xff] }
0x1085   : > { %v3840_v18 = vmul.f32 %v3839_v41, %v3829_v13  ;;  %v8727_v13 = vld [vmem:[#allocation16 + $0x40] sm:$0xff] }
0x1086   : > { %5090 = vmatpush.bf16.msrb.mxu1 %v8727_v13  ;;  %v8787_v41 = vld [vmem:[#allocation16 + $0x220] sm:$0xff]  ;;  %v3937_v43 = vmul.f32 %v9269_v32, %v3936_v29  ;;  %v8773_v13 = vld [vmem:[#allocation16 + $0x1b0] sm:$0xff] }
0x1087   : > { %v3841_v45 = vpack.c.bf16 %v3840_v18, %v3840_v18  ;;  %5177 = vmatpush.bf16.msra.mxu3 %v8787_v41  ;;  %v8807_v29 = vld [vmem:[#allocation16 + $0x2c0] sm:$0xff] }
0x1088   : > { %v3938_v51 = vadd.f32 %v9269_v32, %v3937_v43  ;;  %v8767_v41 = vld [vmem:[#allocation16 + $0x180] sm:$0xff]  ;;  %v8798_v43 = vld [vmem:[#allocation16 + $0x278] sm:$0xff] }
0x1089   : > { %3915 = vmatmul.bf16.vlgmr.msra.gmra.mxu0 %v3841_v45  ;;  %v8777_v45 = vld [vmem:[#allocation16 + $0x1d0] sm:$0xff] }
0x108a   : > { %5161 = vmatpush.bf16.msra.mxu0 %v8782_v23  ;;  %v3940_v56 = vsel %vm3939_vm3, %v9269_v32, %v3938_v51  ;;  %v8772_v23 = vld [vmem:[#allocation16 + $0x1a8] sm:$0xff]  ;;  %v8819_v32 = vld [vmem:[#allocation16 + $0x320] sm:$0xff]  ;;  %v8845_v51 = vld [vmem:[#allocation16 + $0x3f0] sm:$0xff] }
0x108e   : > { %5162 = vmatpush.bf16.msra.mxu0 %v8781_v26  ;;  %v8771_v26 = vld [vmem:[#allocation16 + $0x1a0] sm:$0xff] }
0x1092   : > { %5163 = vmatpush.bf16.msra.mxu0 %v8780_v33  ;;  %v8762_v33 = vld [vmem:[#allocation16 + $0x158] sm:$0xff] }
0x1096   : > { %5164 = vmatpush.bf16.msra.mxu0 %v8779_v36  ;;  %v8760_v36 = vld [vmem:[#allocation16 + $0x148] sm:$0xff] }
0x1099   : > { %5117 = vmatmul.bf16.vlgmr.msrb.gmra.mxu0 %v4273_v24  ;;  %v8811_v24 = vld [vmem:[#allocation16 + $0x2e0] sm:$0xff] }
0x109a   : > { %5165 = vmatpush.bf16.msra.mxu0 %v8778_v40  ;;  %v8759_v40 = vld [vmem:[#allocation16 + $0x140] sm:$0xff] }
0x109e   : > { %5166 = vmatpush.bf16.msra.mxu0 %v8777_v45  ;;  %v4276_v45 = vrot.slane %v10464_v28, 2  ;;  %v8796_v28 = vld [vmem:[#allocation16 + $0x268] sm:$0xff] }
0x10a2   : > { %5167 = vmatpush.bf16.msra.mxu0 %v8776_v53  ;;  %v8805_v53 = vld [vmem:[#allocation16 + $0x2b0] sm:$0xff] }
0x10a6   : > { %5168 = vmatpush.bf16.msra.mxu0 %v8775_v47  ;;  %v8842_v47 = vld [vmem:[#allocation16 + $0x3d8] sm:$0xff] }
0x10a9   : > { %5169 = vmatmul.bf16.vlgmr.msra.gmra.mxu0 %v4277_v5  ;;  %v8792_v5 = vld [vmem:[#allocation16 + $0x248] sm:$0xff] }
0x10aa   : > { %5213 = vmatpush.bf16.msrb.mxu0 %v8814_v61  ;;  %v8793_v61 = vld [vmem:[#allocation16 + $0x250] sm:$0xff] }
0x10ae   : > { %5214 = vmatpush.bf16.msrb.mxu0 %v8813_v8  ;;  %v8791_v8 = vld [vmem:[#allocation16 + $0x240] sm:$0xff] }
0x10b2   : > { %5215 = vmatpush.bf16.msrb.mxu0 %v8812_v30  ;;  %v4280_v30 = vrot.slane %v10482_v15, 2  ;;  %v8835_v15 = vld [vmem:[#allocation16 + $0x3a0] sm:$0xff] }
0x10b6   : > { %5216 = vmatpush.bf16.msrb.mxu0 %v8811_v24  ;;  %v8828_v24 = vld [vmem:[#allocation16 + $0x368] sm:$0xff] }
0x10ba   : > { %5217 = vmatpush.bf16.msrb.mxu0 %v8810_v27  ;;  %v8832_v27 = vld [vmem:[#allocation16 + $0x388] sm:$0xff] }
0x1106   : > { %v3916_v34 = vpop.f32.mrf.mxu0 }
0x1107   : > { %v3920_v35 = vadd.f32 %v3916_v34, %v10649_v60  ;;  %v8786_v60 = vld [vmem:[#allocation16 + $0x218] sm:$0xff]  ;;  %v8761_v34 = vld [vmem:[#allocation16 + $0x150] sm:$0xff] }
0x1108   : > { %5178 = vmatpush.bf16.msra.mxu3 %v8786_v60  ;;  %v4275_v60 = vrot.slane %v10470_v31, 2  ;;  %v8804_v31 = vld [vmem:[#allocation16 + $0x2a8] sm:$0xff] }
0x1109   : > { %v10674_v38 = vadd.f32 %v9221_v9, %v3920_v35  ;;  %v8809_v9 = vld [vmem:[#allocation16 + $0x2d0] sm:$0xff] }
0x110a   : > { %v8769_v35 = vld [vmem:[#allocation16 + $0x190] sm:$0xff]  ;;  %5218 = vmatpush.bf16.msrb.mxu0 %v8809_v9  ;;  %v8831_v9 = vld [vmem:[#allocation16 + $0x380] sm:$0xff] }
0x110b   : > { %v3927_v39 = vsel %vm2739_vm0, %v10674_v38, 0.0 }
0x110c   : > { %v3928_v42 = vrot.slane %v3927_v39, 4  ;;  %5179 = vmatpush.bf16.msra.mxu3 %v8785_v54  ;;  %v4282_v54 = vrot.slane %v10496_v0, 2  ;;  %v8794_v0 = vld [vmem:[#allocation16 + $0x258] sm:$0xff] }
0x110e   : > { %v3929_v18 = vadd.f32 %v3928_v42, %v3927_v39  ;;  %v3918_v44 = vpop.f32.mrf.mxu0  ;;  %5219 = vmatpush.bf16.msrb.mxu0 %v8808_v46  ;;  %v8816_v39 = vld [vmem:[#allocation16 + $0x308] sm:$0xff]  ;;  %v8846_v42 = vld [vmem:[#allocation16 + $0x3f8] sm:$0xff]  ;;  %v4283_v46 = vrot.slane %v10498_v1, 2  ;;  %v8248_v1 = vld [vmem:[#allocation24 + $0x50] sm:$0xf] }
0x110f   : > { %v4281_v44 = vrot.slane %v10486_v17, 2  ;;  %v8844_v17 = vld [vmem:[#allocation16 + $0x3e8] sm:$0xff] }
0x1110   : > { %v3930_v50 = vrot.slane %v3929_v18, 2  ;;  %5180 = vmatpush.bf16.msra.mxu3 %v8784_v58  ;;  %v8802_v58 = vld [vmem:[#allocation16 + $0x298] sm:$0xff] }
0x1112   : > { %v3931_v52 = vadd.f32 %v3930_v50, %v3929_v18  ;;  %v8806_v18 = vld [vmem:[#allocation16 + $0x2b8] sm:$0xff]  ;;  %5220 = vmatpush.bf16.msrb.mxu0 %v8807_v29  ;;  %v8815_v50 = vld [vmem:[#allocation16 + $0x300] sm:$0xff] }
0x1114   : > { %v3932_v55 = vrot.slane %v3931_v52, 1  ;;  %5181 = vmatpush.bf16.msra.mxu3 %v8783_v7  ;;  %v8839_v7 = vld [vmem:[#allocation16 + $0x3c0] sm:$0xff] }
0x1115   : > { %5221 = vmatmul.bf16.vlgmr.msrb.gmra.mxu0 %v4281_v44  ;;  %v8876_v44 = vld [vmem:[#allocation24 + $0x44] sm:$0xf0] }
0x1116   : > { %v3933_v57 = vadd.f32 %v3932_v55, %v3931_v52  ;;  %5265 = vmatpush.bf16.msra.mxu0 %v8846_v42  ;;  %v8797_v52 = vld [vmem:[#allocation16 + $0x270] sm:$0xff]  ;;  %v8843_v55 = vld [vmem:[#allocation16 + $0x3e0] sm:$0xff] }
0x1117   : > { %5182 = vmatmul.bf16.vlgmr.msra.gmra.mxu3 %v4278_v19  ;;  %v4285_v19 = vrot.slane %v10502_v3, 2  ;;  %v8827_v3 = vld [vmem:[#allocation16 + $0x360] sm:$0xff] }
0x1118   : > { %v3941_v59 = vmul.f32 %v3940_v56, %v3933_v57  ;;  %5226 = vmatpush.bf16.msrb.mxu3 %v8822_v11  ;;  %v8795_v56 = vld [vmem:[#allocation16 + $0x260] sm:$0xff] }
0x1119   : > { %v8803_v57 = vld [vmem:[#allocation16 + $0x2a0] sm:$0xff] }
0x111a   : > { %v3942_v6 = vpack.c.bf16 %v3941_v59, %v3941_v59  ;;  %5266 = vmatpush.bf16.msra.mxu0 %v8845_v51  ;;  %v8841_v59 = vld [vmem:[#allocation16 + $0x3d0] sm:$0xff]  ;;  %v8799_v11 = vld [vmem:[#allocation16 + $0x280] sm:$0xff]  ;;  %v8874_v51 = vld [vmem:[#allocation24 + $0x34] sm:$0xf0] }
0x111c   : > { %7606 = vmatmul.msk.bf16.vlgmr.msra.gmra.mxu1 %vm2739_vm0, %v3942_v6  ;;  %7607 = vmatmul.msk.bf16.vlgmr.msrb.gmra.mxu2 %vm2739_vm0, %v3942_v6  ;;  %v8800_v6 = vld [vmem:[#allocation16 + $0x288] sm:$0xff] }
0x111d   : > { %5135 = vmatpush.bf16.msra.mxu1 %v8766_v62  ;;  %5148 = vmatpush.bf16.msrb.mxu2 %v8774_v63  ;;  %v8801_v62 = vld [vmem:[#allocation16 + $0x290] sm:$0xff]  ;;  %v8840_v63 = vld [vmem:[#allocation16 + $0x3c8] sm:$0xff] }
0x111e   : > { %5227 = vmatpush.bf16.msrb.mxu3 %v8821_v21  ;;  %5267 = vmatpush.bf16.msra.mxu0 %v8844_v17  ;;  %v4279_v21 = vrot.slane %v10484_v16, 2  ;;  %v8826_v16 = vld [vmem:[#allocation16 + $0x358] sm:$0xff]  ;;  %v8872_v17 = vld [vmem:[#allocation24 + $0x24] sm:$0xf0] }
0x1121   : > { %5136 = vmatpush.bf16.msra.mxu1 %v8765_v12  ;;  %5149 = vmatpush.bf16.msrb.mxu2 %v8773_v13  ;;  %v8830_v12 = vld [vmem:[#allocation16 + $0x378] sm:$0xff] }
0x1122   : > { %5228 = vmatpush.bf16.msrb.mxu3 %v8820_v4  ;;  %5268 = vmatpush.bf16.msra.mxu0 %v8843_v55  ;;  %v8838_v13 = vld [vmem:[#allocation16 + $0x3b8] sm:$0xff]  ;;  %v8836_v4 = vld [vmem:[#allocation16 + $0x3a8] sm:$0xff] }
0x1123   : > { %v8870_v55 = vld [vmem:[#allocation24 + $0x14] sm:$0xf0] }
0x1125   : > { %5137 = vmatpush.bf16.msra.mxu1 %v8764_v22  ;;  %5150 = vmatpush.bf16.msrb.mxu2 %v8772_v23  ;;  %v8829_v22 = vld [vmem:[#allocation16 + $0x370] sm:$0xff] }
0x1126   : > { %5229 = vmatpush.bf16.msrb.mxu3 %v8819_v32  ;;  %5269 = vmatpush.bf16.msra.mxu0 %v8842_v47  ;;  %v8837_v23 = vld [vmem:[#allocation16 + $0x3b0] sm:$0xff]  ;;  %v8868_v47 = vld [vmem:[#allocation24 + $0x4] sm:$0xf0] }
0x1127   : > { %v8164_v32 = vld [vmem:[#allocation22 + $0x10] sm:$0xf] }
0x1129   : > { %5138 = vmatpush.bf16.msra.mxu1 %v8763_v25  ;;  %5151 = vmatpush.bf16.msrb.mxu2 %v8771_v26  ;;  %v8834_v25 = vld [vmem:[#allocation16 + $0x398] sm:$0xff]  ;;  %v8825_v26 = vld [vmem:[#allocation16 + $0x350] sm:$0xff] }
0x112a   : > { %5230 = vmatpush.bf16.msrb.mxu3 %v8818_v10  ;;  %5270 = vmatpush.bf16.msra.mxu0 %v8841_v59 }
0x112c   : > { %5104 = vmatmul.bf16.vlgmr.msra.gmra.mxu2 %v4272_v14  ;;  %5091 = vmatmul.bf16.vlgmr.msrb.gmra.mxu1 %v4271_v20  ;;  %v8833_v14 = vld [vmem:[#allocation16 + $0x390] sm:$0xff]  ;;  %v8824_v20 = vld [vmem:[#allocation16 + $0x348] sm:$0xff] }
0x112d   : > { %5139 = vmatpush.bf16.msra.mxu1 %v8762_v33  ;;  %5152 = vmatpush.bf16.msrb.mxu2 %v8770_v48  ;;  %v8866_v33 = vld [vmem:[#allocation22 + $0x14] sm:$0xf0]  ;;  %v8823_v48 = vld [vmem:[#allocation16 + $0x340] sm:$0xff] }
0x112e   : > { %5231 = vmatpush.bf16.msrb.mxu3 %v8817_v49  ;;  %5271 = vmatpush.bf16.msra.mxu0 %v8840_v63  ;;  %v8165_v10 = vor.u32 %v8866_v33, %v8164_v32  ;;  %v4284_v49 = vrot.slane %v10500_v2, 2 }
0x1131   : > { %5140 = vmatpush.bf16.msra.mxu1 %v8761_v34  ;;  %5153 = vmatpush.bf16.msrb.mxu2 %v8769_v35  ;;  %v8156_v34 = vld [vmem:[#allocation22] sm:$0xf]  ;;  %v8864_v35 = vld [vmem:[#allocation22 + $0x4] sm:$0xf0] }
0x1132   : > { %5232 = vmatpush.bf16.msrb.mxu3 %v8816_v39  ;;  %5272 = vmatpush.bf16.msra.mxu0 %v8839_v7  ;;  %v8157_v29 = vor.u32 %v8864_v35, %v8156_v34 }
0x1135   : > { %5141 = vmatpush.bf16.msra.mxu1 %v8760_v36  ;;  %5154 = vmatpush.bf16.msrb.mxu2 %v8768_v37  ;;  %v8264_v36 = vld [vmem:[#allocation24 + $0x70] sm:$0xf]  ;;  %v8882_v37 = vld [vmem:[#allocation24 + $0x74] sm:$0xf0] }
0x1136   : > { %5233 = vmatpush.bf16.msrb.mxu3 %v8815_v50  ;;  %5273 = vmatmul.bf16.vlgmr.msra.gmra.mxu0 %v4285_v19  ;;  %v10693_v39 = vor.u32 %v8882_v37, %v8264_v36  ;;  %v8232_v50 = vld [vmem:[#allocation24 + $0x30] sm:$0xf] }
0x1139   : > { %5142 = vmatpush.bf16.msra.mxu1 %v8759_v40  ;;  %5155 = vmatpush.bf16.msrb.mxu2 %v8767_v41  ;;  %v8256_v40 = vld [vmem:[#allocation24 + $0x60] sm:$0xf]  ;;  %v8880_v41 = vld [vmem:[#allocation24 + $0x64] sm:$0xf0] }
0x113a   : > { %5234 = vmatmul.bf16.vlgmr.msrb.gmra.mxu3 %v4282_v54  ;;  %v10696_v42 = vor.u32 %v8880_v41, %v8256_v40  ;;  %v8224_v54 = vld [vmem:[#allocation24 + $0x20] sm:$0xf] }
0x113c   : > { %5156 = vmatmul.bf16.vlgmr.msrb.gmra.mxu2 %v4276_v45  ;;  %5143 = vmatmul.bf16.vlgmr.msra.gmra.mxu1 %v4275_v60  ;;  %v5380_v45 = vpack.c.bf16 %v10674_v38, %v10674_v38  ;;  %v10714_v38 = vor.u32 %v8872_v17, %v8224_v54  ;;  %v8848_v54 = vld [vmem:[#allocation18 + $0x8] sm:$0xff] }
0x113d   : > { %5187 = vmatpush.bf16.msrb.mxu1 %v8798_v43  ;;  %5200 = vmatpush.bf16.msra.mxu2 %v8806_v18  ;;  %v8878_v43 = vld [vmem:[#allocation24 + $0x54] sm:$0xf0]  ;;  %v8240_v18 = vld [vmem:[#allocation24 + $0x40] sm:$0xf] }
0x113e   : > { %v10699_v2 = vor.u32 %v8878_v43, %v8248_v1  ;;  %v10704_v60 = vor.u32 %v8876_v44, %v8240_v18  ;;  %v8850_v43 = vld [vmem:[#allocation18 + $0x18] sm:$0xff] }
0x113f   : > { %5320 = vmatpush.bf16.msra.mxu3 %v8850_v43 }
0x1140   : > { %11455 = vst [vmem:[#allocation64_spill] sm:$0xff] %v10699_v2 }
0x1141   : > { %5188 = vmatpush.bf16.msrb.mxu1 %v8797_v52  ;;  %5201 = vmatpush.bf16.msra.mxu2 %v8805_v53  ;;  %11456 = vst [vmem:[#allocation65_spill] sm:$0xff] %v10704_v60  ;;  %v10706_v52 = vrot.slane %v5380_v45, 2  ;;  %v10709_v53 = vor.u32 %v8874_v51, %v8232_v50  ;;  %v8849_v50 = vld [vmem:[#allocation18 + $0x10] sm:$0xff] }
0x1143   : > { %11457 = vst [vmem:[#allocation66_spill] sm:$0xff] %v10709_v53  ;;  %5321 = vmatpush.bf16.msra.mxu3 %v8849_v50  ;;  %v8862_v50 = vld [vmem:[#allocation21 + $0x34] sm:$0xf0] }
0x1145   : > { %5189 = vmatpush.bf16.msrb.mxu1 %v8796_v28  ;;  %5202 = vmatpush.bf16.msra.mxu2 %v8804_v31  ;;  %v5079_v28 = vpop.f32.mrf.mxu3  ;;  %v8216_v31 = vld [vmem:[#allocation24 + $0x10] sm:$0xf] }
0x1147   : > { %5322 = vmatpush.bf16.msra.mxu3 %v8848_v54 }
0x1149   : > { %5190 = vmatpush.bf16.msrb.mxu1 %v8795_v56  ;;  %5203 = vmatpush.bf16.msra.mxu2 %v8803_v57  ;;  %v10717_v56 = vor.u32 %v8870_v55, %v8216_v31  ;;  %v8208_v57 = vld [vmem:[#allocation24] sm:$0xf] }
0x114a   : > { %v10720_v59 = vor.u32 %v8868_v47, %v8208_v57 }
0x114d   : > { %5191 = vmatpush.bf16.msrb.mxu1 %v8794_v0  ;;  %5204 = vmatpush.bf16.msra.mxu2 %v8802_v58  ;;  %v5081_v0 = vpop.f32.mrf.mxu3  ;;  %v5118_v58 = vpop.f32.mrf.mxu0 }
0x114e   : > { %v8865_v0 = vld [vmem:[#allocation22 + $0x14] sm:$0xf] }
0x1151   : > { %5192 = vmatpush.bf16.msrb.mxu1 %v8793_v61  ;;  %5205 = vmatpush.bf16.msra.mxu2 %v8801_v62  ;;  %v3947_v61 = vld [vmem:[%s11458_s15] sm:$0x3]  ;;  %s6896_s15 = sshll.u32 %s11604_s2, 1 }
0x1152   : > { %v3969_v62 = vperm.slane %v3947_v61, 0  ;;  %s1413_s1 = scalar_lea.vmem %s11459_s7, %s6896_s15  ;;  %s11490_s7 = sld [smem:[#allocation57_spill]] }
0x1155   : > { %5193 = vmatpush.bf16.msrb.mxu1 %v8792_v5  ;;  %5206 = vmatpush.bf16.msra.mxu2 %v8800_v6  ;;  %v5131_v63 = vpop.f32.mrf.mxu3  ;;  %v5120_v5 = vpop.f32.mrf.mxu0 }
0x1159   : > { %5194 = vmatpush.bf16.msrb.mxu1 %v8791_v8  ;;  %5207 = vmatpush.bf16.msra.mxu2 %v8799_v11  ;;  %v3970_v11 = vperm.slane %v3947_v61, 1 }
0x115c   : > { %5195 = vmatmul.bf16.vlgmr.msrb.gmra.mxu1 %v4279_v21  ;;  %5208 = vmatmul.bf16.vlgmr.msra.gmra.mxu2 %v4280_v30 }
0x115d   : > { %5239 = vmatpush.bf16.msra.mxu1 %v8830_v12  ;;  %5252 = vmatpush.bf16.msrb.mxu2 %v8838_v13  ;;  %v4008_v12 = vlaneseq  ;;  %v5133_v19 = vpop.f32.mrf.mxu3  ;;  %v5170_v21 = vpop.f32.mrf.mxu0 }
0x115f   : > { %vm10742_vm5 = vcmp.lt.s32.totalorder %v4008_v12, 157 }
0x1161   : > { %5240 = vmatpush.bf16.msra.mxu1 %v8829_v22  ;;  %5253 = vmatpush.bf16.msrb.mxu2 %v8837_v23 }
0x1165   : > { %5241 = vmatpush.bf16.msra.mxu1 %v8828_v24  ;;  %5254 = vmatpush.bf16.msrb.mxu2 %v8836_v4  ;;  %v11463_v24 = vmov 0 }
0x1166   : > { %v11464_v24 = vsel %vm10742_vm5, 4294967295, %v11463_v24 }
0x1167   : > { %11465 = vst [vmem:[#allocation69_spill] sm:$0xff] %v11464_v24 }
0x1169   : > { %5242 = vmatpush.bf16.msra.mxu1 %v8827_v3  ;;  %5255 = vmatpush.bf16.msrb.mxu2 %v8835_v15  ;;  %v4269_v3 = vld [vmem:[%s11461_s0] sm:$0x1]  ;;  %s11471_s0 = sld [smem:[#allocation55_spill]] }
0x116d   : > { %5243 = vmatpush.bf16.msra.mxu1 %v8826_v16  ;;  %5256 = vmatpush.bf16.msrb.mxu2 %v8834_v25  ;;  %v5080_v25 = vadd.f32 %v5079_v28, %v4269_v3  ;;  %v8847_v28 = vld [vmem:[#allocation18] sm:$0xff] }
0x116e   : > { %5323 = vmatpush.bf16.msra.mxu3 %v8847_v28  ;;  %v8861_v28 = vld [vmem:[#allocation21 + $0x34] sm:$0xf] }
0x1171   : > { %5244 = vmatpush.bf16.msra.mxu1 %v8825_v26  ;;  %5257 = vmatpush.bf16.msrb.mxu2 %v8833_v14  ;;  %v5172_v26 = vpop.f32.mrf.mxu0 }
0x1175   : > { %5245 = vmatpush.bf16.msra.mxu1 %v8824_v20  ;;  %5258 = vmatpush.bf16.msrb.mxu2 %v8832_v27 }
0x1179   : > { %5246 = vmatpush.bf16.msra.mxu1 %v8823_v48  ;;  %5259 = vmatpush.bf16.msrb.mxu2 %v8831_v9 }
0x117c   : > { %5247 = vmatmul.bf16.vlgmr.msra.gmra.mxu1 %v4283_v46  ;;  %5260 = vmatmul.bf16.vlgmr.msrb.gmra.mxu2 %v4284_v49 }
0x117d   : > { %5424 = vmatpush.bf16.msra.mxu2 %v8165_v10 }
0x1181   : > { %5425 = vmatpush.bf16.msra.mxu2 %v8157_v29 }
0x1185   : > { %5655 = vmatpush.bf16.msrb.mxu2 %v10693_v39 }
0x1189   : > { %5656 = vmatpush.bf16.msrb.mxu2 %v10696_v42 }
0x118c   : > { %8170 = vmatmul.msk.bf16.vlgmr.msra.gmra.mxu2 %vm2739_vm0, %v10706_v52 }
0x118d   : > { %5657 = vmatpush.bf16.msrb.mxu2 %v10699_v2 }
0x1191   : > { %5658 = vmatpush.bf16.msrb.mxu2 %v10704_v60 }
0x1192   : > { %v5222_v49 = vpop.f32.mrf.mxu0 }
0x1195   : > { %5659 = vmatpush.bf16.msrb.mxu2 %v10709_v53 }
0x1199   : > { %5660 = vmatpush.bf16.msrb.mxu2 %v10714_v38  ;;  %v3985_v6 = vpop.f32.mrf.mxu1 }
0x119a   : > { %v10725_v7 = vadd.f32 %v3985_v6, %v3969_v62  ;;  %v5183_v16 = vpop.f32.mrf.mxu3  ;;  %v5224_v18 = vpop.f32.mrf.mxu0  ;;  %v8863_v62 = vld [vmem:[#allocation22 + $0x4] sm:$0xf] }
0x119c   : > { %11460 = vst [vmem:[#allocation67_spill] sm:$0xff] %v10725_v7  ;;  %v10732_v8 = vpack.c.bf16 %v10725_v7, %v10725_v7 }
0x119d   : > { %5661 = vmatpush.bf16.msrb.mxu2 %v10717_v56 }
0x119f   : > { %v3998_v13 = vpop.f32.mrf.mxu2 }
0x11a0   : > { %v10736_v30 = vadd.f32 %v3998_v13, %v3970_v11 }
0x11a1   : > { %5662 = vmatpush.bf16.msrb.mxu2 %v10720_v59  ;;  %v3987_v22 = vpop.f32.mrf.mxu1 }
0x11a2   : > { %11462 = vst [vmem:[#allocation68_spill] sm:$0xff] %v10736_v30  ;;  %v4004_v23 = vrot.slane %v10736_v30, 7  ;;  %v5185_v32 = vpop.f32.mrf.mxu3  ;;  %v8886_v22 = vld [vmem:[#allocation24 + $0x94] sm:$0x70] }
0x11a4   : > { %5663 = vmatmul.bf16.vlgmr.msrb.gmra.mxu2 %v10732_v8  ;;  %v4006_v4 = vsel %vm4005_vm4, %v10725_v7, %v4004_v23  ;;  %v9913_v23 = vmov 65535   ;;  %v10909_v7 = vld [vmem:[%s11490_s7] sm:$0x3]  ;;  %s11597_s7 = sld [smem:[#allocation61_spill]] }
0x11a5   : > { %4012 = vst.msk [vmem:[%s1413_s1] sm:$0x3] %vm10742_vm5, %v4006_v4  ;;  %v5647_v4 = vsel %vm5645_vm6, 4294967295, %v9913_v23  ;;  %s11466_s1 = sld [smem:[#allocation54_spill]] }
0x11a6   : > { %v10751_v26 = vsel %vm5646_vm7, %v5647_v4, 0 }
0x11a7   : > { %v4000_v15 = vpop.f32.mrf.mxu2 }
0x11a9   : > { %v5092_v14 = vpop.f32.mrf.mxu1 }
0x11aa   : > { %v5093_v20 = vadd.f32 %v5092_v14, %v5080_v25 }
0x11af   : > { %v5105_v27 = vpop.f32.mrf.mxu2 }
0x11b0   : > { %v5106_v33 = vadd.f32 %v5105_v27, %v5093_v20 }
0x11b1   : > { %v5094_v48 = vpop.f32.mrf.mxu1 }
0x11b2   : > { %v5119_v9 = vadd.f32 %v5118_v58, %v5106_v33  ;;  %v8166_v58 = vld [vmem:[#allocation22 + $0x18] sm:$0xf0]  ;;  %v8272_v33 = vld [vmem:[#allocation24 + $0x80] sm:$0xf]  ;;  %v8884_v48 = vld [vmem:[#allocation24 + $0x84] sm:$0xf0] }
0x11b3   : > { %v5274_v51 = vpop.f32.mrf.mxu0  ;;  %v8169_v61 = vor.u32 %v8865_v0, %v8166_v58  ;;  %v8859_v58 = vld [vmem:[#allocation21 + $0x24] sm:$0xf] }
0x11b4   : > { %v5132_v10 = vadd.f32 %v5131_v63, %v5119_v9  ;;  %v8158_v63 = vld [vmem:[#allocation22 + $0x8] sm:$0xf0] }
0x11b5   : > { %5437 = vmatpush.bf16.msrb.mxu3 %v8169_v61  ;;  %v8161_v5 = vor.u32 %v8863_v62, %v8158_v63  ;;  %v8192_v61 = vld [vmem:[#allocation21 + $0x28] sm:$0xf0] }
0x11b6   : > { %v8195_v62 = vor.u32 %v8859_v58, %v8192_v61  ;;  %v8210_v58 = vld [vmem:[#allocation24 + $0x8] sm:$0xf0]  ;;  %v8346_v61 = vld [vmem:[#allocation25 + $0x70] sm:$0xf] }
0x11b7   : > { %v5107_v34 = vpop.f32.mrf.mxu2 }
0x11b9   : > { %v5144_v35 = vpop.f32.mrf.mxu1  ;;  %5438 = vmatpush.bf16.msrb.mxu3 %v8161_v5  ;;  %v8857_v5 = vld [vmem:[#allocation21 + $0x14] sm:$0xf] }
0x11ba   : > { %v5145_v46 = vadd.f32 %v5144_v35, %v5132_v10  ;;  %v10758_v10 = vor.u32 %v8884_v48, %v8272_v33  ;;  %v8854_v35 = vld [vmem:[#allocation19 + $0x18] sm:$0xff] }
0x11bb   : > { %v5276_v55 = vpop.f32.mrf.mxu0  ;;  %5370 = vmatpush.bf16.msrb.mxu1 %v8854_v35  ;;  %v8176_v35 = vld [vmem:[#allocation21 + $0x8] sm:$0xf0] }
0x11bc   : > { %v8182_v55 = vld [vmem:[#allocation21 + $0x10] sm:$0xf] }
0x11bd   : > { %v5235_v41 = vpop.f32.mrf.mxu3 }
0x11bf   : > { %v5157_v36 = vpop.f32.mrf.mxu2 }
0x11c0   : > { %v5158_v37 = vadd.f32 %v5157_v36, %v5145_v46  ;;  %v8853_v46 = vld [vmem:[#allocation19 + $0x10] sm:$0xff] }
0x11c1   : > { %v5146_v29 = vpop.f32.mrf.mxu1  ;;  %5371 = vmatpush.bf16.msrb.mxu1 %v8853_v46  ;;  %v8875_v46 = vld [vmem:[#allocation24 + $0x44] sm:$0xf] }
0x11c2   : > { %v5171_v40 = vadd.f32 %v5170_v21, %v5158_v37  ;;  %v8280_v21 = vld [vmem:[#allocation24 + $0x90] sm:$0xf]  ;;  %v10767_v37 = vpack.c.bf16 %v10736_v30, %v10736_v30  ;;  %v8356_v30 = vld [vmem:[#allocation25 + $0x88] sm:$0xf0] }
0x11c4   : > { %v5184_v1 = vadd.f32 %v5183_v16, %v5171_v40  ;;  %v8281_v16 = vor.u32 %v8886_v22, %v8280_v21  ;;  %v8266_v21 = vld [vmem:[#allocation24 + $0x78] sm:$0xf0] }
0x11c5   : > { %v5237_v45 = vpop.f32.mrf.mxu3 }
0x11c6   : > { %v10754_v27 = vand.u32 %v8281_v16, %v10751_v26  ;;  %v8198_v45 = vld [vmem:[#allocation21 + $0x30] sm:$0xf] }
0x11c7   : > { %v5159_v44 = vpop.f32.mrf.mxu2  ;;  %v8199_v54 = vor.u32 %v8862_v50, %v8198_v45  ;;  %v8871_v45 = vld [vmem:[#allocation24 + $0x24] sm:$0xf]  ;;  %v8226_v50 = vld [vmem:[#allocation24 + $0x28] sm:$0xf0] }
0x11c9   : > { %5491 = vmatpush.bf16.msrb.mxu0 %v8199_v54  ;;  %v10797_v54 = vor.u32 %v8871_v45, %v8226_v50  ;;  %v8917_v45 = vld [vmem:[#allocation25 + $0xf4] sm:$0xf]  ;;  %v8412_v50 = vld [vmem:[#allocation25 + $0xf8] sm:$0xf0] }
0x11cb   : > { %11470 = vst [vmem:[#allocation73_spill] sm:$0xff] %v10797_v54 }
0x11d9   : > { %v5196_v17 = vpop.f32.mrf.mxu1 }
0x11da   : > { %v5197_v6 = vadd.f32 %v5196_v17, %v5184_v1  ;;  %v5287_v1 = vld [vmem:[%s11466_s1] sm:$0x1]  ;;  %v8860_v17 = vld [vmem:[#allocation21 + $0x24] sm:$0xf0]  ;;  %s11519_s1 = sld [smem:[#allocation58_spill]] }
0x11df   : > { %v5209_v31 = vpop.f32.mrf.mxu2 }
0x11e0   : > { %v5210_v11 = vadd.f32 %v5209_v31, %v5197_v6  ;;  %v8184_v6 = vld [vmem:[#allocation21 + $0x18] sm:$0xf0] }
0x11e1   : > { %v5198_v57 = vpop.f32.mrf.mxu1  ;;  %v8187_v22 = vor.u32 %v8857_v5, %v8184_v6  ;;  %v8348_v6 = vld [vmem:[#allocation25 + $0x78] sm:$0xf0] }
0x11e2   : > { %v5223_v12 = vadd.f32 %v5222_v49, %v5210_v11  ;;  %v8852_v49 = vld [vmem:[#allocation19 + $0x8] sm:$0xff]  ;;  %v8200_v57 = vld [vmem:[#allocation21 + $0x38] sm:$0xf0] }
0x11e3   : > { %5372 = vmatpush.bf16.msrb.mxu1 %v8852_v49  ;;  %v8203_v0 = vor.u32 %v8861_v28, %v8200_v57  ;;  %v8274_v28 = vld [vmem:[#allocation24 + $0x88] sm:$0xf0] }
0x11e4   : > { %v5236_v19 = vadd.f32 %v5235_v41, %v5223_v12  ;;  %v8851_v41 = vld [vmem:[#allocation19] sm:$0xff] }
0x11e5   : > { %v8174_v12 = vld [vmem:[#allocation21] sm:$0xf] }
0x11e7   : > { %v5211_v47 = vpop.f32.mrf.mxu2  ;;  %5373 = vmatpush.bf16.msrb.mxu1 %v8851_v41  ;;  %v8873_v41 = vld [vmem:[#allocation24 + $0x34] sm:$0xf] }
0x11e8   : > { %v8858_v47 = vld [vmem:[#allocation21 + $0x14] sm:$0xf0] }
0x11e9   : > { %v8183_v63 = vor.u32 %v8858_v47, %v8182_v55  ;;  %v8218_v55 = vld [vmem:[#allocation24 + $0x18] sm:$0xf0] }
0x11eb   : > { %5504 = vmatpush.bf16.msra.mxu1 %v8203_v0  ;;  %v8867_v0 = vld [vmem:[#allocation24 + $0x4] sm:$0xf] }
0x11ef   : > { %5505 = vmatpush.bf16.msra.mxu1 %v8195_v62  ;;  %v8902_v62 = vld [vmem:[#allocation25 + $0x74] sm:$0xf0] }
0x11f0   : > { %v10810_v5 = vor.u32 %v8902_v62, %v8346_v61  ;;  %v10835_v62 = vor.u32 %v8917_v45, %v8412_v50  ;;  %v8913_v45 = vld [vmem:[#allocation25 + $0xd4] sm:$0xf] }
0x11f3   : > { %5506 = vmatpush.bf16.msra.mxu1 %v8187_v22  ;;  %v8340_v22 = vld [vmem:[#allocation25 + $0x68] sm:$0xf0] }
0x11f9   : > { %v5248_v13 = vpop.f32.mrf.mxu1 }
0x11fa   : > { %v5249_v3 = vadd.f32 %v5248_v13, %v5236_v19  ;;  %v8856_v13 = vld [vmem:[#allocation21 + $0x4] sm:$0xf0]  ;;  %v8881_v19 = vld [vmem:[#allocation24 + $0x74] sm:$0xf] }
0x11fb   : > { %v8175_v23 = vor.u32 %v8856_v13, %v8174_v12  ;;  %v10777_v4 = vor.u32 %v8881_v19, %v8266_v21  ;;  %v8338_v12 = vld [vmem:[#allocation25 + $0x60] sm:$0xf]  ;;  %v8900_v13 = vld [vmem:[#allocation25 + $0x64] sm:$0xf0]  ;;  %v8899_v21 = vld [vmem:[#allocation25 + $0x64] sm:$0xf] }
0x11ff   : > { %v5261_v15 = vpop.f32.mrf.mxu2 }
0x1200   : > { %v5262_v25 = vadd.f32 %v5261_v15, %v5249_v3  ;;  %v8879_v3 = vld [vmem:[#allocation24 + $0x64] sm:$0xf]  ;;  %v8258_v15 = vld [vmem:[#allocation24 + $0x68] sm:$0xf0] }
0x1201   : > { %v5250_v14 = vpop.f32.mrf.mxu1 }
0x1202   : > { %v5275_v20 = vadd.f32 %v5274_v51, %v5262_v25  ;;  %v8190_v51 = vld [vmem:[#allocation21 + $0x20] sm:$0xf]  ;;  %v10780_v25 = vor.u32 %v8879_v3, %v8258_v15  ;;  %v8877_v14 = vld [vmem:[#allocation24 + $0x54] sm:$0xf]  ;;  %v10818_v3 = vor.u32 %v8899_v21, %v8340_v22  ;;  %v8330_v15 = vld [vmem:[#allocation25 + $0x50] sm:$0xf] }
0x1203   : > { %v8191_v31 = vor.u32 %v8860_v17, %v8190_v51  ;;  %v8883_v17 = vld [vmem:[#allocation24 + $0x84] sm:$0xf]  ;;  %v8404_v22 = vld [vmem:[#allocation25 + $0xe8] sm:$0xf0] }
0x1204   : > { %v5278_v32 = vpack.c.bf16 %v5275_v20, %v5275_v20  ;;  %v8250_v20 = vld [vmem:[#allocation24 + $0x58] sm:$0xf0]  ;;  %v10800_v57 = vor.u32 %v8883_v17, %v8274_v28  ;;  %v8314_v28 = vld [vmem:[#allocation25 + $0x30] sm:$0xf]  ;;  %v8915_v21 = vld [vmem:[#allocation25 + $0xe4] sm:$0xf] }
0x1205   : > { %5492 = vmatpush.bf16.msrb.mxu0 %v8191_v31  ;;  %v8869_v31 = vld [vmem:[#allocation24 + $0x14] sm:$0xf] }
0x1206   : > { %8136 = vmatmul.msk.bf16.vlgmr.msra.gmra.mxu3 %vm5312_vm8, %v5278_v32  ;;  %v10783_v32 = vor.u32 %v8877_v14, %v8250_v20  ;;  %v10803_v47 = vor.u32 %v8869_v31, %v8218_v55  ;;  %v8897_v14 = vld [vmem:[#allocation25 + $0x54] sm:$0xf]  ;;  %v8332_v20 = vld [vmem:[#allocation25 + $0x58] sm:$0xf0]  ;;  %v8894_v31 = vld [vmem:[#allocation25 + $0x34] sm:$0xf0] }
0x1207   : > { %v5263_v9 = vpop.f32.mrf.mxu2  ;;  %5674 = vmatpush.bf16.msra.mxu3 %v10754_v27 }
0x1208   : > { %11467 = vst [vmem:[#allocation70_spill] sm:$0xff] %v10783_v32  ;;  %v8855_v9 = vld [vmem:[#allocation21 + $0x4] sm:$0xf] }
0x1209   : > { %5493 = vmatpush.bf16.msrb.mxu0 %v8183_v63  ;;  %v8179_v49 = vor.u32 %v8855_v9, %v8176_v35  ;;  %v8901_v63 = vld [vmem:[#allocation25 + $0x74] sm:$0xf]  ;;  %v10824_v9 = vor.u32 %v8897_v14, %v8332_v20  ;;  %v8322_v35 = vld [vmem:[#allocation25 + $0x40] sm:$0xf]  ;;  %v10849_v14 = vor.u32 %v8915_v21, %v8404_v22  ;;  %v8911_v21 = vld [vmem:[#allocation25 + $0xc4] sm:$0xf] }
0x120a   : > { %v10812_v19 = vor.u32 %v8901_v63, %v8348_v6  ;;  %v8316_v63 = vld [vmem:[#allocation25 + $0x38] sm:$0xf0]  ;;  %v8402_v6 = vld [vmem:[#allocation25 + $0xe0] sm:$0xf] }
0x120b   : > { %5675 = vmatpush.bf16.msra.mxu3 %v10758_v10  ;;  %5507 = vmatpush.bf16.msra.mxu1 %v8179_v49  ;;  %11472 = vst [vmem:[#allocation74_spill] sm:$0xff] %v10824_v9  ;;  %v5338_v49 = vld [vmem:[%s11471_s0] sm:$0x1]  ;;  %s11522_s0 = sld [smem:[#allocation59_spill]] }
0x120c   : > { %5937 = vmatpush.bf16.msra.mxu2 %v10812_v19 }
0x120d   : > { %5494 = vmatpush.bf16.msrb.mxu0 %v8175_v23  ;;  %v10815_v23 = vor.u32 %v8900_v13, %v8338_v12  ;;  %v8916_v12 = vld [vmem:[#allocation25 + $0xe4] sm:$0xf0]  ;;  %v10838_v13 = vor.u32 %v8894_v31, %v8314_v28  ;;  %v8890_v28 = vld [vmem:[#allocation25 + $0x14] sm:$0xf0] }
0x120f   : > { %v10761_v34 = vpop.f32.mrf.mxu2  ;;  %11475 = vst [vmem:[#allocation77_spill] sm:$0xff] %v10838_v13 }
0x1210   : > { %5938 = vmatpush.bf16.msra.mxu2 %v10818_v3 }
0x1211   : > { %5681 = vmatpush.bf16.msra.mxu0 %v10777_v4 }
0x1214   : > { %5939 = vmatpush.bf16.msra.mxu2 %v10824_v9 }
0x1215   : > { %5682 = vmatpush.bf16.msra.mxu0 %v10780_v25 }
0x1216   : > { %8171 = vmatmul.msk.bf16.vlgmr.msrb.gmra.mxu3 %vm2739_vm0, %v10706_v52 }
0x1217   : > { %v5429_v36 = vpop.f32.mrf.mxu2  ;;  %5911 = vmatpush.bf16.msrb.mxu3 %v10810_v5 }
0x1218   : > { %v8242_v36 = vld [vmem:[#allocation24 + $0x48] sm:$0xf0] }
0x1219   : > { %5683 = vmatpush.bf16.msra.mxu0 %v10783_v32 }
0x121b   : > { %5912 = vmatpush.bf16.msrb.mxu3 %v10815_v23 }
0x1226   : > { %8286 = vmatmul.msk.bf16.vlgmr.msra.gmra.mxu3 %vm5641_vm9, %v10767_v37 }
0x1227   : > { %v10771_v29 = vpop.f32.mrf.mxu2 }
0x122f   : > { %v5666_v40 = vpop.f32.mrf.mxu2 }
0x1230   : > { %v10788_v40 = vor.u32 %v8875_v46, %v8242_v36  ;;  %v8896_v46 = vld [vmem:[#allocation25 + $0x44] sm:$0xf0]  ;;  %v8895_v36 = vld [vmem:[#allocation25 + $0x44] sm:$0xf] }
0x1232   : > { %11468 = vst [vmem:[#allocation71_spill] sm:$0xff] %v10788_v40  ;;  %5684 = vmatpush.bf16.msra.mxu0 %v10788_v40 }
0x1289   : > { %v5325_v43 = vpop.f32.mrf.mxu3 }
0x128a   : > { %v5326_v18 = vadd.f32 %v5325_v43, %v5287_v1  ;;  %v8234_v1 = vld [vmem:[#allocation24 + $0x38] sm:$0xf0] }
0x128b   : > { %v10791_v43 = vor.u32 %v8873_v41, %v8234_v1  ;;  %v8324_v41 = vld [vmem:[#allocation25 + $0x48] sm:$0xf0]  ;;  %v8410_v1 = vld [vmem:[#allocation25 + $0xf0] sm:$0xf] }
0x128c   : > { %v5329_v44 = vpack.c.bf16 %v5326_v18, %v5326_v18  ;;  %v8885_v18 = vld [vmem:[#allocation24 + $0x94] sm:$0xf]  ;;  %v10831_v55 = vor.u32 %v8895_v36, %v8324_v41  ;;  %v8308_v41 = vld [vmem:[#allocation25 + $0x28] sm:$0xf0] }
0x128d   : > { %11469 = vst [vmem:[#allocation72_spill] sm:$0xff] %v10791_v43  ;;  %5685 = vmatpush.bf16.msra.mxu0 %v10791_v43 }
0x128e   : > { %8153 = vmatmul.msk.bf16.vlgmr.msrb.gmra.mxu1 %vm5312_vm8, %v5329_v44  ;;  %v8282_v44 = vld [vmem:[#allocation24 + $0x98] sm:$0x70]  ;;  %11474 = vst [vmem:[#allocation76_spill] sm:$0xff] %v10831_v55  ;;  %5940 = vmatpush.bf16.msra.mxu2 %v10831_v55 }
0x1291   : > { %v5327_v52 = vpop.f32.mrf.mxu3  ;;  %5686 = vmatpush.bf16.msra.mxu0 %v10797_v54 }
0x1292   : > { %v8285_v52 = vor.u32 %v8885_v18, %v8282_v44  ;;  %v8918_v18 = vld [vmem:[#allocation25 + $0xf4] sm:$0xf0] }
0x1294   : > { %v10795_v51 = vand.u32 %v8285_v52, %v10751_v26  ;;  %v10807_v26 = vor.u32 %v8867_v0, %v8210_v58  ;;  %v10828_v52 = vor.u32 %v8896_v46, %v8322_v35  ;;  %v10833_v0 = vor.u32 %v8918_v18, %v8410_v1  ;;  %v8893_v58 = vld [vmem:[#allocation25 + $0x34] sm:$0xf]  ;;  %v8306_v35 = vld [vmem:[#allocation25 + $0x20] sm:$0xf]  ;;  %v8892_v46 = vld [vmem:[#allocation25 + $0x24] sm:$0xf0] }
0x1295   : > { %5687 = vmatpush.bf16.msra.mxu0 %v10803_v47  ;;  %v10858_v36 = vor.u32 %v8892_v46, %v8306_v35  ;;  %v8394_v18 = vld [vmem:[#allocation25 + $0xd0] sm:$0xf]  ;;  %v8290_v46 = vld [vmem:[#allocation25] sm:$0xf] }
0x1296   : > { %5700 = vmatpush.bf16.msrb.mxu1 %v10795_v51  ;;  %11473 = vst [vmem:[#allocation75_spill] sm:$0xff] %v10828_v52 }
0x1297   : > { %11477 = vst [vmem:[#allocation79_spill] sm:$0xff] %v10858_v36 }
0x1299   : > { %v10775_v11 = vpop.f32.mrf.mxu3  ;;  %5688 = vmatpush.bf16.msra.mxu0 %v10807_v26 }
0x129a   : > { %5701 = vmatpush.bf16.msrb.mxu1 %v10800_v57 }
0x12a1   : > { %v5442_v16 = vpop.f32.mrf.mxu3 }
0x12a2   : > { %v8898_v16 = vld [vmem:[#allocation25 + $0x54] sm:$0xf0] }
0x12a9   : > { %v10785_v33 = vpop.f32.mrf.mxu3 }
0x12b1   : > { %v5679_v48 = vpop.f32.mrf.mxu3 }
0x12b2   : > { %v10821_v48 = vor.u32 %v8898_v16, %v8330_v15  ;;  %v10844_v15 = vor.u32 %v8893_v58, %v8316_v63  ;;  %v10846_v16 = vor.u32 %v8916_v12, %v8402_v6  ;;  %v8889_v58 = vld [vmem:[#allocation25 + $0x14] sm:$0xf]  ;;  %v8386_v6 = vld [vmem:[#allocation25 + $0xc0] sm:$0xf]  ;;  %v8912_v12 = vld [vmem:[#allocation25 + $0xc4] sm:$0xf0] }
0x12b3   : > { %v10875_v22 = vor.u32 %v8912_v12, %v8386_v6  ;;  %v8370_v12 = vld [vmem:[#allocation25 + $0xa0] sm:$0xf] }
0x12b4   : > { %5913 = vmatpush.bf16.msrb.mxu3 %v10821_v48  ;;  %11476 = vst [vmem:[#allocation78_spill] sm:$0xff] %v10844_v15  ;;  %5941 = vmatpush.bf16.msra.mxu2 %v10844_v15  ;;  %v8524_v15 = vld [vmem:[#allocation27 + $0xd8] sm:$0xf0] }
0x12b5   : > { %11482 = vst [vmem:[#allocation84_spill] sm:$0xff] %v10875_v22 }
0x12b8   : > { %5914 = vmatpush.bf16.msrb.mxu3 %v10828_v52 }
0x12bc   : > { %5915 = vmatpush.bf16.msrb.mxu3 %v10838_v13  ;;  %v8452_v13 = vld [vmem:[#allocation27 + $0x48] sm:$0xf0] }
0x12c0   : > { %5916 = vmatpush.bf16.msrb.mxu3 %v10858_v36  ;;  %v8522_v36 = vld [vmem:[#allocation27 + $0xd0] sm:$0xf] }
0x130b   : > { %v5375_v44 = vpop.f32.mrf.mxu1 }
0x130c   : > { %v5376_v17 = vadd.f32 %v5375_v44, %v5338_v49  ;;  %v8891_v49 = vld [vmem:[#allocation25 + $0x24] sm:$0xf]  ;;  %v8914_v44 = vld [vmem:[#allocation25 + $0xd4] sm:$0xf0] }
0x130d   : > { %v10860_v1 = vor.u32 %v8891_v49, %v8308_v41  ;;  %v10863_v50 = vor.u32 %v8914_v44, %v8394_v18  ;;  %v8888_v49 = vld [vmem:[#allocation25 + $0x4] sm:$0xf0]  ;;  %v8887_v41 = vld [vmem:[#allocation25 + $0x4] sm:$0xf]  ;;  %v8292_v44 = vld [vmem:[#allocation25 + $0x8] sm:$0xf0] }
0x130e   : > { %v5379_v61 = vpack.c.bf16 %v5376_v17, %v5376_v17  ;;  %v8396_v17 = vld [vmem:[#allocation25 + $0xd8] sm:$0xf0]  ;;  %v10881_v18 = vor.u32 %v8888_v49, %v8290_v46  ;;  %v8372_v49 = vld [vmem:[#allocation25 + $0xa8] sm:$0xf0] }
0x130f   : > { %11478 = vst [vmem:[#allocation80_spill] sm:$0xff] %v10860_v1  ;;  %5942 = vmatpush.bf16.msra.mxu2 %v10860_v1  ;;  %v8948_v1 = vld [vmem:[#allocation27 + $0xe4] sm:$0xf0] }
0x1310   : > { %8204 = vmatmul.msk.bf16.vlgmr.msrb.gmra.mxu0 %vm5312_vm8, %v5379_v61  ;;  %8205 = vmatmul.msk.bf16.vlgmr.msra.gmra.mxu1 %vm5312_vm8, %v5379_v61  ;;  %v8300_v61 = vld [vmem:[#allocation25 + $0x18] sm:$0xf0]  ;;  %11484 = vst [vmem:[#allocation86_spill] sm:$0xff] %v10881_v18 }
0x1311   : > { %5924 = vmatpush.bf16.msra.mxu1 %v10833_v0  ;;  %5950 = vmatpush.bf16.msrb.mxu0 %v10835_v62  ;;  %v10872_v63 = vor.u32 %v8889_v58, %v8300_v61  ;;  %v8380_v61 = vld [vmem:[#allocation25 + $0xb8] sm:$0xf0] }
0x1313   : > { %v5377_v20 = vpop.f32.mrf.mxu1  ;;  %11481 = vst [vmem:[#allocation83_spill] sm:$0xff] %v10872_v63  ;;  %5943 = vmatpush.bf16.msra.mxu2 %v10872_v63  ;;  %v8933_v63 = vld [vmem:[#allocation27 + $0x74] sm:$0xf] }
0x1314   : > { %v8388_v20 = vld [vmem:[#allocation25 + $0xc8] sm:$0xf0] }
0x1315   : > { %5925 = vmatpush.bf16.msra.mxu1 %v10846_v16  ;;  %5951 = vmatpush.bf16.msrb.mxu0 %v10849_v14  ;;  %v10878_v35 = vor.u32 %v8911_v21, %v8388_v20  ;;  %v8908_v21 = vld [vmem:[#allocation25 + $0xa4] sm:$0xf0]  ;;  %v8907_v20 = vld [vmem:[#allocation25 + $0xa4] sm:$0xf] }
0x1316   : > { %v10894_v46 = vor.u32 %v8908_v21, %v8370_v12  ;;  %v8354_v12 = vld [vmem:[#allocation25 + $0x80] sm:$0xf]  ;;  %v8904_v21 = vld [vmem:[#allocation25 + $0x84] sm:$0xf0] }
0x1317   : > { %11483 = vst [vmem:[#allocation85_spill] sm:$0xff] %v10878_v35 }
0x1318   : > { %11488 = vst [vmem:[#allocation90_spill] sm:$0xff] %v10894_v46 }
0x1319   : > { %5926 = vmatpush.bf16.msra.mxu1 %v10863_v50 }
0x131d   : > { %5927 = vmatpush.bf16.msra.mxu1 %v10875_v22 }
0x1320   : > { %5689 = vmatmul.bf16.vlgmr.msra.gmra.mxu0 %v10732_v8  ;;  %8287 = vmatmul.msk.bf16.vlgmr.msrb.gmra.mxu1 %vm5641_vm9, %v10767_v37  ;;  %v10866_v8 = vor.u32 %v8913_v45, %v8396_v17  ;;  %v8298_v37 = vld [vmem:[#allocation25 + $0x10] sm:$0xf]  ;;  %v10884_v45 = vor.u32 %v8887_v41, %v8292_v44  ;;  %v10896_v41 = vor.u32 %v8907_v20, %v8372_v49  ;;  %v8903_v20 = vld [vmem:[#allocation25 + $0x84] sm:$0xf] }
0x1321   : > { %v10869_v31 = vor.u32 %v8890_v28, %v8298_v37  ;;  %v8378_v17 = vld [vmem:[#allocation25 + $0xb0] sm:$0xf]  ;;  %v8910_v37 = vld [vmem:[#allocation25 + $0xb4] sm:$0xf0]  ;;  %v8909_v28 = vld [vmem:[#allocation25 + $0xb4] sm:$0xf]  ;;  %v10906_v49 = vor.u32 %v8904_v21, %v8354_v12 }
0x1322   : > { %11479 = vst [vmem:[#allocation81_spill] sm:$0xff] %v10866_v8  ;;  %5952 = vmatpush.bf16.msrb.mxu0 %v10866_v8  ;;  %v10887_v58 = vor.u32 %v8910_v37, %v8378_v17  ;;  %5944 = vmatpush.bf16.msra.mxu2 %v10884_v45  ;;  %v10890_v6 = vor.u32 %v8909_v28, %v8380_v61  ;;  %v8362_v44 = vld [vmem:[#allocation25 + $0x90] sm:$0xf]  ;;  %v8906_v17 = vld [vmem:[#allocation25 + $0x94] sm:$0xf0] }
0x1323   : > { %11480 = vst [vmem:[#allocation82_spill] sm:$0xff] %v10869_v31  ;;  %5917 = vmatpush.bf16.msrb.mxu3 %v10869_v31  ;;  %v8905_v37 = vld [vmem:[#allocation25 + $0x94] sm:$0xf]  ;;  %v10900_v28 = vor.u32 %v8906_v17, %v8362_v44  ;;  %v8364_v61 = vld [vmem:[#allocation25 + $0x98] sm:$0xf0]  ;;  %v5515_v44 = vperm.slane %v10909_v7, 0 }
0x1324   : > { %11485 = vst [vmem:[#allocation87_spill] sm:$0xff] %v10884_v45  ;;  %5928 = vmatpush.bf16.msra.mxu1 %v10887_v58  ;;  %v10902_v24 = vor.u32 %v8905_v37, %v8364_v61  ;;  %v10911_v45 = vor.u32 %v8903_v20, %v8356_v30  ;;  %v8474_v17 = vld [vmem:[#allocation27 + $0x70] sm:$0xf]  ;;  %v8934_v37 = vld [vmem:[#allocation27 + $0x74] sm:$0xf0] }
0x1325   : > { %11486 = vst [vmem:[#allocation88_spill] sm:$0xff] %v10887_v58  ;;  %v8538_v61 = vld [vmem:[#allocation27 + $0xf0] sm:$0xf]  ;;  %v8476_v12 = vld [vmem:[#allocation27 + $0x78] sm:$0xf0] }
0x1326   : > { %5953 = vmatpush.bf16.msrb.mxu0 %v10878_v35  ;;  %11487 = vst [vmem:[#allocation89_spill] sm:$0xff] %v10890_v6  ;;  %v8949_v30 = vld [vmem:[#allocation27 + $0xf4] sm:$0xf]  ;;  %v8540_v20 = vld [vmem:[#allocation27 + $0xf8] sm:$0xf0] }
0x1327   : > { %5918 = vmatpush.bf16.msrb.mxu3 %v10881_v18  ;;  %11489 = vst [vmem:[#allocation91_spill] sm:$0xff] %v10896_v41  ;;  %v10916_v18 = vor.u32 %v8934_v37, %v8474_v17  ;;  %v8466_v31 = vld [vmem:[#allocation27 + $0x60] sm:$0xf]  ;;  %v8468_v37 = vld [vmem:[#allocation27 + $0x68] sm:$0xf0] }
0x1328   : > { %5929 = vmatpush.bf16.msra.mxu1 %v10894_v46  ;;  %11491 = vst [vmem:[#allocation92_spill] sm:$0xff] %v10900_v28  ;;  %v8514_v58 = vld [vmem:[#allocation27 + $0xc0] sm:$0xf] }
0x1329   : > { %11492 = vst [vmem:[#allocation93_spill] sm:$0xff] %v10902_v24 }
0x132a   : > { %5954 = vmatpush.bf16.msrb.mxu0 %v10890_v6  ;;  %11493 = vst [vmem:[#allocation94_spill] sm:$0xff] %v10906_v49  ;;  %v8929_v6 = vld [vmem:[#allocation27 + $0x54] sm:$0xf] }
0x132b   : > { %11494 = vst [vmem:[#allocation95_spill] sm:$0xff] %v10911_v45  ;;  %6165 = vmatpush.bf16.msra.mxu3 %v10916_v18 }
0x132c   : > { %5930 = vmatpush.bf16.msra.mxu1 %v10900_v28  ;;  %11495 = vst [vmem:[#allocation96_spill] sm:$0xff] %v10916_v18  ;;  %v10920_v28 = vor.u32 %v8933_v63, %v8476_v12  ;;  %v8931_v63 = vld [vmem:[#allocation27 + $0x64] sm:$0xf]  ;;  %v8930_v18 = vld [vmem:[#allocation27 + $0x54] sm:$0xf0] }
0x132d   : > { %v10932_v12 = vor.u32 %v8931_v63, %v8468_v37 }
0x132e   : > { %5955 = vmatpush.bf16.msrb.mxu0 %v10896_v41  ;;  %11497 = vst [vmem:[#allocation98_spill] sm:$0xff] %v10920_v28  ;;  %v8530_v41 = vld [vmem:[#allocation27 + $0xe0] sm:$0xf]  ;;  %6191 = vmatpush.bf16.msrb.mxu2 %v10920_v28 }
0x132f   : > { %11500 = vst [vmem:[#allocation101_spill] sm:$0xff] %v10932_v12 }
0x1330   : > { %5931 = vmatpush.bf16.msra.mxu1 %v10906_v49  ;;  %v8932_v49 = vld [vmem:[#allocation27 + $0x64] sm:$0xf0] }
0x1331   : > { %v10927_v17 = vor.u32 %v8932_v49, %v8466_v31  ;;  %v8945_v49 = vld [vmem:[#allocation27 + $0xd4] sm:$0xf] }
0x1332   : > { %5956 = vmatpush.bf16.msrb.mxu0 %v10902_v24  ;;  %v8950_v24 = vld [vmem:[#allocation27 + $0xf4] sm:$0xf0]  ;;  %6192 = vmatpush.bf16.msrb.mxu2 %v10932_v12  ;;  %v8943_v12 = vld [vmem:[#allocation27 + $0xc4] sm:$0xf] }
0x1333   : > { %v10918_v21 = vor.u32 %v8950_v24, %v8538_v61  ;;  %11499 = vst [vmem:[#allocation100_spill] sm:$0xff] %v10927_v17  ;;  %v10929_v24 = vor.u32 %v8948_v1, %v8530_v41  ;;  %v8947_v61 = vld [vmem:[#allocation27 + $0xe4] sm:$0xf]  ;;  %6166 = vmatpush.bf16.msra.mxu3 %v10927_v17  ;;  %v8460_v41 = vld [vmem:[#allocation27 + $0x58] sm:$0xf0] }
0x1334   : > { %v8927_v17 = vld [vmem:[#allocation27 + $0x44] sm:$0xf] }
0x1335   : > { %11496 = vst [vmem:[#allocation97_spill] sm:$0xff] %v10918_v21  ;;  %6178 = vmatpush.bf16.msrb.mxu1 %v10918_v21  ;;  %v8946_v21 = vld [vmem:[#allocation27 + $0xd4] sm:$0xf0] }
0x1336   : > { %5957 = vmatpush.bf16.msrb.mxu0 %v10911_v45  ;;  %v10923_v45 = vor.u32 %v8949_v30, %v8540_v20  ;;  %v8532_v30 = vld [vmem:[#allocation27 + $0xe8] sm:$0xf0]  ;;  %v8458_v20 = vld [vmem:[#allocation27 + $0x50] sm:$0xf]  ;;  %v10942_v37 = vor.u32 %v8946_v21, %v8522_v36 }
0x1337   : > { %v10934_v46 = vor.u32 %v8947_v61, %v8532_v30  ;;  %v10937_v1 = vor.u32 %v8930_v18, %v8458_v20  ;;  %v10944_v61 = vor.u32 %v8929_v6, %v8460_v41  ;;  %v8450_v30 = vld [vmem:[#allocation27 + $0x40] sm:$0xf]  ;;  %v10947_v18 = vor.u32 %v8945_v49, %v8524_v15  ;;  %v8944_v20 = vld [vmem:[#allocation27 + $0xc4] sm:$0xf0]  ;;  %v8516_v36 = vld [vmem:[#allocation27 + $0xc8] sm:$0xf0] }
0x1338   : > { %11498 = vst [vmem:[#allocation99_spill] sm:$0xff] %v10923_v45  ;;  %v10959_v15 = vor.u32 %v8944_v20, %v8514_v58  ;;  %v10961_v41 = vor.u32 %v8927_v17, %v8452_v13  ;;  %v5516_v58 = vperm.slane %v10909_v7, 1  ;;  %v8925_v7 = vld [vmem:[#allocation27 + $0x34] sm:$0xf] }
0x1339   : > { %6179 = vmatpush.bf16.msrb.mxu1 %v10929_v24  ;;  %6167 = vmatpush.bf16.msra.mxu3 %v10937_v1 }
0x133a   : > { %6204 = vmatpush.bf16.msra.mxu0 %v10923_v45  ;;  %v8928_v45 = vld [vmem:[#allocation27 + $0x44] sm:$0xf0]  ;;  %6193 = vmatpush.bf16.msrb.mxu2 %v10944_v61 }
0x133b   : > { %v10954_v6 = vor.u32 %v8928_v45, %v8450_v30 }
0x133d   : > { %6180 = vmatpush.bf16.msrb.mxu1 %v10942_v37  ;;  %6168 = vmatpush.bf16.msra.mxu3 %v10954_v6 }
0x133e   : > { %6205 = vmatpush.bf16.msra.mxu0 %v10934_v46  ;;  %6194 = vmatpush.bf16.msrb.mxu2 %v10961_v41 }
0x1341   : > { %6181 = vmatpush.bf16.msrb.mxu1 %v10959_v15 }
0x1342   : > { %6206 = vmatpush.bf16.msra.mxu0 %v10947_v18 }
0x138d   : > { %v5496_v28 = vpop.f32.mrf.mxu0  ;;  %v5509_v31 = vpop.f32.mrf.mxu1 }
0x138e   : > { %v5497_v63 = vadd.f32 %v5496_v28, %v10761_v34  ;;  %v5678_v34 = vadd.f32 %v10785_v33, %v10771_v29  ;;  %v10964_v29 = vor.u32 %v8943_v12, %v8516_v36  ;;  %v5510_v13 = vadd.f32 %v5509_v31, %v10775_v11  ;;  %v8942_v11 = vld [vmem:[#allocation27 + $0xb4] sm:$0xf0]  ;;  %v8444_v31 = vld [vmem:[#allocation27 + $0x38] sm:$0xf0] }
0x1390   : > { %v10951_v28 = vadd.f32 %v5515_v44, %v5497_v63  ;;  %11502 = vst [vmem:[#allocation103_spill] sm:$0xff] %v10964_v29  ;;  %6207 = vmatpush.bf16.msra.mxu0 %v10964_v29  ;;  %v10972_v63 = vadd.f32 %v5516_v58, %v5510_v13  ;;  %v10979_v13 = vor.u32 %v8925_v7, %v8444_v31  ;;  %v8941_v58 = vld [vmem:[#allocation27 + $0xb4] sm:$0xf]  ;;  %v8500_v7 = vld [vmem:[#allocation27 + $0xa8] sm:$0xf0] }
0x1392   : > { %11501 = vst [vmem:[#allocation102_spill] sm:$0xff] %v10951_v28  ;;  %v5707_v21 = vadd.f32 %v5678_v34, %v10951_v28  ;;  %6195 = vmatpush.bf16.msrb.mxu2 %v10979_v13 }
0x1393   : > { %11503 = vst [vmem:[#allocation104_spill] sm:$0xff] %v10972_v63 }
0x1394   : > { %v5709_v33 = vmax.f32 %v5707_v21, 0.0  ;;  %11506 = vst [vmem:[#allocation107_spill] sm:$0xff] %v10979_v13 }
0x1395   : > { %v5498_v44 = vpop.f32.mrf.mxu0  ;;  %v5511_v49 = vpop.f32.mrf.mxu1 }
0x1396   : > { %v5711_v45 = vpack.c.bf16 %v5709_v33, %v5709_v33  ;;  %v8442_v44 = vld [vmem:[#allocation27 + $0x30] sm:$0xf]  ;;  %v8926_v49 = vld [vmem:[#allocation27 + $0x34] sm:$0xf0] }
0x1397   : > { %v10975_v28 = vor.u32 %v8926_v49, %v8442_v44  ;;  %v8436_v44 = vld [vmem:[#allocation27 + $0x28] sm:$0xf0] }
0x1398   : > { %5919 = vmatmul.bf16.vlgmr.msrb.gmra.mxu3 %v5711_v45  ;;  %5945 = vmatmul.bf16.vlgmr.msra.gmra.mxu2 %v5711_v45  ;;  %v8506_v45 = vld [vmem:[#allocation27 + $0xb0] sm:$0xf] }
0x1399   : > { %11504 = vst [vmem:[#allocation105_spill] sm:$0xff] %v10975_v28  ;;  %v10977_v29 = vor.u32 %v8942_v11, %v8506_v45  ;;  %6169 = vmatpush.bf16.msra.mxu3 %v10975_v28  ;;  %v8939_v11 = vld [vmem:[#allocation27 + $0xa4] sm:$0xf] }
0x139a   : > { %v10994_v31 = vor.u32 %v8939_v11, %v8500_v7  ;;  %v8937_v11 = vld [vmem:[#allocation27 + $0x94] sm:$0xf]  ;;  %v8492_v7 = vld [vmem:[#allocation27 + $0x98] sm:$0xf0] }
0x139b   : > { %11505 = vst [vmem:[#allocation106_spill] sm:$0xff] %v10977_v29  ;;  %6182 = vmatpush.bf16.msrb.mxu1 %v10977_v29 }
0x139c   : > { %11511 = vst [vmem:[#allocation112_spill] sm:$0xff] %v10994_v31 }
0x139d   : > { %v5690_v17 = vpop.f32.mrf.mxu0  ;;  %v5703_v12 = vpop.f32.mrf.mxu1 }
0x139e   : > { %v5704_v30 = vadd.f32 %v5703_v12, %v5690_v17  ;;  %v8508_v17 = vld [vmem:[#allocation27 + $0xb8] sm:$0xf0] }
0x139f   : > { %v10982_v12 = vor.u32 %v8941_v58, %v8508_v17  ;;  %v8426_v58 = vld [vmem:[#allocation27 + $0x10] sm:$0xf]  ;;  %v8922_v17 = vld [vmem:[#allocation27 + $0x14] sm:$0xf0] }
0x13a0   : > { %v5708_v20 = vadd.f32 %v5704_v30, %v10972_v63  ;;  %v8434_v30 = vld [vmem:[#allocation27 + $0x20] sm:$0xf] }
0x13a1   : > { %11507 = vst [vmem:[#allocation108_spill] sm:$0xff] %v10982_v12  ;;  %6208 = vmatpush.bf16.msra.mxu0 %v10982_v12 }
0x13a2   : > { %v5710_v34 = vmax.f32 %v5708_v20, 0.0  ;;  %v8924_v20 = vld [vmem:[#allocation27 + $0x24] sm:$0xf0] }
0x13a4   : > { %v5712_v36 = vpack.c.bf16 %v5710_v34, %v5710_v34  ;;  %v8498_v34 = vld [vmem:[#allocation27 + $0xa0] sm:$0xf] }
0x13a5   : > { %v5692_v21 = vpop.f32.mrf.mxu0  ;;  %v5705_v33 = vpop.f32.mrf.mxu1  ;;  %6209 = vmatpush.bf16.msra.mxu0 %v10994_v31  ;;  %v8418_v31 = vld [vmem:[#allocation27] sm:$0xf] }
0x13a6   : > { %5932 = vmatmul.bf16.vlgmr.msra.gmra.mxu1 %v5712_v36  ;;  %5958 = vmatmul.bf16.vlgmr.msrb.gmra.mxu0 %v5712_v36  ;;  %v10987_v36 = vor.u32 %v8924_v20, %v8434_v30  ;;  %v8940_v21 = vld [vmem:[#allocation27 + $0xa4] sm:$0xf0]  ;;  %v8923_v33 = vld [vmem:[#allocation27 + $0x24] sm:$0xf]  ;;  %v8490_v30 = vld [vmem:[#allocation27 + $0x90] sm:$0xf]  ;;  %v10999_v20 = vor.u32 %v8922_v17, %v8426_v58 }
0x13a7   : > { %v10989_v49 = vor.u32 %v8940_v21, %v8498_v34  ;;  %v10991_v45 = vor.u32 %v8923_v33, %v8436_v44  ;;  %v8938_v34 = vld [vmem:[#allocation27 + $0x94] sm:$0xf0]  ;;  %v8921_v21 = vld [vmem:[#allocation27 + $0x14] sm:$0xf]  ;;  %v8428_v33 = vld [vmem:[#allocation27 + $0x18] sm:$0xf0] }
0x13a8   : > { %11508 = vst [vmem:[#allocation109_spill] sm:$0xff] %v10987_v36  ;;  %6170 = vmatpush.bf16.msra.mxu3 %v10987_v36  ;;  %v11001_v44 = vor.u32 %v8938_v34, %v8490_v30  ;;  %v11003_v63 = vor.u32 %v8921_v21, %v8428_v33  ;;  %v8920_v58 = vld [vmem:[#allocation27 + $0x4] sm:$0xf0]  ;;  %v8482_v17 = vld [vmem:[#allocation27 + $0x80] sm:$0xf] }
0x13a9   : > { %11509 = vst [vmem:[#allocation110_spill] sm:$0xff] %v10989_v49  ;;  %6183 = vmatpush.bf16.msrb.mxu1 %v10989_v49  ;;  %6196 = vmatpush.bf16.msrb.mxu2 %v10991_v45  ;;  %v11006_v49 = vor.u32 %v8937_v11, %v8492_v7  ;;  %v8936_v30 = vld [vmem:[#allocation27 + $0x84] sm:$0xf0]  ;;  %v8919_v34 = vld [vmem:[#allocation27 + $0x4] sm:$0xf] }
0x13aa   : > { %11510 = vst [vmem:[#allocation111_spill] sm:$0xff] %v10991_v45  ;;  %v11011_v45 = vor.u32 %v8920_v58, %v8418_v31  ;;  %v8420_v21 = vld [vmem:[#allocation27 + $0x8] sm:$0xf0]  ;;  %v11013_v33 = vor.u32 %v8936_v30, %v8482_v17  ;;  %v8935_v11 = vld [vmem:[#allocation27 + $0x84] sm:$0xf] }
0x13ab   : > { %11512 = vst [vmem:[#allocation113_spill] sm:$0xff] %v10999_v20  ;;  %6210 = vmatpush.bf16.msra.mxu0 %v11006_v49  ;;  %v11015_v36 = vor.u32 %v8919_v34, %v8420_v21  ;;  %v8484_v7 = vld [vmem:[#allocation27 + $0x88] sm:$0xf0]  ;;  %v5745_v31 = vld [vmem:[%s11519_s1] sm:$0x3]  ;;  %s1417_s1 = scalar_lea.vmem %s11597_s7, %s6896_s15 }
0x13ac   : > { %11513 = vst [vmem:[#allocation114_spill] sm:$0xff] %v11001_v44  ;;  %6171 = vmatpush.bf16.msra.mxu3 %v10999_v20  ;;  %v11038_v30 = vperm.slane %v5745_v31, 0  ;;  %v11041_v34 = vperm.slane %v5745_v31, 1 }
0x13ad   : > { %11514 = vst [vmem:[#allocation115_spill] sm:$0xff] %v11003_v63  ;;  %6184 = vmatpush.bf16.msrb.mxu1 %v11001_v44  ;;  %6197 = vmatpush.bf16.msrb.mxu2 %v11003_v63  ;;  %v11018_v44 = vor.u32 %v8935_v11, %v8484_v7 }
0x13ae   : > { %11515 = vst [vmem:[#allocation116_spill] sm:$0xff] %v11006_v49 }
0x13af   : > { %11516 = vst [vmem:[#allocation117_spill] sm:$0xff] %v11011_v45  ;;  %6211 = vmatpush.bf16.msra.mxu0 %v11018_v44 }
0x13b0   : > { %11517 = vst [vmem:[#allocation118_spill] sm:$0xff] %v11013_v33  ;;  %6172 = vmatpush.bf16.msra.mxu3 %v11011_v45 }
0x13b1   : > { %11518 = vst [vmem:[#allocation119_spill] sm:$0xff] %v11015_v36  ;;  %6185 = vmatpush.bf16.msrb.mxu1 %v11013_v33  ;;  %6198 = vmatpush.bf16.msrb.mxu2 %v11015_v36 }
0x13b3   : > { %6269 = vmatpush.bf16.msrb.mxu0 %v10795_v51 }
0x13b4   : > { %6224 = vmatpush.bf16.msrb.mxu3 %v10693_v39 }
0x13b5   : > { %6250 = vmatpush.bf16.msra.mxu2 %v10777_v4  ;;  %6243 = vmatpush.bf16.msra.mxu1 %v10754_v27 }
0x13b7   : > { %6270 = vmatpush.bf16.msrb.mxu0 %v10800_v57 }
0x13b8   : > { %6225 = vmatpush.bf16.msrb.mxu3 %v10696_v42 }
0x13b9   : > { %6251 = vmatpush.bf16.msra.mxu2 %v10780_v25  ;;  %6244 = vmatpush.bf16.msra.mxu1 %v10758_v10 }
0x13bc   : > { %6226 = vmatpush.bf16.msrb.mxu3 %v10699_v2 }
0x13bd   : > { %6252 = vmatpush.bf16.msra.mxu2 %v10783_v32 }
0x13c0   : > { %6227 = vmatpush.bf16.msrb.mxu3 %v10704_v60 }
0x13c1   : > { %6253 = vmatpush.bf16.msra.mxu2 %v10788_v40 }
0x13c4   : > { %6228 = vmatpush.bf16.msrb.mxu3 %v10709_v53 }
0x13c5   : > { %6254 = vmatpush.bf16.msra.mxu2 %v10791_v43 }
0x13c8   : > { %6229 = vmatpush.bf16.msrb.mxu3 %v10714_v38 }
0x13c9   : > { %6255 = vmatpush.bf16.msra.mxu2 %v10797_v54 }
0x13cc   : > { %6230 = vmatpush.bf16.msrb.mxu3 %v10717_v56 }
0x13cd   : > { %6256 = vmatpush.bf16.msra.mxu2 %v10803_v47 }
0x13d0   : > { %6231 = vmatpush.bf16.msrb.mxu3 %v10720_v59 }
0x13d1   : > { %6257 = vmatpush.bf16.msra.mxu2 %v10807_v26 }
0x141b   : > { %v5920_v58 = vpop.f32.mrf.mxu3  ;;  %v5946_v17 = vpop.f32.mrf.mxu2 }
0x141c   : > { %v5921_v21 = vadd.f32 %v5920_v58, %v11038_v30  ;;  %v5947_v11 = vadd.f32 %v5946_v17, %v11041_v34 }
0x1423   : > { %v5922_v7 = vpop.f32.mrf.mxu3  ;;  %v5933_v53 = vpop.f32.mrf.mxu1 }
0x1424   : > { %v5934_v40 = vadd.f32 %v5933_v53, %v5921_v21  ;;  %v5948_v43 = vpop.f32.mrf.mxu2  ;;  %v5959_v60 = vpop.f32.mrf.mxu0  ;;  %v11523_v53 = vld [vmem:[#allocation78_spill] sm:$0xff]  ;;  %v11528_v21 = vld [vmem:[#allocation91_spill] sm:$0xff] }
0x1425   : > { %v5960_v32 = vadd.f32 %v5959_v60, %v5947_v11  ;;  %v11521_v60 = vld [vmem:[#allocation88_spill] sm:$0xff]  ;;  %v11526_v43 = vld [vmem:[#allocation90_spill] sm:$0xff] }
0x1426   : > { %v5963_v2 = vmax.f32 %v5934_v40, 0.0  ;;  %v11525_v40 = vld [vmem:[#allocation79_spill] sm:$0xff]  ;;  %v11529_v11 = vld [vmem:[#allocation82_spill] sm:$0xff] }
0x1427   : > { %v5964_v31 = vmax.f32 %v5960_v32, 0.0  ;;  %v11524_v32 = vld [vmem:[#allocation89_spill] sm:$0xff] }
0x1428   : > { %v5965_v54 = vpack.c.bf16 %v5963_v2, %v5963_v2  ;;  %v11520_v2 = vld [vmem:[#allocation77_spill] sm:$0xff] }
0x1429   : > { %v5966_v58 = vpack.c.bf16 %v5964_v31, %v5964_v31  ;;  %v11530_v31 = vld [vmem:[#allocation92_spill] sm:$0xff] }
0x142a   : > { %6173 = vmatmul.bf16.vlgmr.msra.gmra.mxu3 %v5965_v54  ;;  %6199 = vmatmul.bf16.vlgmr.msrb.gmra.mxu2 %v5965_v54  ;;  %v11527_v54 = vld [vmem:[#allocation80_spill] sm:$0xff] }
0x142b   : > { %6186 = vmatmul.bf16.vlgmr.msrb.gmra.mxu1 %v5966_v58  ;;  %6212 = vmatmul.bf16.vlgmr.msra.gmra.mxu0 %v5966_v58  ;;  %v5935_v17 = vpop.f32.mrf.mxu1  ;;  %v11531_v58 = vld [vmem:[#allocation83_spill] sm:$0xff] }
0x142c   : > { %v5961_v7 = vpop.f32.mrf.mxu0  ;;  %6282 = vmatpush.bf16.msrb.mxu1 %v10810_v5  ;;  %6295 = vmatpush.bf16.msra.mxu3 %v10833_v0  ;;  %v11532_v17 = vld [vmem:[#allocation93_spill] sm:$0xff] }
0x142d   : > { %6308 = vmatpush.bf16.msra.mxu0 %v10812_v19  ;;  %6321 = vmatpush.bf16.msrb.mxu2 %v10835_v62  ;;  %v11533_v7 = vld [vmem:[#allocation86_spill] sm:$0xff] }
0x1430   : > { %6283 = vmatpush.bf16.msrb.mxu1 %v10815_v23  ;;  %6296 = vmatpush.bf16.msra.mxu3 %v10846_v16 }
0x1431   : > { %6309 = vmatpush.bf16.msra.mxu0 %v10818_v3  ;;  %6322 = vmatpush.bf16.msrb.mxu2 %v10849_v14 }
0x1434   : > { %6284 = vmatpush.bf16.msrb.mxu1 %v10821_v48  ;;  %6297 = vmatpush.bf16.msra.mxu3 %v10863_v50 }
0x1435   : > { %6310 = vmatpush.bf16.msra.mxu0 %v10824_v9  ;;  %6323 = vmatpush.bf16.msrb.mxu2 %v10866_v8 }
0x1438   : > { %6285 = vmatpush.bf16.msrb.mxu1 %v10828_v52  ;;  %6298 = vmatpush.bf16.msra.mxu3 %v10875_v22 }
0x1439   : > { %6311 = vmatpush.bf16.msra.mxu0 %v10831_v55  ;;  %6324 = vmatpush.bf16.msrb.mxu2 %v10878_v35 }
0x143c   : > { %6286 = vmatpush.bf16.msrb.mxu1 %v11520_v2  ;;  %6299 = vmatpush.bf16.msra.mxu3 %v11521_v60 }
0x143d   : > { %6312 = vmatpush.bf16.msra.mxu0 %v11523_v53  ;;  %6325 = vmatpush.bf16.msrb.mxu2 %v11524_v32  ;;  %v11534_v53 = vld [vmem:[#allocation94_spill] sm:$0xff]  ;;  %v11535_v32 = vld [vmem:[#allocation87_spill] sm:$0xff] }
0x1440   : > { %6287 = vmatpush.bf16.msrb.mxu1 %v11525_v40  ;;  %6300 = vmatpush.bf16.msra.mxu3 %v11526_v43  ;;  %v11536_v40 = vld [vmem:[#allocation95_spill] sm:$0xff] }
0x1441   : > { %6313 = vmatpush.bf16.msra.mxu0 %v11527_v54  ;;  %6326 = vmatpush.bf16.msrb.mxu2 %v11528_v21  ;;  %v5999_v43 = vld [vmem:[%s11522_s0] sm:$0x3] }
0x1442   : > { %v11083_v21 = vperm.slane %v5999_v43, 0 }
0x1444   : > { %6288 = vmatpush.bf16.msrb.mxu1 %v11529_v11  ;;  %6301 = vmatpush.bf16.msra.mxu3 %v11530_v31  ;;  %v11085_v11 = vperm.slane %v5999_v43, 1 }
0x1445   : > { %6314 = vmatpush.bf16.msra.mxu0 %v11531_v58  ;;  %6327 = vmatpush.bf16.msrb.mxu2 %v11532_v17 }
0x1448   : > { %6289 = vmatpush.bf16.msrb.mxu1 %v11533_v7  ;;  %6302 = vmatpush.bf16.msra.mxu3 %v11534_v53 }
0x1449   : > { %6315 = vmatpush.bf16.msra.mxu0 %v11535_v32  ;;  %6328 = vmatpush.bf16.msrb.mxu2 %v11536_v40  ;;  %v11537_v32 = vld [vmem:[#allocation67_spill] sm:$0xff]  ;;  %v11538_v40 = vld [vmem:[#allocation68_spill] sm:$0xff] }
0x14a8   : > { %v6187_v54 = vpop.f32.mrf.mxu1  ;;  %v6213_v60 = vpop.f32.mrf.mxu0 }
0x14ad   : > { %v6174_v31 = vpop.f32.mrf.mxu3  ;;  %v6200_v2 = vpop.f32.mrf.mxu2 }
0x14ae   : > { %v6175_v58 = vadd.f32 %v6174_v31, %v11083_v21  ;;  %v6201_v17 = vadd.f32 %v6200_v2, %v11085_v11  ;;  %v11540_v2 = vld [vmem:[#allocation97_spill] sm:$0xff] }
0x14b0   : > { %v6188_v7 = vadd.f32 %v6187_v54, %v6175_v58  ;;  %v6214_v35 = vadd.f32 %v6213_v60, %v6201_v17  ;;  %v6189_v53 = vpop.f32.mrf.mxu1  ;;  %v6215_v55 = vpop.f32.mrf.mxu0  ;;  %v11542_v60 = vld [vmem:[#allocation99_spill] sm:$0xff]  ;;  %v11549_v58 = vld [vmem:[#allocation112_spill] sm:$0xff]  ;;  %v11550_v17 = vld [vmem:[#allocation114_spill] sm:$0xff] }
0x14b1   : > { %v11539_v55 = vld [vmem:[#allocation96_spill] sm:$0xff]  ;;  %v11548_v54 = vld [vmem:[#allocation111_spill] sm:$0xff] }
0x14b2   : > { %v11090_v22 = vadd.f32 %v6188_v7, %v11537_v32  ;;  %v11093_v52 = vadd.f32 %v6214_v35, %v11538_v40  ;;  %v11541_v35 = vld [vmem:[#allocation98_spill] sm:$0xff]  ;;  %v11543_v53 = vld [vmem:[#allocation100_spill] sm:$0xff]  ;;  %v11546_v32 = vld [vmem:[#allocation109_spill] sm:$0xff] }
0x14b3   : > { %v11547_v40 = vld [vmem:[#allocation110_spill] sm:$0xff] }
0x14b4   : > { %v6219_v43 = vpack.c.bf16 %v11090_v22, %v11090_v22  ;;  %v6220_v8 = vpack.c.bf16 %v11093_v52, %v11093_v52 }
0x14b5   : > { %v6176_v9 = vpop.f32.mrf.mxu3  ;;  %v6202_v31 = vpop.f32.mrf.mxu2 }
0x14b6   : > { %6232 = vmatmul.bf16.vlgmr.msrb.gmra.mxu3 %v6219_v43  ;;  %8544 = vmatmul.msk.bf16.vlgmr.msra.gmra.mxu1 %vm5641_vm9, %v6220_v8  ;;  %v11544_v9 = vld [vmem:[#allocation101_spill] sm:$0xff] }
0x14b7   : > { %6258 = vmatmul.bf16.vlgmr.msra.gmra.mxu2 %v6219_v43  ;;  %8545 = vmatmul.msk.bf16.vlgmr.msrb.gmra.mxu0 %vm5641_vm9, %v6220_v8  ;;  %v11545_v8 = vld [vmem:[#allocation103_spill] sm:$0xff] }
0x14b8   : > { %6338 = vmatpush.bf16.msra.mxu1 %v11539_v55  ;;  %6351 = vmatpush.bf16.msrb.mxu3 %v11540_v2 }
0x14b9   : > { %6364 = vmatpush.bf16.msrb.mxu0 %v11541_v35  ;;  %6377 = vmatpush.bf16.msra.mxu2 %v11542_v60 }
0x14bc   : > { %6339 = vmatpush.bf16.msra.mxu1 %v11543_v53  ;;  %6352 = vmatpush.bf16.msrb.mxu3 %v10929_v24 }
0x14bd   : > { %6365 = vmatpush.bf16.msrb.mxu0 %v11544_v9  ;;  %6378 = vmatpush.bf16.msra.mxu2 %v10934_v46 }
0x14c0   : > { %6340 = vmatpush.bf16.msra.mxu1 %v10937_v1  ;;  %6353 = vmatpush.bf16.msrb.mxu3 %v10942_v37 }
0x14c1   : > { %6366 = vmatpush.bf16.msrb.mxu0 %v10944_v61  ;;  %6379 = vmatpush.bf16.msra.mxu2 %v10947_v18 }
0x14c4   : > { %6341 = vmatpush.bf16.msra.mxu1 %v10954_v6  ;;  %6354 = vmatpush.bf16.msrb.mxu3 %v10959_v15 }
0x14c5   : > { %6367 = vmatpush.bf16.msrb.mxu0 %v10961_v41  ;;  %6380 = vmatpush.bf16.msra.mxu2 %v11545_v8 }
0x14c8   : > { %6342 = vmatpush.bf16.msra.mxu1 %v10975_v28  ;;  %6355 = vmatpush.bf16.msrb.mxu3 %v10977_v29 }
0x14c9   : > { %6368 = vmatpush.bf16.msrb.mxu0 %v10979_v13  ;;  %6381 = vmatpush.bf16.msra.mxu2 %v10982_v12  ;;  %v11552_v12 = vld [vmem:[#allocation104_spill] sm:$0xff] }
0x14cc   : > { %6343 = vmatpush.bf16.msra.mxu1 %v11546_v32  ;;  %6356 = vmatpush.bf16.msrb.mxu3 %v11547_v40 }
0x14cd   : > { %6369 = vmatpush.bf16.msrb.mxu0 %v11548_v54  ;;  %6382 = vmatpush.bf16.msra.mxu2 %v11549_v58 }
0x14d0   : > { %6344 = vmatpush.bf16.msra.mxu1 %v10999_v20  ;;  %6357 = vmatpush.bf16.msrb.mxu3 %v11550_v17  ;;  %v11551_v17 = vld [vmem:[#allocation102_spill] sm:$0xff] }
0x14d1   : > { %6370 = vmatpush.bf16.msrb.mxu0 %v11003_v63  ;;  %6383 = vmatpush.bf16.msra.mxu2 %v11006_v49 }
0x14d4   : > { %6345 = vmatpush.bf16.msra.mxu1 %v11011_v45  ;;  %6358 = vmatpush.bf16.msrb.mxu3 %v11013_v33 }
0x14d5   : > { %6371 = vmatpush.bf16.msrb.mxu0 %v11015_v36  ;;  %6384 = vmatpush.bf16.msra.mxu2 %v11018_v44 }
0x1533   : > { %v6246_v7 = vpop.f32.mrf.mxu1 }
0x1534   : > { %v6272_v43 = vpop.f32.mrf.mxu0 }
0x1539   : > { %v6233_v31 = vpop.f32.mrf.mxu3 }
0x153a   : > { %v6247_v58 = vadd.f32 %v6246_v7, %v6233_v31  ;;  %v6259_v54 = vpop.f32.mrf.mxu2  ;;  %v11573_v7 = vld [vmem:[#allocation91_spill] sm:$0xff]  ;;  %v11575_v31 = vld [vmem:[#allocation92_spill] sm:$0xff] }
0x153b   : > { %v6273_v20 = vadd.f32 %v6272_v43, %v6259_v54  ;;  %v6248_v40 = vpop.f32.mrf.mxu1  ;;  %v11571_v54 = vld [vmem:[#allocation90_spill] sm:$0xff] }
0x153c   : > { %v6276_v32 = vadd.f32 %v6247_v58, %v11551_v17  ;;  %v6274_v63 = vpop.f32.mrf.mxu0  ;;  %v11560_v40 = vld [vmem:[#allocation74_spill] sm:$0xff]  ;;  %v11572_v58 = vld [vmem:[#allocation80_spill] sm:$0xff] }
0x153d   : > { %v6277_v49 = vadd.f32 %v6273_v20, %v11552_v12  ;;  %v11555_v63 = vld [vmem:[#allocation65_spill] sm:$0xff]  ;;  %v11574_v43 = vld [vmem:[#allocation82_spill] sm:$0xff] }
0x153e   : > { %v6278_v13 = vmax.f32 %v6276_v32, 0.0 }
0x153f   : > { %v6279_v45 = vmax.f32 %v6277_v49, 0.0 }
0x1540   : > { %v6280_v29 = vpack.c.bf16 %v6278_v13, %v6278_v13 }
0x1541   : > { %v6281_v33 = vpack.c.bf16 %v6279_v45, %v6279_v45  ;;  %v6235_v28 = vpop.f32.mrf.mxu3 }
0x1542   : > { %v6261_v36 = vpop.f32.mrf.mxu2  ;;  %6290 = vmatmul.bf16.vlgmr.msrb.gmra.mxu1 %v6280_v29  ;;  %6316 = vmatmul.bf16.vlgmr.msra.gmra.mxu0 %v6280_v29  ;;  %v11553_v28 = vld [vmem:[#allocation64_spill] sm:$0xff]  ;;  %v11554_v29 = vld [vmem:[#allocation70_spill] sm:$0xff] }
0x1543   : > { %6303 = vmatmul.bf16.vlgmr.msra.gmra.mxu3 %v6281_v33  ;;  %6329 = vmatmul.bf16.vlgmr.msrb.gmra.mxu2 %v6281_v33 }
0x1544   : > { %6397 = vmatpush.bf16.msrb.mxu1 %v10693_v39  ;;  %6423 = vmatpush.bf16.msra.mxu0 %v10777_v4  ;;  %v11556_v39 = vld [vmem:[#allocation71_spill] sm:$0xff]  ;;  %v11557_v4 = vld [vmem:[#allocation66_spill] sm:$0xff] }
0x1545   : > { %6416 = vmatpush.bf16.msra.mxu3 %v10754_v27  ;;  %6442 = vmatpush.bf16.msrb.mxu2 %v10795_v51  ;;  %v11558_v27 = vld [vmem:[#allocation72_spill] sm:$0xff] }
0x1548   : > { %6398 = vmatpush.bf16.msrb.mxu1 %v10696_v42  ;;  %6424 = vmatpush.bf16.msra.mxu0 %v10780_v25  ;;  %v11559_v42 = vld [vmem:[#allocation73_spill] sm:$0xff] }
0x1549   : > { %6417 = vmatpush.bf16.msra.mxu3 %v10758_v10  ;;  %6443 = vmatpush.bf16.msrb.mxu2 %v10800_v57 }
0x154c   : > { %6399 = vmatpush.bf16.msrb.mxu1 %v11553_v28  ;;  %6425 = vmatpush.bf16.msra.mxu0 %v11554_v29  ;;  %v11576_v28 = vld [vmem:[#allocation83_spill] sm:$0xff]  ;;  %v11577_v29 = vld [vmem:[#allocation93_spill] sm:$0xff] }
0x1550   : > { %6400 = vmatpush.bf16.msrb.mxu1 %v11555_v63  ;;  %6426 = vmatpush.bf16.msra.mxu0 %v11556_v39  ;;  %v11578_v63 = vld [vmem:[#allocation86_spill] sm:$0xff] }
0x1551   : > { %v11579_v39 = vld [vmem:[#allocation94_spill] sm:$0xff] }
0x1554   : > { %6401 = vmatpush.bf16.msrb.mxu1 %v11557_v4  ;;  %6427 = vmatpush.bf16.msra.mxu0 %v11558_v27  ;;  %v11580_v4 = vld [vmem:[#allocation87_spill] sm:$0xff] }
0x1555   : > { %v11581_v27 = vld [vmem:[#allocation95_spill] sm:$0xff] }
0x1558   : > { %6402 = vmatpush.bf16.msrb.mxu1 %v10714_v38  ;;  %6428 = vmatpush.bf16.msra.mxu0 %v11559_v42 }
0x155c   : > { %6403 = vmatpush.bf16.msrb.mxu1 %v10717_v56  ;;  %6429 = vmatpush.bf16.msra.mxu0 %v10803_v47 }
0x1560   : > { %6404 = vmatpush.bf16.msrb.mxu1 %v10720_v59  ;;  %6430 = vmatpush.bf16.msra.mxu0 %v10807_v26 }
0x15bf   : > { %v6291_v10 = vpop.f32.mrf.mxu1  ;;  %v6317_v25 = vpop.f32.mrf.mxu0 }
0x15c0   : > { %v6292_v51 = vadd.f32 %v6291_v10, %v11038_v30  ;;  %v6318_v57 = vadd.f32 %v6317_v25, %v11041_v34 }
0x15c6   : > { %v6304_v13 = vpop.f32.mrf.mxu3  ;;  %v6330_v36 = vpop.f32.mrf.mxu2 }
0x15c7   : > { %v6305_v49 = vadd.f32 %v6304_v13, %v6292_v51  ;;  %v6331_v38 = vadd.f32 %v6330_v36, %v6318_v57  ;;  %v6293_v45 = vpop.f32.mrf.mxu1  ;;  %v6319_v20 = vpop.f32.mrf.mxu0 }
0x15c9   : > { %v6334_v33 = vmax.f32 %v6305_v49, 0.0  ;;  %v6335_v56 = vmax.f32 %v6331_v38, 0.0 }
0x15cb   : > { %v6336_v32 = vpack.c.bf16 %v6334_v33, %v6334_v33  ;;  %v6337_v47 = vpack.c.bf16 %v6335_v56, %v6335_v56 }
0x15cd   : > { %6346 = vmatmul.bf16.vlgmr.msra.gmra.mxu1 %v6336_v32  ;;  %6359 = vmatmul.bf16.vlgmr.msrb.gmra.mxu3 %v6337_v47 }
0x15ce   : > { %6372 = vmatmul.bf16.vlgmr.msrb.gmra.mxu0 %v6336_v32  ;;  %6385 = vmatmul.bf16.vlgmr.msra.gmra.mxu2 %v6337_v47  ;;  %v6306_v59 = vpop.f32.mrf.mxu3  ;;  %v6332_v26 = vpop.f32.mrf.mxu2 }
0x15cf   : > { %6455 = vmatpush.bf16.msrb.mxu3 %v10810_v5  ;;  %6468 = vmatpush.bf16.msra.mxu1 %v10833_v0  ;;  %v11561_v5 = vld [vmem:[#allocation81_spill] sm:$0xff]  ;;  %v11562_v0 = vld [vmem:[#allocation75_spill] sm:$0xff] }
0x15d0   : > { %6481 = vmatpush.bf16.msra.mxu2 %v10812_v19  ;;  %6494 = vmatpush.bf16.msrb.mxu0 %v10835_v62  ;;  %v11563_v19 = vld [vmem:[#allocation84_spill] sm:$0xff] }
0x15d1   : > { %v11564_v62 = vld [vmem:[#allocation76_spill] sm:$0xff] }
0x15d3   : > { %6456 = vmatpush.bf16.msrb.mxu3 %v10815_v23  ;;  %6469 = vmatpush.bf16.msra.mxu1 %v10846_v16  ;;  %v11565_v23 = vld [vmem:[#allocation85_spill] sm:$0xff] }
0x15d4   : > { %6482 = vmatpush.bf16.msra.mxu2 %v10818_v3  ;;  %6495 = vmatpush.bf16.msrb.mxu0 %v10849_v14  ;;  %v11566_v16 = vld [vmem:[#allocation77_spill] sm:$0xff]  ;;  %v11567_v3 = vld [vmem:[#allocation88_spill] sm:$0xff]  ;;  %v11568_v14 = vld [vmem:[#allocation78_spill] sm:$0xff] }
0x15d7   : > { %6457 = vmatpush.bf16.msrb.mxu3 %v10821_v48  ;;  %6470 = vmatpush.bf16.msra.mxu1 %v10863_v50  ;;  %v11569_v48 = vld [vmem:[#allocation89_spill] sm:$0xff]  ;;  %v11570_v50 = vld [vmem:[#allocation79_spill] sm:$0xff] }
0x15d8   : > { %6483 = vmatpush.bf16.msra.mxu2 %v11560_v40  ;;  %6496 = vmatpush.bf16.msrb.mxu0 %v11561_v5 }
0x15db   : > { %6458 = vmatpush.bf16.msrb.mxu3 %v11562_v0  ;;  %6471 = vmatpush.bf16.msra.mxu1 %v11563_v19 }
0x15dc   : > { %6484 = vmatpush.bf16.msra.mxu2 %v11564_v62  ;;  %6497 = vmatpush.bf16.msrb.mxu0 %v11565_v23 }
0x15df   : > { %6459 = vmatpush.bf16.msrb.mxu3 %v11566_v16  ;;  %6472 = vmatpush.bf16.msra.mxu1 %v11567_v3 }
0x15e0   : > { %6485 = vmatpush.bf16.msra.mxu2 %v11568_v14  ;;  %6498 = vmatpush.bf16.msrb.mxu0 %v11569_v48 }
0x15e3   : > { %6460 = vmatpush.bf16.msrb.mxu3 %v11570_v50  ;;  %6473 = vmatpush.bf16.msra.mxu1 %v11571_v54 }
0x15e4   : > { %6486 = vmatpush.bf16.msra.mxu2 %v11572_v58  ;;  %6499 = vmatpush.bf16.msrb.mxu0 %v11573_v7 }
0x15e7   : > { %6461 = vmatpush.bf16.msrb.mxu3 %v11574_v43  ;;  %6474 = vmatpush.bf16.msra.mxu1 %v11575_v31 }
0x15e8   : > { %6487 = vmatpush.bf16.msra.mxu2 %v11576_v28  ;;  %6500 = vmatpush.bf16.msrb.mxu0 %v11577_v29 }
0x15eb   : > { %6462 = vmatpush.bf16.msrb.mxu3 %v11578_v63  ;;  %6475 = vmatpush.bf16.msra.mxu1 %v11579_v39 }
0x15ec   : > { %6488 = vmatpush.bf16.msra.mxu2 %v11580_v4  ;;  %6501 = vmatpush.bf16.msrb.mxu0 %v11581_v27 }
0x164a   : > { %v6347_v42 = vpop.f32.mrf.mxu1 }
0x164b   : > { %v6373_v10 = vpop.f32.mrf.mxu0  ;;  %v6348_v25 = vadd.f32 %v6347_v42, %v11083_v21 }
0x164c   : > { %v6374_v51 = vadd.f32 %v6373_v10, %v11085_v11 }
0x1650   : > { %v6360_v57 = vpop.f32.mrf.mxu3 }
0x1651   : > { %v6361_v13 = vadd.f32 %v6360_v57, %v6348_v25  ;;  %v6386_v36 = vpop.f32.mrf.mxu2 }
0x1652   : > { %v6387_v49 = vadd.f32 %v6386_v36, %v6374_v51  ;;  %v6349_v38 = vpop.f32.mrf.mxu1 }
0x1653   : > { %v11192_v45 = vadd.f32 %v6361_v13, %v11090_v22  ;;  %v6375_v20 = vpop.f32.mrf.mxu0  ;;  %v11583_v22 = vld [vmem:[#allocation106_spill] sm:$0xff] }
0x1654   : > { %v11195_v33 = vadd.f32 %v6387_v49, %v11093_v52  ;;  %v11582_v52 = vld [vmem:[#allocation105_spill] sm:$0xff] }
0x1655   : > { %v6392_v56 = vpack.c.bf16 %v11192_v45, %v11192_v45 }
0x1656   : > { %v6393_v32 = vpack.c.bf16 %v11195_v33, %v11195_v33 }
0x1657   : > { %6405 = vmatmul.bf16.vlgmr.msrb.gmra.mxu1 %v6392_v56  ;;  %6431 = vmatmul.bf16.vlgmr.msra.gmra.mxu0 %v6392_v56 }
0x1658   : > { %8546 = vmatmul.msk.bf16.vlgmr.msra.gmra.mxu3 %vm5641_vm9, %v6393_v32  ;;  %8547 = vmatmul.msk.bf16.vlgmr.msrb.gmra.mxu2 %vm5641_vm9, %v6393_v32  ;;  %v6362_v47 = vpop.f32.mrf.mxu3 }
0x1659   : > { %v6388_v59 = vpop.f32.mrf.mxu2  ;;  %6511 = vmatpush.bf16.msra.mxu3 %v11539_v55  ;;  %6524 = vmatpush.bf16.msrb.mxu1 %v11540_v2  ;;  %v11593_v55 = vld [vmem:[#allocation116_spill] sm:$0xff]  ;;  %v11594_v2 = vld [vmem:[#allocation117_spill] sm:$0xff] }
0x165a   : > { %6537 = vmatpush.bf16.msrb.mxu2 %v11541_v35  ;;  %6550 = vmatpush.bf16.msra.mxu0 %v11542_v60  ;;  %v11595_v35 = vld [vmem:[#allocation118_spill] sm:$0xff]  ;;  %v11596_v60 = vld [vmem:[#allocation119_spill] sm:$0xff] }
0x165d   : > { %6512 = vmatpush.bf16.msra.mxu3 %v11543_v53  ;;  %6525 = vmatpush.bf16.msrb.mxu1 %v10929_v24  ;;  %v11585_v24 = vld [vmem:[#allocation108_spill] sm:$0xff] }
0x165e   : > { %6538 = vmatpush.bf16.msrb.mxu2 %v11544_v9  ;;  %6551 = vmatpush.bf16.msra.mxu0 %v10934_v46  ;;  %v11584_v46 = vld [vmem:[#allocation107_spill] sm:$0xff] }
0x1661   : > { %6513 = vmatpush.bf16.msra.mxu3 %v10937_v1  ;;  %6526 = vmatpush.bf16.msrb.mxu1 %v10942_v37  ;;  %v11586_v1 = vld [vmem:[#allocation109_spill] sm:$0xff]  ;;  %v11587_v37 = vld [vmem:[#allocation110_spill] sm:$0xff] }
0x1662   : > { %6539 = vmatpush.bf16.msrb.mxu2 %v10944_v61  ;;  %6552 = vmatpush.bf16.msra.mxu0 %v10947_v18  ;;  %v11588_v61 = vld [vmem:[#allocation111_spill] sm:$0xff]  ;;  %v11589_v18 = vld [vmem:[#allocation112_spill] sm:$0xff] }
0x1665   : > { %6514 = vmatpush.bf16.msra.mxu3 %v10954_v6  ;;  %6527 = vmatpush.bf16.msrb.mxu1 %v10959_v15  ;;  %v11590_v6 = vld [vmem:[#allocation113_spill] sm:$0xff]  ;;  %v11591_v15 = vld [vmem:[#allocation114_spill] sm:$0xff] }
0x1666   : > { %6540 = vmatpush.bf16.msrb.mxu2 %v10961_v41  ;;  %6553 = vmatpush.bf16.msra.mxu0 %v11545_v8  ;;  %v11592_v41 = vld [vmem:[#allocation115_spill] sm:$0xff] }
0x1669   : > { %6515 = vmatpush.bf16.msra.mxu3 %v11582_v52  ;;  %6528 = vmatpush.bf16.msrb.mxu1 %v11583_v22 }
0x166a   : > { %6541 = vmatpush.bf16.msrb.mxu2 %v11584_v46  ;;  %6554 = vmatpush.bf16.msra.mxu0 %v11585_v24 }
0x166d   : > { %6516 = vmatpush.bf16.msra.mxu3 %v11586_v1  ;;  %6529 = vmatpush.bf16.msrb.mxu1 %v11587_v37 }
0x166e   : > { %6542 = vmatpush.bf16.msrb.mxu2 %v11588_v61  ;;  %6555 = vmatpush.bf16.msra.mxu0 %v11589_v18 }
0x1671   : > { %6517 = vmatpush.bf16.msra.mxu3 %v11590_v6  ;;  %6530 = vmatpush.bf16.msrb.mxu1 %v11591_v15 }
0x1672   : > { %6543 = vmatpush.bf16.msrb.mxu2 %v11592_v41  ;;  %6556 = vmatpush.bf16.msra.mxu0 %v11593_v55 }
0x1675   : > { %6518 = vmatpush.bf16.msra.mxu3 %v11594_v2  ;;  %6531 = vmatpush.bf16.msrb.mxu1 %v11595_v35 }
0x1676   : > { %6544 = vmatpush.bf16.msrb.mxu2 %v11596_v60  ;;  %6557 = vmatpush.bf16.msra.mxu0 %v11018_v44 }
0x16d4   : > { %v6406_v53 = vpop.f32.mrf.mxu1  ;;  %v6432_v9 = vpop.f32.mrf.mxu0 }
0x16db   : > { %v6419_v8 = vpop.f32.mrf.mxu3  ;;  %v6445_v26 = vpop.f32.mrf.mxu2 }
0x16dc   : > { %v6420_v40 = vadd.f32 %v6419_v8, %v6406_v53  ;;  %v6446_v5 = vadd.f32 %v6445_v26, %v6432_v9  ;;  %v6408_v0 = vpop.f32.mrf.mxu1  ;;  %v6434_v19 = vpop.f32.mrf.mxu0 }
0x16de   : > { %v6449_v62 = vadd.f32 %v6420_v40, %v11551_v17  ;;  %v6450_v23 = vadd.f32 %v6446_v5, %v11552_v12 }
0x16e0   : > { %v6451_v16 = vmax.f32 %v6449_v62, 0.0  ;;  %v6452_v3 = vmax.f32 %v6450_v23, 0.0 }
0x16e2   : > { %v6453_v14 = vpack.c.bf16 %v6451_v16, %v6451_v16  ;;  %v6454_v48 = vpack.c.bf16 %v6452_v3, %v6452_v3 }
0x16e3   : > { %v6421_v50 = vpop.f32.mrf.mxu3  ;;  %v6447_v54 = vpop.f32.mrf.mxu2 }
0x16e4   : > { %6463 = vmatmul.bf16.vlgmr.msrb.gmra.mxu3 %v6453_v14  ;;  %6476 = vmatmul.bf16.vlgmr.msra.gmra.mxu1 %v6454_v48 }
0x16e5   : > { %6489 = vmatmul.bf16.vlgmr.msra.gmra.mxu2 %v6453_v14  ;;  %6502 = vmatmul.bf16.vlgmr.msrb.gmra.mxu0 %v6454_v48 }
0x1761   : > { %v6477_v44 = vpop.f32.mrf.mxu1 }
0x1762   : > { %v6503_v58 = vpop.f32.mrf.mxu0 }
0x1767   : > { %v6464_v7 = vpop.f32.mrf.mxu3 }
0x1768   : > { %v6465_v43 = vadd.f32 %v6464_v7, %v11038_v30  ;;  %v6490_v31 = vpop.f32.mrf.mxu2 }
0x1769   : > { %v6491_v17 = vadd.f32 %v6490_v31, %v11041_v34  ;;  %v6479_v28 = vpop.f32.mrf.mxu1 }
0x176a   : > { %v6478_v12 = vadd.f32 %v6477_v44, %v6465_v43  ;;  %v6505_v29 = vpop.f32.mrf.mxu0 }
0x176b   : > { %v6504_v63 = vadd.f32 %v6503_v58, %v6491_v17 }
0x176c   : > { %v6507_v39 = vmax.f32 %v6478_v12, 0.0 }
0x176d   : > { %v6508_v4 = vmax.f32 %v6504_v63, 0.0 }
0x176e   : > { %v6509_v27 = vpack.c.bf16 %v6507_v39, %v6507_v39 }
0x176f   : > { %v6510_v42 = vpack.c.bf16 %v6508_v4, %v6508_v4  ;;  %v6466_v10 = vpop.f32.mrf.mxu3 }
0x1770   : > { %v6492_v25 = vpop.f32.mrf.mxu2  ;;  %6519 = vmatmul.bf16.vlgmr.msra.gmra.mxu3 %v6509_v27  ;;  %6545 = vmatmul.bf16.vlgmr.msrb.gmra.mxu2 %v6509_v27 }
0x1771   : > { %6532 = vmatmul.bf16.vlgmr.msrb.gmra.mxu1 %v6510_v42  ;;  %6558 = vmatmul.bf16.vlgmr.msra.gmra.mxu0 %v6510_v42 }
0x17ee   : > { %v6533_v30 = vpop.f32.mrf.mxu1  ;;  %v6559_v51 = vpop.f32.mrf.mxu0 }
0x17f3   : > { %v6520_v57 = vpop.f32.mrf.mxu3  ;;  %v6546_v34 = vpop.f32.mrf.mxu2 }
0x17f4   : > { %v6521_v13 = vadd.f32 %v6520_v57, %v11083_v21  ;;  %v6547_v36 = vadd.f32 %v6546_v34, %v11085_v11 }
0x17f6   : > { %v6534_v49 = vadd.f32 %v6533_v30, %v6521_v13  ;;  %v6560_v38 = vadd.f32 %v6559_v51, %v6547_v36  ;;  %v6535_v20 = vpop.f32.mrf.mxu1  ;;  %v6561_v56 = vpop.f32.mrf.mxu0 }
0x17f8   : > { %v6564_v32 = vadd.f32 %v6560_v38, %v11195_v33  ;;  %v6563_v47 = vadd.f32 %v6534_v49, %v11192_v45 }
0x17fa   : > { %v6567_v59 = vrot.slane %v6564_v32, 7 }
0x17fb   : > { %v6522_v52 = vpop.f32.mrf.mxu3  ;;  %v6548_v22 = vpop.f32.mrf.mxu2 }
0x17fc   : > { %v6568_v46 = vsel %vm4005_vm4, %v6563_v47, %v6567_v59 }
0x17fd   : > { %6570 = vst.msk [vmem:[%s1417_s1] sm:$0x3] %vm10742_vm5, %v6568_v46 }
0x17fe PF: > { %p94_p3 = scmp.ge.s32.totalorder %s10370_s28, 4   ;;  %s11599_s7 = smov %s9838_s10 }
0x17ff   : > { %s11600_s10 = smov %s9842_s11  ;;  %s11601_s11 = smov %s10381_s26 }
0x1800   : > { %s11602_s15 = smov %s10370_s28  ;;  %96 = sbr.rel (!%p94_p3) target bundleno = 79 (0x4f), region = 333 }
0x1805   :  { %6604 = vsyncpa [#allocation3], 1 }
0x1806   :  { %6606 = vsyncpa [#allocation3 + $0x1], 1 }
0x1807   :  { %6607 = vsyncpa [#allocation5], 1 }
0x1808   :  { %6608 = vsyncpa [#allocation8], 1 }
0x1809   :  { %6609 = vsyncpa [#allocation11], 1 }
0x180a   :  { %6610 = vsyncpa [#allocation14], 1 }
0x180b   :  { %6611 = vsyncpa [#allocation17], 1 }
0x180c   :  { %6612 = vsyncpa [#allocation20], 1 }
0x180d   :  { %6613 = vsyncpa [#allocation23], 1 }
0x180e   :  { %6614 = vsyncpa [#allocation26], 1 }

</bundles_post_ra>
